<compile_context>
chip_gen: v7x
topology: tpu7x:2x2x1
jax: 0.10.0
libtpu: 0.0.40
codegen_flags: <defaults>
</compile_context>

<pallas_src>
import jax
import jax.numpy as jnp
import numpy as np
from jax.experimental import pallas as pl
from jax.experimental.pallas import tpu as pltpu

# ---- static architecture constants (module defaults) -------------------------
SEQ_LEN = 110                      # shape = (1, 110)
SEQ_PAD = 128                      # lane-dense padded input width
N_FILTERS = 32                     # n_filters
N_HIDDEN = 32                      # n_hidden
C1, C2 = N_FILTERS, 2 * N_FILTERS  # 32, 64 conv channels
H1, H2 = 8 * N_HIDDEN, 2 * N_HIDDEN  # 256, 64 head widths
NOUT = 3
NOUT_PAD = 128                     # lane-dense padded output width
KS = 2                             # conv kernel size
G = 11                             # final MaxPool1d(3) length (flatten time dim)
Q = 5                              # pool1 outputs needed per final group
D = 4                              # conv2 outputs needed per final group
R = 3                              # conv3 outputs needed per final group
XWIN = 16                          # raw-input window needed per final group
XSTRIDE = 9                        # raw-input stride between final groups
BN_EPS = 1e-5


# ------------------------------- kernel ---------------------------------------
def _max3(z):
    """MaxPool1d(kernel=3, stride=3) over lanes ordered (r, ...): max of the
    three contiguous thirds of the lane axis."""
    w = z.shape[-1] // 3
    return jnp.maximum(jnp.maximum(z[:, :w], z[:, w:2 * w]), z[:, 2 * w:])


def cnn1d_kernel(x_ref,
                 w1_ref, b1_ref,
                 w2_ref, b2_ref,
                 w3_ref, b3_ref,
                 bn2s_ref, bn2t_ref,
                 wf1_ref, bf1_ref,
                 wf2_ref, bf2_ref,
                 wf3_ref, bf3_ref,
                 out_ref):
    bf16, f32 = jnp.bfloat16, jnp.float32

    x = x_ref[...]                              # (TILE_B, 128) bf16, lane-dense

    # Hoist every weight / bias / BN operand load out of the unrolled loops.
    w1, b1 = w1_ref[...], b1_ref[...]
    w2, b2 = w2_ref[...], b2_ref[...]
    w3, b3 = w3_ref[...], b3_ref[...]
    bn2s, bn2t = bn2s_ref[...], bn2t_ref[...]

    # ---- Stage 1: conv1 (+folded eval BN1) + ReLU + MaxPool1d(3) -------------
    # RHS = W1e stays staged across all 11 groups.
    p1s = []
    for g in range(G):
        xg = x[:, XSTRIDE * g: XSTRIDE * g + XWIN]          # (tb, 16)
        z1 = jnp.dot(xg, w1, preferred_element_type=f32) + b1   # (tb, 480) (r,q,c)
        # ReLU commutes with max-pool -> pool first (3x less ReLU work).
        p1s.append(jnp.maximum(_max3(z1), 0.0).astype(bf16))    # (tb, 160) (q,c)

    # ---- Stage 2: conv2 + ReLU (RHS = W2e staged across groups) --------------
    z2s = []
    for g in range(G):
        z2 = jnp.dot(p1s[g], w2, preferred_element_type=f32) + b2   # (tb, 256) (d,c)
        z2s.append(jnp.maximum(z2, 0.0).astype(bf16))

    # ---- Stage 3: conv3 + ReLU + eval BN2 + MaxPool1d(3) ---------------------
    p2s = []
    for g in range(G):
        z3 = jnp.dot(z2s[g], w3, preferred_element_type=f32) + b3   # (tb, 192) (r,c)
        z3 = jnp.maximum(z3, 0.0) * bn2s + bn2t
        p2s.append(_max3(z3).astype(bf16))                          # (tb, 64)

    # ---- Head: single K=704 fc1 matmul over the flattened (g, c) features ----
    flat = jnp.concatenate(p2s, axis=-1)                            # (tb, 704) bf16
    h = jnp.maximum(jnp.dot(flat, wf1_ref[...],
                            preferred_element_type=f32) + bf1_ref[...], 0.0)
    h = jnp.maximum(jnp.dot(h.astype(bf16), wf2_ref[...],
                            preferred_element_type=f32) + bf2_ref[...], 0.0)
    y = jnp.dot(h.astype(bf16), wf3_ref[...],
                preferred_element_type=f32) + bf3_ref[...]
    out_ref[...] = y.astype(out_ref.dtype)                          # (tb, 128)


# ------------------------- wrapper / weight preparation ------------------------
def build_kernel_operands(params):
    """Fold eval-mode BN, expand conv kernels into block-banded matmul weights
    for the grouped-lane layout, cast matmul operands to bf16 (f32 accumulation
    happens inside the kernel)."""
    (w1, b1), (g1, be1, m1, v1), (w2, b2), (w3, b3), (g2, be2, m2, v2), \
        (wf1, bf1), (wf2, bf2), (wf3, bf3) = params
    f32, bf16 = jnp.float32, jnp.bfloat16

    # BN1 folded into conv1 (conv then affine == conv with scaled weights/bias).
    s1 = g1 / jnp.sqrt(v1 + BN_EPS)                      # (C1,)
    w1f = (w1[:, 0, :] * s1[:, None]).T                  # (KS, C1)
    b1f = (b1 - m1) * s1 + be1                           # (C1,)

    # conv1 expanded: (XWIN, R*Q*C1); column (r, q, c) = conv1 out at local t=3q+r.
    W1e = jnp.zeros((XWIN, R * Q * C1), f32)
    for q in range(Q):
        for r in range(R):
            col = (r * Q + q) * C1
            for k in range(KS):
                W1e = W1e.at[3 * q + r + k, col:col + C1].set(w1f[k])
    b1e = jnp.tile(b1f, R * Q).reshape(1, -1)

    # conv2 expanded: (Q*C1, D*C2); column block d reads input blocks d, d+1.
    w2t = jnp.transpose(w2, (2, 1, 0))                   # (KS, C1, C2)
    W2e = jnp.zeros((Q * C1, D * C2), f32)
    for d in range(D):
        for k in range(KS):
            q = d + k
            W2e = W2e.at[q * C1:(q + 1) * C1, d * C2:(d + 1) * C2].set(w2t[k])
    b2e = jnp.tile(b2, D).reshape(1, -1)

    # conv3 expanded: (D*C2, R*C2).
    w3t = jnp.transpose(w3, (2, 1, 0))                   # (KS, C2, C2)
    W3e = jnp.zeros((D * C2, R * C2), f32)
    for r in range(R):
        for k in range(KS):
            d = r + k
            W3e = W3e.at[d * C2:(d + 1) * C2, r * C2:(r + 1) * C2].set(w3t[k])
    b3e = jnp.tile(b3, R).reshape(1, -1)

    # BN2 (eval) as per-channel scale/shift, tiled across the R conv3 slots.
    s2 = g2 / jnp.sqrt(v2 + BN_EPS)
    t2 = be2 - m2 * s2
    bn2s = jnp.tile(s2, R).reshape(1, -1)
    bn2t = jnp.tile(t2, R).reshape(1, -1)

    # head: PyTorch flatten of the (B, C2, G) body output is channel-major
    # (flat index = c*G + g); the kernel's concat is group-major (g*C2 + c),
    # so regroup fc1 into a flat (G*C2, H1) matrix with rows in (g, c) order.
    wf1k = jnp.transpose(wf1.reshape(H1, C2, G), (2, 1, 0)).reshape(G * C2, H1)
    wf2k = wf2.T                                         # (H1, H2)
    wf3k = jnp.zeros((H2, NOUT_PAD), f32).at[:, :NOUT].set(wf3.T)
    bf3k = jnp.zeros((1, NOUT_PAD), f32).at[0, :NOUT].set(bf3)

    return (W1e.astype(bf16), b1e,
            W2e.astype(bf16), b2e,
            W3e.astype(bf16), b3e,
            bn2s, bn2t,
            wf1k.astype(bf16), bf1.reshape(1, -1),
            wf2k.astype(bf16), bf2.reshape(1, -1),
            wf3k.astype(bf16), bf3k)


def _round_up(n, m):
    return ((n + m - 1) // m) * m


def _cdiv(a, b):
    return (a + b - 1) // b


def cnn1d_forward(x, params, *, tile_b=512):
    """x: (B, 1, 110) float32  ->  (B, 3) float32."""
    B = x.shape[0]
    # Lane-dense, bf16 input slab: (B_pad, 128).
    x_flat = x.reshape(B, SEQ_LEN).astype(jnp.bfloat16)

    # Tile the batch so that large batches give >= 2 grid steps (v7x megacore
    # gets both TensorCores busy); TILE_B is a multiple of 16 (bf16 sublanes).
    tb = min(tile_b, max(16, _round_up(_cdiv(B, 2), 16)))
    b_pad = _round_up(B, tb)
    x_flat = jnp.pad(x_flat, ((0, b_pad - B), (0, SEQ_PAD - SEQ_LEN)))

    operands = build_kernel_operands(params)

    c2 = lambda i: (0, 0)        # weights/biases: resident across grid steps
    in_specs = [
        pl.BlockSpec((tb, SEQ_PAD), lambda i: (i, 0)),   # x (batch-tiled)
        pl.BlockSpec((XWIN, R * Q * C1), c2),            # W1e
        pl.BlockSpec((1, R * Q * C1), c2),               # b1e
        pl.BlockSpec((Q * C1, D * C2), c2),              # W2e
        pl.BlockSpec((1, D * C2), c2),                   # b2e
        pl.BlockSpec((D * C2, R * C2), c2),              # W3e
        pl.BlockSpec((1, R * C2), c2),                   # b3e
        pl.BlockSpec((1, R * C2), c2),                   # BN2 scale
        pl.BlockSpec((1, R * C2), c2),                   # BN2 shift
        pl.BlockSpec((G * C2, H1), c2),                  # Wfc1 (flat, K=704)
        pl.BlockSpec((1, H1), c2),                       # bfc1
        pl.BlockSpec((H1, H2), c2),                      # Wfc2
        pl.BlockSpec((1, H2), c2),                       # bfc2
        pl.BlockSpec((H2, NOUT_PAD), c2),                # Wfc3 (N padded to 128)
        pl.BlockSpec((1, NOUT_PAD), c2),                 # bfc3 (padded)
    ]
    out_spec = pl.BlockSpec((tb, NOUT_PAD), lambda i: (i, 0))

    y_pad = pl.pallas_call(
        cnn1d_kernel,
        out_shape=jax.ShapeDtypeStruct((b_pad, NOUT_PAD), jnp.float32),
        grid=(b_pad // tb,),
        in_specs=in_specs,
        out_specs=out_spec,
        compiler_params=pltpu.CompilerParams(
            dimension_semantics=("parallel",),
            vmem_limit_bytes=48 * 1024 * 1024),
    )(x_flat, *operands)

    return y_pad[:B, :NOUT]


# -------------------------- synthetic params / reference -----------------------
def init_params(key):
    """Deterministic synthetic parameters in PyTorch layouts:
    Conv1d weight (Cout, Cin, K), Linear weight (out, in),
    BatchNorm as (gamma, beta, running_mean, running_var)."""
    def u(k, shape, fan_in):
        b = 1.0 / float(np.sqrt(fan_in))
        return jax.random.uniform(k, shape, jnp.float32, -b, b)

    def bn(k, c):
        kg, kb, km, kv = jax.random.split(k, 4)
        return (jax.random.uniform(kg, (c,), jnp.float32, 0.5, 1.5),
                jax.random.uniform(kb, (c,), jnp.float32, -0.2, 0.2),
                0.2 * jax.random.normal(km, (c,), jnp.float32),
                jax.random.uniform(kv, (c,), jnp.float32, 0.5, 1.5))

    ks = jax.random.split(key, 14)
    flat = C2 * G  # 704
    conv1 = (u(ks[0], (C1, 1, KS), 1 * KS), u(ks[1], (C1,), 1 * KS))
    bn1 = bn(ks[2], C1)
    conv2 = (u(ks[3], (C2, C1, KS), C1 * KS), u(ks[4], (C2,), C1 * KS))
    conv3 = (u(ks[5], (C2, C2, KS), C2 * KS), u(ks[6], (C2,), C2 * KS))
    bn2 = bn(ks[7], C2)
    fc1 = (u(ks[8], (H1, flat), flat), u(ks[9], (H1,), flat))
    fc2 = (u(ks[10], (H2, H1), H1), u(ks[11], (H2,), H1))
    fc3 = (u(ks[12], (NOUT, H2), H2), u(ks[13], (NOUT,), H2))
    return (conv1, bn1, conv2, conv3, bn2, fc1, fc2, fc3)


def cnn1d_reference(x, params):
    """Straightforward JAX mirror of the PyTorch forward (eval-mode BatchNorm).
    Matmul operands are cast to bf16 with f32 accumulation to mirror the
    kernel's precision policy."""
    f32, bf16 = jnp.float32, jnp.bfloat16
    (w1, b1), (g1, be1, m1, v1), (w2, b2), (w3, b3), (g2, be2, m2, v2), \
        (wf1, bf1), (wf2, bf2), (wf3, bf3) = params

    def conv1d(h, w, b):                                 # h: (B, Cin, L)
        k = w.shape[2]
        L = h.shape[2] - k + 1
        cols = jnp.stack([h[:, :, i:i + L] for i in range(k)], axis=-1)
        y = jnp.einsum('bcti,oci->bot', cols.astype(bf16), w.astype(bf16),
                       preferred_element_type=f32)
        return y + b[None, :, None]

    def bn_eval(h, g, bt, m, v):
        s = g / jnp.sqrt(v + BN_EPS)
        return h * s[None, :, None] + (bt - m * s)[None, :, None]

    def maxpool3(h):
        b, c, L = h.shape
        L3 = (L // 3) * 3
        return jnp.max(h[:, :, :L3].reshape(b, c, L3 // 3, 3), axis=-1)

    relu = lambda t: jnp.maximum(t, 0.0)

    h = maxpool3(relu(bn_eval(conv1d(x, w1, b1), g1, be1, m1, v1)))
    h = relu(conv1d(h, w2, b2))
    h = relu(conv1d(h, w3, b3))
    h = maxpool3(bn_eval(h, g2, be2, m2, v2))            # (B, 64, 11)
    flat = h.reshape(h.shape[0], -1)                     # channel-major flatten
    z = relu(jnp.dot(flat.astype(bf16), wf1.T.astype(bf16),
                     preferred_element_type=f32) + bf1)
    z = relu(jnp.dot(z.astype(bf16), wf2.T.astype(bf16),
                     preferred_element_type=f32) + bf2)
    return jnp.dot(z.astype(bf16), wf3.T.astype(bf16),
                   preferred_element_type=f32) + bf3


if __name__ == "__main__":
    root = jax.random.PRNGKey(0)
    kparams, kx = jax.random.split(root)

    B = 4
    x = jax.random.normal(kx, (B, 1, SEQ_LEN), dtype=jnp.float32)
    params = init_params(kparams)

    fwd = jax.jit(cnn1d_forward)
    y = jax.block_until_ready(fwd(x, params))

    y_ref = cnn1d_reference(x, params)
    assert y.shape == (B, NOUT)
    err = float(jnp.max(jnp.abs(y - y_ref)))
    assert jnp.allclose(y, y_ref, atol=3e-2, rtol=3e-2), \
        f"mismatch vs reference (max abs err {err})"
    print("KERNEL_OK")
</pallas_src>

<mosaic_0001>
module attributes {stable_mosaic.version = 11 : i64} {
  func.func @cnn1d_kernel(%arg0: i32, %arg1: memref<16x128xbf16, #tpu.memory_space<vmem>>, %arg2: memref<16x480xbf16, #tpu.memory_space<vmem>>, %arg3: memref<1x480xf32, #tpu.memory_space<vmem>>, %arg4: memref<160x256xbf16, #tpu.memory_space<vmem>>, %arg5: memref<1x256xf32, #tpu.memory_space<vmem>>, %arg6: memref<256x192xbf16, #tpu.memory_space<vmem>>, %arg7: memref<1x192xf32, #tpu.memory_space<vmem>>, %arg8: memref<1x192xf32, #tpu.memory_space<vmem>>, %arg9: memref<1x192xf32, #tpu.memory_space<vmem>>, %arg10: memref<704x256xbf16, #tpu.memory_space<vmem>>, %arg11: memref<1x256xf32, #tpu.memory_space<vmem>>, %arg12: memref<256x64xbf16, #tpu.memory_space<vmem>>, %arg13: memref<1x64xf32, #tpu.memory_space<vmem>>, %arg14: memref<64x128xbf16, #tpu.memory_space<vmem>>, %arg15: memref<1x128xf32, #tpu.memory_space<vmem>>, %arg16: memref<16x128xf32, #tpu.memory_space<vmem>>) attributes {dimension_semantics = [#tpu.dimension_semantics<parallel>], iteration_bounds = array<i64: 1>, scalar_prefetch = 0 : i64, scratch_operands = 0 : i64, tpu.core_type = #tpu.core_type<tc>, window_params = [{transform_indices = @transform_0, window_bounds = array<i64: 16, 128>}, {pipeline_mode = #tpu.pipeline_mode<synchronous>, transform_indices = @transform_1, window_bounds = array<i64: 16, 480>}, {pipeline_mode = #tpu.pipeline_mode<synchronous>, transform_indices = @transform_2, window_bounds = array<i64: 1, 480>}, {pipeline_mode = #tpu.pipeline_mode<synchronous>, transform_indices = @transform_3, window_bounds = array<i64: 160, 256>}, {pipeline_mode = #tpu.pipeline_mode<synchronous>, transform_indices = @transform_4, window_bounds = array<i64: 1, 256>}, {pipeline_mode = #tpu.pipeline_mode<synchronous>, transform_indices = @transform_5, window_bounds = array<i64: 256, 192>}, {pipeline_mode = #tpu.pipeline_mode<synchronous>, transform_indices = @transform_6, window_bounds = array<i64: 1, 192>}, {pipeline_mode = #tpu.pipeline_mode<synchronous>, transform_indices = @transform_7, window_bounds = array<i64: 1, 192>}, {pipeline_mode = #tpu.pipeline_mode<synchronous>, transform_indices = @transform_8, window_bounds = array<i64: 1, 192>}, {pipeline_mode = #tpu.pipeline_mode<synchronous>, transform_indices = @transform_9, window_bounds = array<i64: 704, 256>}, {pipeline_mode = #tpu.pipeline_mode<synchronous>, transform_indices = @transform_10, window_bounds = array<i64: 1, 256>}, {pipeline_mode = #tpu.pipeline_mode<synchronous>, transform_indices = @transform_11, window_bounds = array<i64: 256, 64>}, {pipeline_mode = #tpu.pipeline_mode<synchronous>, transform_indices = @transform_12, window_bounds = array<i64: 1, 64>}, {pipeline_mode = #tpu.pipeline_mode<synchronous>, transform_indices = @transform_13, window_bounds = array<i64: 64, 128>}, {pipeline_mode = #tpu.pipeline_mode<synchronous>, transform_indices = @transform_14, window_bounds = array<i64: 1, 128>}, {transform_indices = @transform_15, window_bounds = array<i64: 16, 128>}]} {
    %c0 = arith.constant 0 : index
    %c0_0 = arith.constant 0 : index
    %0 = vector.load %arg1[%c0, %c0_0] : memref<16x128xbf16, #tpu.memory_space<vmem>>, vector<16x128xbf16>
    %c0_1 = arith.constant 0 : index
    %c0_2 = arith.constant 0 : index
    %1 = vector.load %arg2[%c0_1, %c0_2] : memref<16x480xbf16, #tpu.memory_space<vmem>>, vector<16x480xbf16>
    %c0_3 = arith.constant 0 : index
    %c0_4 = arith.constant 0 : index
    %2 = vector.load %arg3[%c0_3, %c0_4] : memref<1x480xf32, #tpu.memory_space<vmem>>, vector<1x480xf32>
    %c0_5 = arith.constant 0 : index
    %c0_6 = arith.constant 0 : index
    %3 = vector.load %arg4[%c0_5, %c0_6] : memref<160x256xbf16, #tpu.memory_space<vmem>>, vector<160x256xbf16>
    %c0_7 = arith.constant 0 : index
    %c0_8 = arith.constant 0 : index
    %4 = vector.load %arg5[%c0_7, %c0_8] : memref<1x256xf32, #tpu.memory_space<vmem>>, vector<1x256xf32>
    %c0_9 = arith.constant 0 : index
    %c0_10 = arith.constant 0 : index
    %5 = vector.load %arg6[%c0_9, %c0_10] : memref<256x192xbf16, #tpu.memory_space<vmem>>, vector<256x192xbf16>
    %c0_11 = arith.constant 0 : index
    %c0_12 = arith.constant 0 : index
    %6 = vector.load %arg7[%c0_11, %c0_12] : memref<1x192xf32, #tpu.memory_space<vmem>>, vector<1x192xf32>
    %c0_13 = arith.constant 0 : index
    %c0_14 = arith.constant 0 : index
    %7 = vector.load %arg8[%c0_13, %c0_14] : memref<1x192xf32, #tpu.memory_space<vmem>>, vector<1x192xf32>
    %c0_15 = arith.constant 0 : index
    %c0_16 = arith.constant 0 : index
    %8 = vector.load %arg9[%c0_15, %c0_16] : memref<1x192xf32, #tpu.memory_space<vmem>>, vector<1x192xf32>
    %9 = vector.extract_strided_slice %0 {offsets = [0, 0], sizes = [16, 16], strides = [1, 1]} : vector<16x128xbf16> to vector<16x16xbf16>
    %cst = arith.constant dense<0.000000e+00> : vector<16x480xf32>
    %10 = tpu.matmul %9, %1, %cst {dimension_numbers = #tpu.dot_dimension_numbers<[1], [0], [0], [1], [0, 0, 1, 1], [], []>} : vector<16x16xbf16>, vector<16x480xbf16>, vector<16x480xf32> -> vector<16x480xf32>
    %11 = vector.broadcast %2 : vector<1x480xf32> to vector<16x480xf32>
    %12 = arith.addf %10, %11 : vector<16x480xf32>
    %13 = vector.extract_strided_slice %12 {offsets = [0, 0], sizes = [16, 160], strides = [1, 1]} : vector<16x480xf32> to vector<16x160xf32>
    %14 = vector.extract_strided_slice %12 {offsets = [0, 160], sizes = [16, 160], strides = [1, 1]} : vector<16x480xf32> to vector<16x160xf32>
    %15 = arith.maximumf %13, %14 : vector<16x160xf32>
    %16 = vector.extract_strided_slice %12 {offsets = [0, 320], sizes = [16, 160], strides = [1, 1]} : vector<16x480xf32> to vector<16x160xf32>
    %17 = arith.maximumf %15, %16 : vector<16x160xf32>
    %cst_17 = arith.constant 0.000000e+00 : f32
    %18 = vector.broadcast %cst_17 : f32 to vector<16x160xf32>
    %19 = arith.maximumf %17, %18 : vector<16x160xf32>
    %20 = arith.truncf %19 : vector<16x160xf32> to vector<16x160xbf16>
    %21 = vector.extract_strided_slice %0 {offsets = [0, 9], sizes = [16, 16], strides = [1, 1]} : vector<16x128xbf16> to vector<16x16xbf16>
    %cst_18 = arith.constant dense<0.000000e+00> : vector<16x480xf32>
    %22 = tpu.matmul %21, %1, %cst_18 {dimension_numbers = #tpu.dot_dimension_numbers<[1], [0], [0], [1], [0, 0, 1, 1], [], []>} : vector<16x16xbf16>, vector<16x480xbf16>, vector<16x480xf32> -> vector<16x480xf32>
    %23 = vector.broadcast %2 : vector<1x480xf32> to vector<16x480xf32>
    %24 = arith.addf %22, %23 : vector<16x480xf32>
    %25 = vector.extract_strided_slice %24 {offsets = [0, 0], sizes = [16, 160], strides = [1, 1]} : vector<16x480xf32> to vector<16x160xf32>
    %26 = vector.extract_strided_slice %24 {offsets = [0, 160], sizes = [16, 160], strides = [1, 1]} : vector<16x480xf32> to vector<16x160xf32>
    %27 = arith.maximumf %25, %26 : vector<16x160xf32>
    %28 = vector.extract_strided_slice %24 {offsets = [0, 320], sizes = [16, 160], strides = [1, 1]} : vector<16x480xf32> to vector<16x160xf32>
    %29 = arith.maximumf %27, %28 : vector<16x160xf32>
    %cst_19 = arith.constant 0.000000e+00 : f32
    %30 = vector.broadcast %cst_19 : f32 to vector<16x160xf32>
    %31 = arith.maximumf %29, %30 : vector<16x160xf32>
    %32 = arith.truncf %31 : vector<16x160xf32> to vector<16x160xbf16>
    %33 = vector.extract_strided_slice %0 {offsets = [0, 18], sizes = [16, 16], strides = [1, 1]} : vector<16x128xbf16> to vector<16x16xbf16>
    %cst_20 = arith.constant dense<0.000000e+00> : vector<16x480xf32>
    %34 = tpu.matmul %33, %1, %cst_20 {dimension_numbers = #tpu.dot_dimension_numbers<[1], [0], [0], [1], [0, 0, 1, 1], [], []>} : vector<16x16xbf16>, vector<16x480xbf16>, vector<16x480xf32> -> vector<16x480xf32>
    %35 = vector.broadcast %2 : vector<1x480xf32> to vector<16x480xf32>
    %36 = arith.addf %34, %35 : vector<16x480xf32>
    %37 = vector.extract_strided_slice %36 {offsets = [0, 0], sizes = [16, 160], strides = [1, 1]} : vector<16x480xf32> to vector<16x160xf32>
    %38 = vector.extract_strided_slice %36 {offsets = [0, 160], sizes = [16, 160], strides = [1, 1]} : vector<16x480xf32> to vector<16x160xf32>
    %39 = arith.maximumf %37, %38 : vector<16x160xf32>
    %40 = vector.extract_strided_slice %36 {offsets = [0, 320], sizes = [16, 160], strides = [1, 1]} : vector<16x480xf32> to vector<16x160xf32>
    %41 = arith.maximumf %39, %40 : vector<16x160xf32>
    %cst_21 = arith.constant 0.000000e+00 : f32
    %42 = vector.broadcast %cst_21 : f32 to vector<16x160xf32>
    %43 = arith.maximumf %41, %42 : vector<16x160xf32>
    %44 = arith.truncf %43 : vector<16x160xf32> to vector<16x160xbf16>
    %45 = vector.extract_strided_slice %0 {offsets = [0, 27], sizes = [16, 16], strides = [1, 1]} : vector<16x128xbf16> to vector<16x16xbf16>
    %cst_22 = arith.constant dense<0.000000e+00> : vector<16x480xf32>
    %46 = tpu.matmul %45, %1, %cst_22 {dimension_numbers = #tpu.dot_dimension_numbers<[1], [0], [0], [1], [0, 0, 1, 1], [], []>} : vector<16x16xbf16>, vector<16x480xbf16>, vector<16x480xf32> -> vector<16x480xf32>
    %47 = vector.broadcast %2 : vector<1x480xf32> to vector<16x480xf32>
    %48 = arith.addf %46, %47 : vector<16x480xf32>
    %49 = vector.extract_strided_slice %48 {offsets = [0, 0], sizes = [16, 160], strides = [1, 1]} : vector<16x480xf32> to vector<16x160xf32>
    %50 = vector.extract_strided_slice %48 {offsets = [0, 160], sizes = [16, 160], strides = [1, 1]} : vector<16x480xf32> to vector<16x160xf32>
    %51 = arith.maximumf %49, %50 : vector<16x160xf32>
    %52 = vector.extract_strided_slice %48 {offsets = [0, 320], sizes = [16, 160], strides = [1, 1]} : vector<16x480xf32> to vector<16x160xf32>
    %53 = arith.maximumf %51, %52 : vector<16x160xf32>
    %cst_23 = arith.constant 0.000000e+00 : f32
    %54 = vector.broadcast %cst_23 : f32 to vector<16x160xf32>
    %55 = arith.maximumf %53, %54 : vector<16x160xf32>
    %56 = arith.truncf %55 : vector<16x160xf32> to vector<16x160xbf16>
    %57 = vector.extract_strided_slice %0 {offsets = [0, 36], sizes = [16, 16], strides = [1, 1]} : vector<16x128xbf16> to vector<16x16xbf16>
    %cst_24 = arith.constant dense<0.000000e+00> : vector<16x480xf32>
    %58 = tpu.matmul %57, %1, %cst_24 {dimension_numbers = #tpu.dot_dimension_numbers<[1], [0], [0], [1], [0, 0, 1, 1], [], []>} : vector<16x16xbf16>, vector<16x480xbf16>, vector<16x480xf32> -> vector<16x480xf32>
    %59 = vector.broadcast %2 : vector<1x480xf32> to vector<16x480xf32>
    %60 = arith.addf %58, %59 : vector<16x480xf32>
    %61 = vector.extract_strided_slice %60 {offsets = [0, 0], sizes = [16, 160], strides = [1, 1]} : vector<16x480xf32> to vector<16x160xf32>
    %62 = vector.extract_strided_slice %60 {offsets = [0, 160], sizes = [16, 160], strides = [1, 1]} : vector<16x480xf32> to vector<16x160xf32>
    %63 = arith.maximumf %61, %62 : vector<16x160xf32>
    %64 = vector.extract_strided_slice %60 {offsets = [0, 320], sizes = [16, 160], strides = [1, 1]} : vector<16x480xf32> to vector<16x160xf32>
    %65 = arith.maximumf %63, %64 : vector<16x160xf32>
    %cst_25 = arith.constant 0.000000e+00 : f32
    %66 = vector.broadcast %cst_25 : f32 to vector<16x160xf32>
    %67 = arith.maximumf %65, %66 : vector<16x160xf32>
    %68 = arith.truncf %67 : vector<16x160xf32> to vector<16x160xbf16>
    %69 = vector.extract_strided_slice %0 {offsets = [0, 45], sizes = [16, 16], strides = [1, 1]} : vector<16x128xbf16> to vector<16x16xbf16>
    %cst_26 = arith.constant dense<0.000000e+00> : vector<16x480xf32>
    %70 = tpu.matmul %69, %1, %cst_26 {dimension_numbers = #tpu.dot_dimension_numbers<[1], [0], [0], [1], [0, 0, 1, 1], [], []>} : vector<16x16xbf16>, vector<16x480xbf16>, vector<16x480xf32> -> vector<16x480xf32>
    %71 = vector.broadcast %2 : vector<1x480xf32> to vector<16x480xf32>
    %72 = arith.addf %70, %71 : vector<16x480xf32>
    %73 = vector.extract_strided_slice %72 {offsets = [0, 0], sizes = [16, 160], strides = [1, 1]} : vector<16x480xf32> to vector<16x160xf32>
    %74 = vector.extract_strided_slice %72 {offsets = [0, 160], sizes = [16, 160], strides = [1, 1]} : vector<16x480xf32> to vector<16x160xf32>
    %75 = arith.maximumf %73, %74 : vector<16x160xf32>
    %76 = vector.extract_strided_slice %72 {offsets = [0, 320], sizes = [16, 160], strides = [1, 1]} : vector<16x480xf32> to vector<16x160xf32>
    %77 = arith.maximumf %75, %76 : vector<16x160xf32>
    %cst_27 = arith.constant 0.000000e+00 : f32
    %78 = vector.broadcast %cst_27 : f32 to vector<16x160xf32>
    %79 = arith.maximumf %77, %78 : vector<16x160xf32>
    %80 = arith.truncf %79 : vector<16x160xf32> to vector<16x160xbf16>
    %81 = vector.extract_strided_slice %0 {offsets = [0, 54], sizes = [16, 16], strides = [1, 1]} : vector<16x128xbf16> to vector<16x16xbf16>
    %cst_28 = arith.constant dense<0.000000e+00> : vector<16x480xf32>
    %82 = tpu.matmul %81, %1, %cst_28 {dimension_numbers = #tpu.dot_dimension_numbers<[1], [0], [0], [1], [0, 0, 1, 1], [], []>} : vector<16x16xbf16>, vector<16x480xbf16>, vector<16x480xf32> -> vector<16x480xf32>
    %83 = vector.broadcast %2 : vector<1x480xf32> to vector<16x480xf32>
    %84 = arith.addf %82, %83 : vector<16x480xf32>
    %85 = vector.extract_strided_slice %84 {offsets = [0, 0], sizes = [16, 160], strides = [1, 1]} : vector<16x480xf32> to vector<16x160xf32>
    %86 = vector.extract_strided_slice %84 {offsets = [0, 160], sizes = [16, 160], strides = [1, 1]} : vector<16x480xf32> to vector<16x160xf32>
    %87 = arith.maximumf %85, %86 : vector<16x160xf32>
    %88 = vector.extract_strided_slice %84 {offsets = [0, 320], sizes = [16, 160], strides = [1, 1]} : vector<16x480xf32> to vector<16x160xf32>
    %89 = arith.maximumf %87, %88 : vector<16x160xf32>
    %cst_29 = arith.constant 0.000000e+00 : f32
    %90 = vector.broadcast %cst_29 : f32 to vector<16x160xf32>
    %91 = arith.maximumf %89, %90 : vector<16x160xf32>
    %92 = arith.truncf %91 : vector<16x160xf32> to vector<16x160xbf16>
    %93 = vector.extract_strided_slice %0 {offsets = [0, 63], sizes = [16, 16], strides = [1, 1]} : vector<16x128xbf16> to vector<16x16xbf16>
    %cst_30 = arith.constant dense<0.000000e+00> : vector<16x480xf32>
    %94 = tpu.matmul %93, %1, %cst_30 {dimension_numbers = #tpu.dot_dimension_numbers<[1], [0], [0], [1], [0, 0, 1, 1], [], []>} : vector<16x16xbf16>, vector<16x480xbf16>, vector<16x480xf32> -> vector<16x480xf32>
    %95 = vector.broadcast %2 : vector<1x480xf32> to vector<16x480xf32>
    %96 = arith.addf %94, %95 : vector<16x480xf32>
    %97 = vector.extract_strided_slice %96 {offsets = [0, 0], sizes = [16, 160], strides = [1, 1]} : vector<16x480xf32> to vector<16x160xf32>
    %98 = vector.extract_strided_slice %96 {offsets = [0, 160], sizes = [16, 160], strides = [1, 1]} : vector<16x480xf32> to vector<16x160xf32>
    %99 = arith.maximumf %97, %98 : vector<16x160xf32>
    %100 = vector.extract_strided_slice %96 {offsets = [0, 320], sizes = [16, 160], strides = [1, 1]} : vector<16x480xf32> to vector<16x160xf32>
    %101 = arith.maximumf %99, %100 : vector<16x160xf32>
    %cst_31 = arith.constant 0.000000e+00 : f32
    %102 = vector.broadcast %cst_31 : f32 to vector<16x160xf32>
    %103 = arith.maximumf %101, %102 : vector<16x160xf32>
    %104 = arith.truncf %103 : vector<16x160xf32> to vector<16x160xbf16>
    %105 = vector.extract_strided_slice %0 {offsets = [0, 72], sizes = [16, 16], strides = [1, 1]} : vector<16x128xbf16> to vector<16x16xbf16>
    %cst_32 = arith.constant dense<0.000000e+00> : vector<16x480xf32>
    %106 = tpu.matmul %105, %1, %cst_32 {dimension_numbers = #tpu.dot_dimension_numbers<[1], [0], [0], [1], [0, 0, 1, 1], [], []>} : vector<16x16xbf16>, vector<16x480xbf16>, vector<16x480xf32> -> vector<16x480xf32>
    %107 = vector.broadcast %2 : vector<1x480xf32> to vector<16x480xf32>
    %108 = arith.addf %106, %107 : vector<16x480xf32>
    %109 = vector.extract_strided_slice %108 {offsets = [0, 0], sizes = [16, 160], strides = [1, 1]} : vector<16x480xf32> to vector<16x160xf32>
    %110 = vector.extract_strided_slice %108 {offsets = [0, 160], sizes = [16, 160], strides = [1, 1]} : vector<16x480xf32> to vector<16x160xf32>
    %111 = arith.maximumf %109, %110 : vector<16x160xf32>
    %112 = vector.extract_strided_slice %108 {offsets = [0, 320], sizes = [16, 160], strides = [1, 1]} : vector<16x480xf32> to vector<16x160xf32>
    %113 = arith.maximumf %111, %112 : vector<16x160xf32>
    %cst_33 = arith.constant 0.000000e+00 : f32
    %114 = vector.broadcast %cst_33 : f32 to vector<16x160xf32>
    %115 = arith.maximumf %113, %114 : vector<16x160xf32>
    %116 = arith.truncf %115 : vector<16x160xf32> to vector<16x160xbf16>
    %117 = vector.extract_strided_slice %0 {offsets = [0, 81], sizes = [16, 16], strides = [1, 1]} : vector<16x128xbf16> to vector<16x16xbf16>
    %cst_34 = arith.constant dense<0.000000e+00> : vector<16x480xf32>
    %118 = tpu.matmul %117, %1, %cst_34 {dimension_numbers = #tpu.dot_dimension_numbers<[1], [0], [0], [1], [0, 0, 1, 1], [], []>} : vector<16x16xbf16>, vector<16x480xbf16>, vector<16x480xf32> -> vector<16x480xf32>
    %119 = vector.broadcast %2 : vector<1x480xf32> to vector<16x480xf32>
    %120 = arith.addf %118, %119 : vector<16x480xf32>
    %121 = vector.extract_strided_slice %120 {offsets = [0, 0], sizes = [16, 160], strides = [1, 1]} : vector<16x480xf32> to vector<16x160xf32>
    %122 = vector.extract_strided_slice %120 {offsets = [0, 160], sizes = [16, 160], strides = [1, 1]} : vector<16x480xf32> to vector<16x160xf32>
    %123 = arith.maximumf %121, %122 : vector<16x160xf32>
    %124 = vector.extract_strided_slice %120 {offsets = [0, 320], sizes = [16, 160], strides = [1, 1]} : vector<16x480xf32> to vector<16x160xf32>
    %125 = arith.maximumf %123, %124 : vector<16x160xf32>
    %cst_35 = arith.constant 0.000000e+00 : f32
    %126 = vector.broadcast %cst_35 : f32 to vector<16x160xf32>
    %127 = arith.maximumf %125, %126 : vector<16x160xf32>
    %128 = arith.truncf %127 : vector<16x160xf32> to vector<16x160xbf16>
    %129 = vector.extract_strided_slice %0 {offsets = [0, 90], sizes = [16, 16], strides = [1, 1]} : vector<16x128xbf16> to vector<16x16xbf16>
    %cst_36 = arith.constant dense<0.000000e+00> : vector<16x480xf32>
    %130 = tpu.matmul %129, %1, %cst_36 {dimension_numbers = #tpu.dot_dimension_numbers<[1], [0], [0], [1], [0, 0, 1, 1], [], []>} : vector<16x16xbf16>, vector<16x480xbf16>, vector<16x480xf32> -> vector<16x480xf32>
    %131 = vector.broadcast %2 : vector<1x480xf32> to vector<16x480xf32>
    %132 = arith.addf %130, %131 : vector<16x480xf32>
    %133 = vector.extract_strided_slice %132 {offsets = [0, 0], sizes = [16, 160], strides = [1, 1]} : vector<16x480xf32> to vector<16x160xf32>
    %134 = vector.extract_strided_slice %132 {offsets = [0, 160], sizes = [16, 160], strides = [1, 1]} : vector<16x480xf32> to vector<16x160xf32>
    %135 = arith.maximumf %133, %134 : vector<16x160xf32>
    %136 = vector.extract_strided_slice %132 {offsets = [0, 320], sizes = [16, 160], strides = [1, 1]} : vector<16x480xf32> to vector<16x160xf32>
    %137 = arith.maximumf %135, %136 : vector<16x160xf32>
    %cst_37 = arith.constant 0.000000e+00 : f32
    %138 = vector.broadcast %cst_37 : f32 to vector<16x160xf32>
    %139 = arith.maximumf %137, %138 : vector<16x160xf32>
    %140 = arith.truncf %139 : vector<16x160xf32> to vector<16x160xbf16>
    %cst_38 = arith.constant dense<0.000000e+00> : vector<16x256xf32>
    %141 = tpu.matmul %20, %3, %cst_38 {dimension_numbers = #tpu.dot_dimension_numbers<[1], [0], [0], [1], [0, 0, 1, 1], [], []>} : vector<16x160xbf16>, vector<160x256xbf16>, vector<16x256xf32> -> vector<16x256xf32>
    %142 = vector.broadcast %4 : vector<1x256xf32> to vector<16x256xf32>
    %143 = arith.addf %141, %142 : vector<16x256xf32>
    %cst_39 = arith.constant 0.000000e+00 : f32
    %144 = vector.broadcast %cst_39 : f32 to vector<16x256xf32>
    %145 = arith.maximumf %143, %144 : vector<16x256xf32>
    %146 = arith.truncf %145 : vector<16x256xf32> to vector<16x256xbf16>
    %cst_40 = arith.constant dense<0.000000e+00> : vector<16x256xf32>
    %147 = tpu.matmul %32, %3, %cst_40 {dimension_numbers = #tpu.dot_dimension_numbers<[1], [0], [0], [1], [0, 0, 1, 1], [], []>} : vector<16x160xbf16>, vector<160x256xbf16>, vector<16x256xf32> -> vector<16x256xf32>
    %148 = vector.broadcast %4 : vector<1x256xf32> to vector<16x256xf32>
    %149 = arith.addf %147, %148 : vector<16x256xf32>
    %cst_41 = arith.constant 0.000000e+00 : f32
    %150 = vector.broadcast %cst_41 : f32 to vector<16x256xf32>
    %151 = arith.maximumf %149, %150 : vector<16x256xf32>
    %152 = arith.truncf %151 : vector<16x256xf32> to vector<16x256xbf16>
    %cst_42 = arith.constant dense<0.000000e+00> : vector<16x256xf32>
    %153 = tpu.matmul %44, %3, %cst_42 {dimension_numbers = #tpu.dot_dimension_numbers<[1], [0], [0], [1], [0, 0, 1, 1], [], []>} : vector<16x160xbf16>, vector<160x256xbf16>, vector<16x256xf32> -> vector<16x256xf32>
    %154 = vector.broadcast %4 : vector<1x256xf32> to vector<16x256xf32>
    %155 = arith.addf %153, %154 : vector<16x256xf32>
    %cst_43 = arith.constant 0.000000e+00 : f32
    %156 = vector.broadcast %cst_43 : f32 to vector<16x256xf32>
    %157 = arith.maximumf %155, %156 : vector<16x256xf32>
    %158 = arith.truncf %157 : vector<16x256xf32> to vector<16x256xbf16>
    %cst_44 = arith.constant dense<0.000000e+00> : vector<16x256xf32>
    %159 = tpu.matmul %56, %3, %cst_44 {dimension_numbers = #tpu.dot_dimension_numbers<[1], [0], [0], [1], [0, 0, 1, 1], [], []>} : vector<16x160xbf16>, vector<160x256xbf16>, vector<16x256xf32> -> vector<16x256xf32>
    %160 = vector.broadcast %4 : vector<1x256xf32> to vector<16x256xf32>
    %161 = arith.addf %159, %160 : vector<16x256xf32>
    %cst_45 = arith.constant 0.000000e+00 : f32
    %162 = vector.broadcast %cst_45 : f32 to vector<16x256xf32>
    %163 = arith.maximumf %161, %162 : vector<16x256xf32>
    %164 = arith.truncf %163 : vector<16x256xf32> to vector<16x256xbf16>
    %cst_46 = arith.constant dense<0.000000e+00> : vector<16x256xf32>
    %165 = tpu.matmul %68, %3, %cst_46 {dimension_numbers = #tpu.dot_dimension_numbers<[1], [0], [0], [1], [0, 0, 1, 1], [], []>} : vector<16x160xbf16>, vector<160x256xbf16>, vector<16x256xf32> -> vector<16x256xf32>
    %166 = vector.broadcast %4 : vector<1x256xf32> to vector<16x256xf32>
    %167 = arith.addf %165, %166 : vector<16x256xf32>
    %cst_47 = arith.constant 0.000000e+00 : f32
    %168 = vector.broadcast %cst_47 : f32 to vector<16x256xf32>
    %169 = arith.maximumf %167, %168 : vector<16x256xf32>
    %170 = arith.truncf %169 : vector<16x256xf32> to vector<16x256xbf16>
    %cst_48 = arith.constant dense<0.000000e+00> : vector<16x256xf32>
    %171 = tpu.matmul %80, %3, %cst_48 {dimension_numbers = #tpu.dot_dimension_numbers<[1], [0], [0], [1], [0, 0, 1, 1], [], []>} : vector<16x160xbf16>, vector<160x256xbf16>, vector<16x256xf32> -> vector<16x256xf32>
    %172 = vector.broadcast %4 : vector<1x256xf32> to vector<16x256xf32>
    %173 = arith.addf %171, %172 : vector<16x256xf32>
    %cst_49 = arith.constant 0.000000e+00 : f32
    %174 = vector.broadcast %cst_49 : f32 to vector<16x256xf32>
    %175 = arith.maximumf %173, %174 : vector<16x256xf32>
    %176 = arith.truncf %175 : vector<16x256xf32> to vector<16x256xbf16>
    %cst_50 = arith.constant dense<0.000000e+00> : vector<16x256xf32>
    %177 = tpu.matmul %92, %3, %cst_50 {dimension_numbers = #tpu.dot_dimension_numbers<[1], [0], [0], [1], [0, 0, 1, 1], [], []>} : vector<16x160xbf16>, vector<160x256xbf16>, vector<16x256xf32> -> vector<16x256xf32>
    %178 = vector.broadcast %4 : vector<1x256xf32> to vector<16x256xf32>
    %179 = arith.addf %177, %178 : vector<16x256xf32>
    %cst_51 = arith.constant 0.000000e+00 : f32
    %180 = vector.broadcast %cst_51 : f32 to vector<16x256xf32>
    %181 = arith.maximumf %179, %180 : vector<16x256xf32>
    %182 = arith.truncf %181 : vector<16x256xf32> to vector<16x256xbf16>
    %cst_52 = arith.constant dense<0.000000e+00> : vector<16x256xf32>
    %183 = tpu.matmul %104, %3, %cst_52 {dimension_numbers = #tpu.dot_dimension_numbers<[1], [0], [0], [1], [0, 0, 1, 1], [], []>} : vector<16x160xbf16>, vector<160x256xbf16>, vector<16x256xf32> -> vector<16x256xf32>
    %184 = vector.broadcast %4 : vector<1x256xf32> to vector<16x256xf32>
    %185 = arith.addf %183, %184 : vector<16x256xf32>
    %cst_53 = arith.constant 0.000000e+00 : f32
    %186 = vector.broadcast %cst_53 : f32 to vector<16x256xf32>
    %187 = arith.maximumf %185, %186 : vector<16x256xf32>
    %188 = arith.truncf %187 : vector<16x256xf32> to vector<16x256xbf16>
    %cst_54 = arith.constant dense<0.000000e+00> : vector<16x256xf32>
    %189 = tpu.matmul %116, %3, %cst_54 {dimension_numbers = #tpu.dot_dimension_numbers<[1], [0], [0], [1], [0, 0, 1, 1], [], []>} : vector<16x160xbf16>, vector<160x256xbf16>, vector<16x256xf32> -> vector<16x256xf32>
    %190 = vector.broadcast %4 : vector<1x256xf32> to vector<16x256xf32>
    %191 = arith.addf %189, %190 : vector<16x256xf32>
    %cst_55 = arith.constant 0.000000e+00 : f32
    %192 = vector.broadcast %cst_55 : f32 to vector<16x256xf32>
    %193 = arith.maximumf %191, %192 : vector<16x256xf32>
    %194 = arith.truncf %193 : vector<16x256xf32> to vector<16x256xbf16>
    %cst_56 = arith.constant dense<0.000000e+00> : vector<16x256xf32>
    %195 = tpu.matmul %128, %3, %cst_56 {dimension_numbers = #tpu.dot_dimension_numbers<[1], [0], [0], [1], [0, 0, 1, 1], [], []>} : vector<16x160xbf16>, vector<160x256xbf16>, vector<16x256xf32> -> vector<16x256xf32>
    %196 = vector.broadcast %4 : vector<1x256xf32> to vector<16x256xf32>
    %197 = arith.addf %195, %196 : vector<16x256xf32>
    %cst_57 = arith.constant 0.000000e+00 : f32
    %198 = vector.broadcast %cst_57 : f32 to vector<16x256xf32>
    %199 = arith.maximumf %197, %198 : vector<16x256xf32>
    %200 = arith.truncf %199 : vector<16x256xf32> to vector<16x256xbf16>
    %cst_58 = arith.constant dense<0.000000e+00> : vector<16x256xf32>
    %201 = tpu.matmul %140, %3, %cst_58 {dimension_numbers = #tpu.dot_dimension_numbers<[1], [0], [0], [1], [0, 0, 1, 1], [], []>} : vector<16x160xbf16>, vector<160x256xbf16>, vector<16x256xf32> -> vector<16x256xf32>
    %202 = vector.broadcast %4 : vector<1x256xf32> to vector<16x256xf32>
    %203 = arith.addf %201, %202 : vector<16x256xf32>
    %cst_59 = arith.constant 0.000000e+00 : f32
    %204 = vector.broadcast %cst_59 : f32 to vector<16x256xf32>
    %205 = arith.maximumf %203, %204 : vector<16x256xf32>
    %206 = arith.truncf %205 : vector<16x256xf32> to vector<16x256xbf16>
    %cst_60 = arith.constant dense<0.000000e+00> : vector<16x192xf32>
    %207 = tpu.matmul %146, %5, %cst_60 {dimension_numbers = #tpu.dot_dimension_numbers<[1], [0], [0], [1], [0, 0, 1, 1], [], []>} : vector<16x256xbf16>, vector<256x192xbf16>, vector<16x192xf32> -> vector<16x192xf32>
    %208 = vector.broadcast %6 : vector<1x192xf32> to vector<16x192xf32>
    %209 = arith.addf %207, %208 : vector<16x192xf32>
    %cst_61 = arith.constant 0.000000e+00 : f32
    %210 = vector.broadcast %cst_61 : f32 to vector<16x192xf32>
    %211 = arith.maximumf %209, %210 : vector<16x192xf32>
    %212 = vector.broadcast %7 : vector<1x192xf32> to vector<16x192xf32>
    %213 = arith.mulf %211, %212 : vector<16x192xf32>
    %214 = vector.broadcast %8 : vector<1x192xf32> to vector<16x192xf32>
    %215 = arith.addf %213, %214 : vector<16x192xf32>
    %216 = vector.extract_strided_slice %215 {offsets = [0, 0], sizes = [16, 64], strides = [1, 1]} : vector<16x192xf32> to vector<16x64xf32>
    %217 = vector.extract_strided_slice %215 {offsets = [0, 64], sizes = [16, 64], strides = [1, 1]} : vector<16x192xf32> to vector<16x64xf32>
    %218 = arith.maximumf %216, %217 : vector<16x64xf32>
    %219 = vector.extract_strided_slice %215 {offsets = [0, 128], sizes = [16, 64], strides = [1, 1]} : vector<16x192xf32> to vector<16x64xf32>
    %220 = arith.maximumf %218, %219 : vector<16x64xf32>
    %221 = arith.truncf %220 : vector<16x64xf32> to vector<16x64xbf16>
    %cst_62 = arith.constant dense<0.000000e+00> : vector<16x192xf32>
    %222 = tpu.matmul %152, %5, %cst_62 {dimension_numbers = #tpu.dot_dimension_numbers<[1], [0], [0], [1], [0, 0, 1, 1], [], []>} : vector<16x256xbf16>, vector<256x192xbf16>, vector<16x192xf32> -> vector<16x192xf32>
    %223 = vector.broadcast %6 : vector<1x192xf32> to vector<16x192xf32>
    %224 = arith.addf %222, %223 : vector<16x192xf32>
    %cst_63 = arith.constant 0.000000e+00 : f32
    %225 = vector.broadcast %cst_63 : f32 to vector<16x192xf32>
    %226 = arith.maximumf %224, %225 : vector<16x192xf32>
    %227 = vector.broadcast %7 : vector<1x192xf32> to vector<16x192xf32>
    %228 = arith.mulf %226, %227 : vector<16x192xf32>
    %229 = vector.broadcast %8 : vector<1x192xf32> to vector<16x192xf32>
    %230 = arith.addf %228, %229 : vector<16x192xf32>
    %231 = vector.extract_strided_slice %230 {offsets = [0, 0], sizes = [16, 64], strides = [1, 1]} : vector<16x192xf32> to vector<16x64xf32>
    %232 = vector.extract_strided_slice %230 {offsets = [0, 64], sizes = [16, 64], strides = [1, 1]} : vector<16x192xf32> to vector<16x64xf32>
    %233 = arith.maximumf %231, %232 : vector<16x64xf32>
    %234 = vector.extract_strided_slice %230 {offsets = [0, 128], sizes = [16, 64], strides = [1, 1]} : vector<16x192xf32> to vector<16x64xf32>
    %235 = arith.maximumf %233, %234 : vector<16x64xf32>
    %236 = arith.truncf %235 : vector<16x64xf32> to vector<16x64xbf16>
    %cst_64 = arith.constant dense<0.000000e+00> : vector<16x192xf32>
    %237 = tpu.matmul %158, %5, %cst_64 {dimension_numbers = #tpu.dot_dimension_numbers<[1], [0], [0], [1], [0, 0, 1, 1], [], []>} : vector<16x256xbf16>, vector<256x192xbf16>, vector<16x192xf32> -> vector<16x192xf32>
    %238 = vector.broadcast %6 : vector<1x192xf32> to vector<16x192xf32>
    %239 = arith.addf %237, %238 : vector<16x192xf32>
    %cst_65 = arith.constant 0.000000e+00 : f32
    %240 = vector.broadcast %cst_65 : f32 to vector<16x192xf32>
    %241 = arith.maximumf %239, %240 : vector<16x192xf32>
    %242 = vector.broadcast %7 : vector<1x192xf32> to vector<16x192xf32>
    %243 = arith.mulf %241, %242 : vector<16x192xf32>
    %244 = vector.broadcast %8 : vector<1x192xf32> to vector<16x192xf32>
    %245 = arith.addf %243, %244 : vector<16x192xf32>
    %246 = vector.extract_strided_slice %245 {offsets = [0, 0], sizes = [16, 64], strides = [1, 1]} : vector<16x192xf32> to vector<16x64xf32>
    %247 = vector.extract_strided_slice %245 {offsets = [0, 64], sizes = [16, 64], strides = [1, 1]} : vector<16x192xf32> to vector<16x64xf32>
    %248 = arith.maximumf %246, %247 : vector<16x64xf32>
    %249 = vector.extract_strided_slice %245 {offsets = [0, 128], sizes = [16, 64], strides = [1, 1]} : vector<16x192xf32> to vector<16x64xf32>
    %250 = arith.maximumf %248, %249 : vector<16x64xf32>
    %251 = arith.truncf %250 : vector<16x64xf32> to vector<16x64xbf16>
    %cst_66 = arith.constant dense<0.000000e+00> : vector<16x192xf32>
    %252 = tpu.matmul %164, %5, %cst_66 {dimension_numbers = #tpu.dot_dimension_numbers<[1], [0], [0], [1], [0, 0, 1, 1], [], []>} : vector<16x256xbf16>, vector<256x192xbf16>, vector<16x192xf32> -> vector<16x192xf32>
    %253 = vector.broadcast %6 : vector<1x192xf32> to vector<16x192xf32>
    %254 = arith.addf %252, %253 : vector<16x192xf32>
    %cst_67 = arith.constant 0.000000e+00 : f32
    %255 = vector.broadcast %cst_67 : f32 to vector<16x192xf32>
    %256 = arith.maximumf %254, %255 : vector<16x192xf32>
    %257 = vector.broadcast %7 : vector<1x192xf32> to vector<16x192xf32>
    %258 = arith.mulf %256, %257 : vector<16x192xf32>
    %259 = vector.broadcast %8 : vector<1x192xf32> to vector<16x192xf32>
    %260 = arith.addf %258, %259 : vector<16x192xf32>
    %261 = vector.extract_strided_slice %260 {offsets = [0, 0], sizes = [16, 64], strides = [1, 1]} : vector<16x192xf32> to vector<16x64xf32>
    %262 = vector.extract_strided_slice %260 {offsets = [0, 64], sizes = [16, 64], strides = [1, 1]} : vector<16x192xf32> to vector<16x64xf32>
    %263 = arith.maximumf %261, %262 : vector<16x64xf32>
    %264 = vector.extract_strided_slice %260 {offsets = [0, 128], sizes = [16, 64], strides = [1, 1]} : vector<16x192xf32> to vector<16x64xf32>
    %265 = arith.maximumf %263, %264 : vector<16x64xf32>
    %266 = arith.truncf %265 : vector<16x64xf32> to vector<16x64xbf16>
    %cst_68 = arith.constant dense<0.000000e+00> : vector<16x192xf32>
    %267 = tpu.matmul %170, %5, %cst_68 {dimension_numbers = #tpu.dot_dimension_numbers<[1], [0], [0], [1], [0, 0, 1, 1], [], []>} : vector<16x256xbf16>, vector<256x192xbf16>, vector<16x192xf32> -> vector<16x192xf32>
    %268 = vector.broadcast %6 : vector<1x192xf32> to vector<16x192xf32>
    %269 = arith.addf %267, %268 : vector<16x192xf32>
    %cst_69 = arith.constant 0.000000e+00 : f32
    %270 = vector.broadcast %cst_69 : f32 to vector<16x192xf32>
    %271 = arith.maximumf %269, %270 : vector<16x192xf32>
    %272 = vector.broadcast %7 : vector<1x192xf32> to vector<16x192xf32>
    %273 = arith.mulf %271, %272 : vector<16x192xf32>
    %274 = vector.broadcast %8 : vector<1x192xf32> to vector<16x192xf32>
    %275 = arith.addf %273, %274 : vector<16x192xf32>
    %276 = vector.extract_strided_slice %275 {offsets = [0, 0], sizes = [16, 64], strides = [1, 1]} : vector<16x192xf32> to vector<16x64xf32>
    %277 = vector.extract_strided_slice %275 {offsets = [0, 64], sizes = [16, 64], strides = [1, 1]} : vector<16x192xf32> to vector<16x64xf32>
    %278 = arith.maximumf %276, %277 : vector<16x64xf32>
    %279 = vector.extract_strided_slice %275 {offsets = [0, 128], sizes = [16, 64], strides = [1, 1]} : vector<16x192xf32> to vector<16x64xf32>
    %280 = arith.maximumf %278, %279 : vector<16x64xf32>
    %281 = arith.truncf %280 : vector<16x64xf32> to vector<16x64xbf16>
    %cst_70 = arith.constant dense<0.000000e+00> : vector<16x192xf32>
    %282 = tpu.matmul %176, %5, %cst_70 {dimension_numbers = #tpu.dot_dimension_numbers<[1], [0], [0], [1], [0, 0, 1, 1], [], []>} : vector<16x256xbf16>, vector<256x192xbf16>, vector<16x192xf32> -> vector<16x192xf32>
    %283 = vector.broadcast %6 : vector<1x192xf32> to vector<16x192xf32>
    %284 = arith.addf %282, %283 : vector<16x192xf32>
    %cst_71 = arith.constant 0.000000e+00 : f32
    %285 = vector.broadcast %cst_71 : f32 to vector<16x192xf32>
    %286 = arith.maximumf %284, %285 : vector<16x192xf32>
    %287 = vector.broadcast %7 : vector<1x192xf32> to vector<16x192xf32>
    %288 = arith.mulf %286, %287 : vector<16x192xf32>
    %289 = vector.broadcast %8 : vector<1x192xf32> to vector<16x192xf32>
    %290 = arith.addf %288, %289 : vector<16x192xf32>
    %291 = vector.extract_strided_slice %290 {offsets = [0, 0], sizes = [16, 64], strides = [1, 1]} : vector<16x192xf32> to vector<16x64xf32>
    %292 = vector.extract_strided_slice %290 {offsets = [0, 64], sizes = [16, 64], strides = [1, 1]} : vector<16x192xf32> to vector<16x64xf32>
    %293 = arith.maximumf %291, %292 : vector<16x64xf32>
    %294 = vector.extract_strided_slice %290 {offsets = [0, 128], sizes = [16, 64], strides = [1, 1]} : vector<16x192xf32> to vector<16x64xf32>
    %295 = arith.maximumf %293, %294 : vector<16x64xf32>
    %296 = arith.truncf %295 : vector<16x64xf32> to vector<16x64xbf16>
    %cst_72 = arith.constant dense<0.000000e+00> : vector<16x192xf32>
    %297 = tpu.matmul %182, %5, %cst_72 {dimension_numbers = #tpu.dot_dimension_numbers<[1], [0], [0], [1], [0, 0, 1, 1], [], []>} : vector<16x256xbf16>, vector<256x192xbf16>, vector<16x192xf32> -> vector<16x192xf32>
    %298 = vector.broadcast %6 : vector<1x192xf32> to vector<16x192xf32>
    %299 = arith.addf %297, %298 : vector<16x192xf32>
    %cst_73 = arith.constant 0.000000e+00 : f32
    %300 = vector.broadcast %cst_73 : f32 to vector<16x192xf32>
    %301 = arith.maximumf %299, %300 : vector<16x192xf32>
    %302 = vector.broadcast %7 : vector<1x192xf32> to vector<16x192xf32>
    %303 = arith.mulf %301, %302 : vector<16x192xf32>
    %304 = vector.broadcast %8 : vector<1x192xf32> to vector<16x192xf32>
    %305 = arith.addf %303, %304 : vector<16x192xf32>
    %306 = vector.extract_strided_slice %305 {offsets = [0, 0], sizes = [16, 64], strides = [1, 1]} : vector<16x192xf32> to vector<16x64xf32>
    %307 = vector.extract_strided_slice %305 {offsets = [0, 64], sizes = [16, 64], strides = [1, 1]} : vector<16x192xf32> to vector<16x64xf32>
    %308 = arith.maximumf %306, %307 : vector<16x64xf32>
    %309 = vector.extract_strided_slice %305 {offsets = [0, 128], sizes = [16, 64], strides = [1, 1]} : vector<16x192xf32> to vector<16x64xf32>
    %310 = arith.maximumf %308, %309 : vector<16x64xf32>
    %311 = arith.truncf %310 : vector<16x64xf32> to vector<16x64xbf16>
    %cst_74 = arith.constant dense<0.000000e+00> : vector<16x192xf32>
    %312 = tpu.matmul %188, %5, %cst_74 {dimension_numbers = #tpu.dot_dimension_numbers<[1], [0], [0], [1], [0, 0, 1, 1], [], []>} : vector<16x256xbf16>, vector<256x192xbf16>, vector<16x192xf32> -> vector<16x192xf32>
    %313 = vector.broadcast %6 : vector<1x192xf32> to vector<16x192xf32>
    %314 = arith.addf %312, %313 : vector<16x192xf32>
    %cst_75 = arith.constant 0.000000e+00 : f32
    %315 = vector.broadcast %cst_75 : f32 to vector<16x192xf32>
    %316 = arith.maximumf %314, %315 : vector<16x192xf32>
    %317 = vector.broadcast %7 : vector<1x192xf32> to vector<16x192xf32>
    %318 = arith.mulf %316, %317 : vector<16x192xf32>
    %319 = vector.broadcast %8 : vector<1x192xf32> to vector<16x192xf32>
    %320 = arith.addf %318, %319 : vector<16x192xf32>
    %321 = vector.extract_strided_slice %320 {offsets = [0, 0], sizes = [16, 64], strides = [1, 1]} : vector<16x192xf32> to vector<16x64xf32>
    %322 = vector.extract_strided_slice %320 {offsets = [0, 64], sizes = [16, 64], strides = [1, 1]} : vector<16x192xf32> to vector<16x64xf32>
    %323 = arith.maximumf %321, %322 : vector<16x64xf32>
    %324 = vector.extract_strided_slice %320 {offsets = [0, 128], sizes = [16, 64], strides = [1, 1]} : vector<16x192xf32> to vector<16x64xf32>
    %325 = arith.maximumf %323, %324 : vector<16x64xf32>
    %326 = arith.truncf %325 : vector<16x64xf32> to vector<16x64xbf16>
    %cst_76 = arith.constant dense<0.000000e+00> : vector<16x192xf32>
    %327 = tpu.matmul %194, %5, %cst_76 {dimension_numbers = #tpu.dot_dimension_numbers<[1], [0], [0], [1], [0, 0, 1, 1], [], []>} : vector<16x256xbf16>, vector<256x192xbf16>, vector<16x192xf32> -> vector<16x192xf32>
    %328 = vector.broadcast %6 : vector<1x192xf32> to vector<16x192xf32>
    %329 = arith.addf %327, %328 : vector<16x192xf32>
    %cst_77 = arith.constant 0.000000e+00 : f32
    %330 = vector.broadcast %cst_77 : f32 to vector<16x192xf32>
    %331 = arith.maximumf %329, %330 : vector<16x192xf32>
    %332 = vector.broadcast %7 : vector<1x192xf32> to vector<16x192xf32>
    %333 = arith.mulf %331, %332 : vector<16x192xf32>
    %334 = vector.broadcast %8 : vector<1x192xf32> to vector<16x192xf32>
    %335 = arith.addf %333, %334 : vector<16x192xf32>
    %336 = vector.extract_strided_slice %335 {offsets = [0, 0], sizes = [16, 64], strides = [1, 1]} : vector<16x192xf32> to vector<16x64xf32>
    %337 = vector.extract_strided_slice %335 {offsets = [0, 64], sizes = [16, 64], strides = [1, 1]} : vector<16x192xf32> to vector<16x64xf32>
    %338 = arith.maximumf %336, %337 : vector<16x64xf32>
    %339 = vector.extract_strided_slice %335 {offsets = [0, 128], sizes = [16, 64], strides = [1, 1]} : vector<16x192xf32> to vector<16x64xf32>
    %340 = arith.maximumf %338, %339 : vector<16x64xf32>
    %341 = arith.truncf %340 : vector<16x64xf32> to vector<16x64xbf16>
    %cst_78 = arith.constant dense<0.000000e+00> : vector<16x192xf32>
    %342 = tpu.matmul %200, %5, %cst_78 {dimension_numbers = #tpu.dot_dimension_numbers<[1], [0], [0], [1], [0, 0, 1, 1], [], []>} : vector<16x256xbf16>, vector<256x192xbf16>, vector<16x192xf32> -> vector<16x192xf32>
    %343 = vector.broadcast %6 : vector<1x192xf32> to vector<16x192xf32>
    %344 = arith.addf %342, %343 : vector<16x192xf32>
    %cst_79 = arith.constant 0.000000e+00 : f32
    %345 = vector.broadcast %cst_79 : f32 to vector<16x192xf32>
    %346 = arith.maximumf %344, %345 : vector<16x192xf32>
    %347 = vector.broadcast %7 : vector<1x192xf32> to vector<16x192xf32>
    %348 = arith.mulf %346, %347 : vector<16x192xf32>
    %349 = vector.broadcast %8 : vector<1x192xf32> to vector<16x192xf32>
    %350 = arith.addf %348, %349 : vector<16x192xf32>
    %351 = vector.extract_strided_slice %350 {offsets = [0, 0], sizes = [16, 64], strides = [1, 1]} : vector<16x192xf32> to vector<16x64xf32>
    %352 = vector.extract_strided_slice %350 {offsets = [0, 64], sizes = [16, 64], strides = [1, 1]} : vector<16x192xf32> to vector<16x64xf32>
    %353 = arith.maximumf %351, %352 : vector<16x64xf32>
    %354 = vector.extract_strided_slice %350 {offsets = [0, 128], sizes = [16, 64], strides = [1, 1]} : vector<16x192xf32> to vector<16x64xf32>
    %355 = arith.maximumf %353, %354 : vector<16x64xf32>
    %356 = arith.truncf %355 : vector<16x64xf32> to vector<16x64xbf16>
    %cst_80 = arith.constant dense<0.000000e+00> : vector<16x192xf32>
    %357 = tpu.matmul %206, %5, %cst_80 {dimension_numbers = #tpu.dot_dimension_numbers<[1], [0], [0], [1], [0, 0, 1, 1], [], []>} : vector<16x256xbf16>, vector<256x192xbf16>, vector<16x192xf32> -> vector<16x192xf32>
    %358 = vector.broadcast %6 : vector<1x192xf32> to vector<16x192xf32>
    %359 = arith.addf %357, %358 : vector<16x192xf32>
    %cst_81 = arith.constant 0.000000e+00 : f32
    %360 = vector.broadcast %cst_81 : f32 to vector<16x192xf32>
    %361 = arith.maximumf %359, %360 : vector<16x192xf32>
    %362 = vector.broadcast %7 : vector<1x192xf32> to vector<16x192xf32>
    %363 = arith.mulf %361, %362 : vector<16x192xf32>
    %364 = vector.broadcast %8 : vector<1x192xf32> to vector<16x192xf32>
    %365 = arith.addf %363, %364 : vector<16x192xf32>
    %366 = vector.extract_strided_slice %365 {offsets = [0, 0], sizes = [16, 64], strides = [1, 1]} : vector<16x192xf32> to vector<16x64xf32>
    %367 = vector.extract_strided_slice %365 {offsets = [0, 64], sizes = [16, 64], strides = [1, 1]} : vector<16x192xf32> to vector<16x64xf32>
    %368 = arith.maximumf %366, %367 : vector<16x64xf32>
    %369 = vector.extract_strided_slice %365 {offsets = [0, 128], sizes = [16, 64], strides = [1, 1]} : vector<16x192xf32> to vector<16x64xf32>
    %370 = arith.maximumf %368, %369 : vector<16x64xf32>
    %371 = arith.truncf %370 : vector<16x64xf32> to vector<16x64xbf16>
    %372 = tpu.concatenate %221, %236, %251, %266, %281, %296, %311, %326, %341, %356, %371 in 1 : vector<16x64xbf16>, vector<16x64xbf16>, vector<16x64xbf16>, vector<16x64xbf16>, vector<16x64xbf16>, vector<16x64xbf16>, vector<16x64xbf16>, vector<16x64xbf16>, vector<16x64xbf16>, vector<16x64xbf16>, vector<16x64xbf16> -> vector<16x704xbf16>
    %c0_82 = arith.constant 0 : index
    %c0_83 = arith.constant 0 : index
    %373 = vector.load %arg10[%c0_82, %c0_83] : memref<704x256xbf16, #tpu.memory_space<vmem>>, vector<704x256xbf16>
    %cst_84 = arith.constant dense<0.000000e+00> : vector<16x256xf32>
    %374 = tpu.matmul %372, %373, %cst_84 {dimension_numbers = #tpu.dot_dimension_numbers<[1], [0], [0], [1], [0, 0, 1, 1], [], []>} : vector<16x704xbf16>, vector<704x256xbf16>, vector<16x256xf32> -> vector<16x256xf32>
    %c0_85 = arith.constant 0 : index
    %c0_86 = arith.constant 0 : index
    %375 = vector.load %arg11[%c0_85, %c0_86] : memref<1x256xf32, #tpu.memory_space<vmem>>, vector<1x256xf32>
    %376 = vector.broadcast %375 : vector<1x256xf32> to vector<16x256xf32>
    %377 = arith.addf %374, %376 : vector<16x256xf32>
    %cst_87 = arith.constant 0.000000e+00 : f32
    %378 = vector.broadcast %cst_87 : f32 to vector<16x256xf32>
    %379 = arith.maximumf %377, %378 : vector<16x256xf32>
    %380 = arith.truncf %379 : vector<16x256xf32> to vector<16x256xbf16>
    %c0_88 = arith.constant 0 : index
    %c0_89 = arith.constant 0 : index
    %381 = vector.load %arg12[%c0_88, %c0_89] : memref<256x64xbf16, #tpu.memory_space<vmem>>, vector<256x64xbf16>
    %cst_90 = arith.constant dense<0.000000e+00> : vector<16x64xf32>
    %382 = tpu.matmul %380, %381, %cst_90 {dimension_numbers = #tpu.dot_dimension_numbers<[1], [0], [0], [1], [0, 0, 1, 1], [], []>} : vector<16x256xbf16>, vector<256x64xbf16>, vector<16x64xf32> -> vector<16x64xf32>
    %c0_91 = arith.constant 0 : index
    %c0_92 = arith.constant 0 : index
    %383 = vector.load %arg13[%c0_91, %c0_92] : memref<1x64xf32, #tpu.memory_space<vmem>>, vector<1x64xf32>
    %384 = vector.broadcast %383 : vector<1x64xf32> to vector<16x64xf32>
    %385 = arith.addf %382, %384 : vector<16x64xf32>
    %cst_93 = arith.constant 0.000000e+00 : f32
    %386 = vector.broadcast %cst_93 : f32 to vector<16x64xf32>
    %387 = arith.maximumf %385, %386 : vector<16x64xf32>
    %388 = arith.truncf %387 : vector<16x64xf32> to vector<16x64xbf16>
    %c0_94 = arith.constant 0 : index
    %c0_95 = arith.constant 0 : index
    %389 = vector.load %arg14[%c0_94, %c0_95] : memref<64x128xbf16, #tpu.memory_space<vmem>>, vector<64x128xbf16>
    %cst_96 = arith.constant dense<0.000000e+00> : vector<16x128xf32>
    %390 = tpu.matmul %388, %389, %cst_96 {dimension_numbers = #tpu.dot_dimension_numbers<[1], [0], [0], [1], [0, 0, 1, 1], [], []>} : vector<16x64xbf16>, vector<64x128xbf16>, vector<16x128xf32> -> vector<16x128xf32>
    %c0_97 = arith.constant 0 : index
    %c0_98 = arith.constant 0 : index
    %391 = vector.load %arg15[%c0_97, %c0_98] : memref<1x128xf32, #tpu.memory_space<vmem>>, vector<1x128xf32>
    %392 = vector.broadcast %391 : vector<1x128xf32> to vector<16x128xf32>
    %393 = arith.addf %390, %392 : vector<16x128xf32>
    %c0_99 = arith.constant 0 : index
    %c0_100 = arith.constant 0 : index
    %394 = vector.load %arg16[%c0_99, %c0_100] : memref<16x128xf32, #tpu.memory_space<vmem>>, vector<16x128xf32>
    tpu.vector_store %arg16[%c0_99, %c0_100], %393 {strides = array<i32>} : memref<16x128xf32, #tpu.memory_space<vmem>>, vector<16x128xf32>,
    return
  }
  func.func @transform_0(%arg0: i32) -> (i32, i32) {
    %c0_i32 = arith.constant 0 : i32
    %c0_i32_0 = arith.constant 0 : i32
    return %arg0, %c0_i32 : i32, i32
  }
  func.func @transform_1(%arg0: i32) -> (i32, i32) {
    %c0_i32 = arith.constant 0 : i32
    %c0_i32_0 = arith.constant 0 : i32
    %c0_i32_1 = arith.constant 0 : i32
    return %c0_i32, %c0_i32_0 : i32, i32
  }
  func.func @transform_2(%arg0: i32) -> (i32, i32) {
    %c0_i32 = arith.constant 0 : i32
    %c0_i32_0 = arith.constant 0 : i32
    %c0_i32_1 = arith.constant 0 : i32
    return %c0_i32, %c0_i32_0 : i32, i32
  }
  func.func @transform_3(%arg0: i32) -> (i32, i32) {
    %c0_i32 = arith.constant 0 : i32
    %c0_i32_0 = arith.constant 0 : i32
    %c0_i32_1 = arith.constant 0 : i32
    return %c0_i32, %c0_i32_0 : i32, i32
  }
  func.func @transform_4(%arg0: i32) -> (i32, i32) {
    %c0_i32 = arith.constant 0 : i32
    %c0_i32_0 = arith.constant 0 : i32
    %c0_i32_1 = arith.constant 0 : i32
    return %c0_i32, %c0_i32_0 : i32, i32
  }
  func.func @transform_5(%arg0: i32) -> (i32, i32) {
    %c0_i32 = arith.constant 0 : i32
    %c0_i32_0 = arith.constant 0 : i32
    %c0_i32_1 = arith.constant 0 : i32
    return %c0_i32, %c0_i32_0 : i32, i32
  }
  func.func @transform_6(%arg0: i32) -> (i32, i32) {
    %c0_i32 = arith.constant 0 : i32
    %c0_i32_0 = arith.constant 0 : i32
    %c0_i32_1 = arith.constant 0 : i32
    return %c0_i32, %c0_i32_0 : i32, i32
  }
  func.func @transform_7(%arg0: i32) -> (i32, i32) {
    %c0_i32 = arith.constant 0 : i32
    %c0_i32_0 = arith.constant 0 : i32
    %c0_i32_1 = arith.constant 0 : i32
    return %c0_i32, %c0_i32_0 : i32, i32
  }
  func.func @transform_8(%arg0: i32) -> (i32, i32) {
    %c0_i32 = arith.constant 0 : i32
    %c0_i32_0 = arith.constant 0 : i32
    %c0_i32_1 = arith.constant 0 : i32
    return %c0_i32, %c0_i32_0 : i32, i32
  }
  func.func @transform_9(%arg0: i32) -> (i32, i32) {
    %c0_i32 = arith.constant 0 : i32
    %c0_i32_0 = arith.constant 0 : i32
    %c0_i32_1 = arith.constant 0 : i32
    return %c0_i32, %c0_i32_0 : i32, i32
  }
  func.func @transform_10(%arg0: i32) -> (i32, i32) {
    %c0_i32 = arith.constant 0 : i32
    %c0_i32_0 = arith.constant 0 : i32
    %c0_i32_1 = arith.constant 0 : i32
    return %c0_i32, %c0_i32_0 : i32, i32
  }
  func.func @transform_11(%arg0: i32) -> (i32, i32) {
    %c0_i32 = arith.constant 0 : i32
    %c0_i32_0 = arith.constant 0 : i32
    %c0_i32_1 = arith.constant 0 : i32
    return %c0_i32, %c0_i32_0 : i32, i32
  }
  func.func @transform_12(%arg0: i32) -> (i32, i32) {
    %c0_i32 = arith.constant 0 : i32
    %c0_i32_0 = arith.constant 0 : i32
    %c0_i32_1 = arith.constant 0 : i32
    return %c0_i32, %c0_i32_0 : i32, i32
  }
  func.func @transform_13(%arg0: i32) -> (i32, i32) {
    %c0_i32 = arith.constant 0 : i32
    %c0_i32_0 = arith.constant 0 : i32
    %c0_i32_1 = arith.constant 0 : i32
    return %c0_i32, %c0_i32_0 : i32, i32
  }
  func.func @transform_14(%arg0: i32) -> (i32, i32) {
    %c0_i32 = arith.constant 0 : i32
    %c0_i32_0 = arith.constant 0 : i32
    %c0_i32_1 = arith.constant 0 : i32
    return %c0_i32, %c0_i32_0 : i32, i32
  }
  func.func @transform_15(%arg0: i32) -> (i32, i32) {
    %c0_i32 = arith.constant 0 : i32
    %c0_i32_0 = arith.constant 0 : i32
    return %arg0, %c0_i32 : i32, i32
  }
}

</mosaic_0001>

<bundles_post_ra>
// kernel: tile.28
= control target key start
LH: loop header
LB: loop body
LE: loop exit
PB: predicated region body
PF: predicated region fallthrough
CT: control target
= control target key end

     0   :  { %s28_s0 = inlined_call_operand.vmem [shape: f32[32], index: 0, kind: input, shape index: {}]   ;;  %s29_s1 = inlined_call_operand.vmem [shape: f32[15,32], index: 1, kind: output, shape index: {}]  }
   0x1   :  { %v4_v0 = vld [vmem:[%s28_s0] ss:$0 sm:$0xff] }
   0x2   :  { %5 = vst [vmem:[%s29_s1] sm:$0xff] %v4_v0  ;;  %8 = vst [vmem:[%s29_s1 + $0x8] sm:$0xff] %v4_v0 }

// kernel: tile.29
= control target key start
LH: loop header
LB: loop body
LE: loop exit
PB: predicated region body
PF: predicated region fallthrough
CT: control target
= control target key end

     0   :  { %s57_s8 = smov 96   ;;  %vm3_vm0 = vcmask 261120   ;;  %s59_s15 = smov 64   ;;  %vm9_vm1 = vcmask 1048320   ;;  %vm15_vm2 = vcmask 785920   ;;  %vm21_vm3 = vcmask 523520   ;;  %s94_s0 = inlined_call_operand.vmem [shape: f32[15,32], index: 0, kind: input, shape index: {}]   ;;  %s95_s1 = inlined_call_operand.vmem [shape: f32[1,480], index: 1, kind: output, shape index: {}]  }
   0x1   :  { %v48_v0 = vld [vmem:[%s94_s0 + $0x3] ss:$4 sm:$0x7]   ;;  %v49_v1 = vld [vmem:[%s94_s0 + $0x2] ss:$4 sm:$0xf]  }
   0x2   :  { %7 = vrot.lane.b32.xlu0 %v48_v0, %s57_s8  ;;  %v50_v2 = vld [vmem:[%s94_s0 + $0x1] ss:$4 sm:$0xf]   ;;  %v2_v3 = vld [vmem:[%s94_s0] ss:$4 sm:$0xf]  }
   0x3   :  { %s58_s0 = smov 32   ;;  %4 = vst.msk [vmem:[#allocation0] ss:$8 sm:$0xf] %vm3_vm0, %v2_v3  }
   0x4   :  { %19 = vrot.lane.b32.xlu1 %v50_v2, %s58_s0 }
   0x6   :  { %13 = vrot.lane.b32.xlu0 %v49_v1, %s59_s15 }
  0x74   :  { %v8_v4 = vpop.permute.xlu0 %7  }
  0x75   :  { %10 = vst.msk [vmem:[#allocation0] ss:$8 sm:$0x7] %vm9_vm1, %v8_v4  }
  0x76   :  { %v20_v5 = vpop.permute.xlu1 %19  }
  0x78   :  { %v14_v6 = vpop.permute.xlu0 %13  }
  0x79   :  { %16 = vst.msk [vmem:[#allocation0] ss:$8 sm:$0xf] %vm15_vm2, %v14_v6  }
  0x7a   :  { %22 = vst.msk [vmem:[#allocation0] ss:$8 sm:$0xf] %vm21_vm3, %v20_v5  }
  0x81   :  { %v26_v7 = vld [vmem:[#allocation0] sm:$0x1]  ;;  %v30_v8 = vld [vmem:[#allocation0 + $0x8] sm:$0x1]  ;;  %v35_v9 = vld [vmem:[#allocation0 + $0x10] sm:$0x1] }
  0x82   :  { %28 = vst [vmem:[%s95_s1] sm:$0x1] %v26_v7  ;;  %51 = vst [vmem:[%s95_s1 + $0x1] sm:$0x1] %v30_v8  ;;  %v41_v10 = vld [vmem:[#allocation0 + $0x18] sm:$0x1] }
  0x83   :  { %52 = vst [vmem:[%s95_s1 + $0x2] sm:$0x1] %v35_v9  ;;  %53 = vst [vmem:[%s95_s1 + $0x3] sm:$0x1] %v41_v10 }

// kernel: tile.33
= control target key start
LH: loop header
LB: loop body
LE: loop exit
PB: predicated region body
PF: predicated region fallthrough
CT: control target
= control target key end

     0   :  { %s22_s0 = inlined_call_operand.vmem [shape: f32[64], index: 0, kind: input, shape index: {}]   ;;  %s23_s1 = inlined_call_operand.vmem [shape: f32[4,64], index: 1, kind: output, shape index: {}]  }
   0x1   :  { %v4_v0 = vld [vmem:[%s22_s0] ss:$0 sm:$0xff] }
   0x2   :  { %5 = vst [vmem:[%s23_s1] sm:$0xf] %v4_v0 }

// kernel: tile.34
= control target key start
LH: loop header
LB: loop body
LE: loop exit
PB: predicated region body
PF: predicated region fallthrough
CT: control target
= control target key end

     0   :  { %s6_s8 = smov 3  ;;  %vm8_vm0 = vcmask 523264   ;;  %s30_s9 = smov 64   ;;  %vm15_vm1 = vcmask 1048064   ;;  %s50_s0 = inlined_call_operand.vmem [shape: f32[4,64], index: 0, kind: input, shape index: {}]   ;;  %s51_s1 = inlined_call_operand.vmem [shape: f32[1,256], index: 1, kind: output, shape index: {}]  }
   0x1   :  { %v4_v0 = vld [vmem:[%s50_s0] sm:$0xf]  ;;  %s11_s0 = smov 3 }
   0x2   :  { %5 = vst [vmem:[#allocation1] sm:$0xf] %v4_v0 }
   0x9   :  { %v12_v1 = vld [vmem:[#allocation1 + $0x1] ss:$2 sm:%s11_s0]   ;;  %v7_v2 = vld [vmem:[#allocation1] ss:$2 sm:%s6_s8]  }
   0xa   :  { %13 = vrot.lane.b32.xlu0 %v12_v1, %s30_s9  ;;  %9 = vst.msk [vmem:[#allocation0] ss:$8 sm:$0x3] %vm8_vm0, %v7_v2  }
  0x7c   :  { %v14_v3 = vpop.permute.xlu0 %13  }
  0x7d   :  { %16 = vst.msk [vmem:[#allocation0] ss:$8 sm:$0x3] %vm15_vm1, %v14_v3  }
  0x84   :  { %v20_v4 = vld [vmem:[#allocation0] sm:$0x1]  ;;  %v24_v5 = vld [vmem:[#allocation0 + $0x8] sm:$0x1] }
  0x85   :  { %22 = vst [vmem:[%s51_s1] sm:$0x1] %v20_v4  ;;  %28 = vst [vmem:[%s51_s1 + $0x1] sm:$0x1] %v24_v5 }

// kernel: tile.38
= control target key start
LH: loop header
LB: loop body
LE: loop exit
PB: predicated region body
PF: predicated region fallthrough
CT: control target
= control target key end

     0   :  { %s22_s0 = inlined_call_operand.vmem [shape: f32[64], index: 0, kind: input, shape index: {}]   ;;  %s23_s1 = inlined_call_operand.vmem [shape: f32[3,64], index: 1, kind: output, shape index: {}]  }
   0x1   :  { %v4_v0 = vld [vmem:[%s22_s0] ss:$0 sm:$0xff] }
   0x2   :  { %5 = vst [vmem:[%s23_s1] sm:$0xf] %v4_v0 }

// kernel: tile.39
= control target key start
LH: loop header
LB: loop body
LE: loop exit
PB: predicated region body
PF: predicated region fallthrough
CT: control target
= control target key end

     0   :  { %vm8_vm0 = vcmask 523264   ;;  %s29_s8 = smov 64   ;;  %vm14_vm1 = vcmask 1048064   ;;  %s49_s0 = inlined_call_operand.vmem [shape: f32[3,64], index: 0, kind: input, shape index: {}]   ;;  %s50_s1 = inlined_call_operand.vmem [shape: f32[1,192], index: 1, kind: output, shape index: {}]  }
   0x1   :  { %v4_v0 = vld [vmem:[%s49_s0] sm:$0xf]  ;;  %s6_s0 = smov 3 }
   0x2   :  { %5 = vst [vmem:[#allocation1] sm:$0xf] %v4_v0 }
   0x9   :  { %v11_v1 = vld [vmem:[#allocation1 + $0x1] sm:$0x1]   ;;  %v7_v2 = vld [vmem:[#allocation1] ss:$2 sm:%s6_s0]  }
   0xa   :  { %12 = vrot.lane.b32.xlu0 %v11_v1, %s29_s8  ;;  %9 = vst.msk [vmem:[#allocation0] ss:$8 sm:$0x3] %vm8_vm0, %v7_v2  }
  0x11   :  { %v23_v3 = vld [vmem:[#allocation0 + $0x8] sm:$0x1] }
  0x12   :  { %27 = vst [vmem:[%s50_s1 + $0x1] sm:$0x1] %v23_v3 }
  0x7c   :  { %v13_v4 = vpop.permute.xlu0 %12  }
  0x7d   :  { %15 = vst.msk [vmem:[#allocation0] sm:$0x1] %vm14_vm1, %v13_v4  }
  0x84   :  { %v19_v5 = vld [vmem:[#allocation0] sm:$0x1] }
  0x85   :  { %21 = vst [vmem:[%s50_s1] sm:$0x1] %v19_v5 }

// kernel: cnn1d_forward.1
= control target key start
LH: loop header
LB: loop body
LE: loop exit
PB: predicated region body
PF: predicated region fallthrough
CT: control target
= control target key end

     0   :  { %v5127_v1 = vmov 0   ;;  %s5128_s24 = smov 119   ;;  %vm160_vm0 = vcmask 130048   ;;  %s5130_s29 = smov 110   ;;  %v115_v26 = vlaneseq  ;;  %vm262_vm1 = vcmask 785408   ;;  %s7678_s1 = inlined_call_operand.vmem [shape: bf16[16,480], index: 1, kind: input, shape index: {}]   ;;  %s7679_s0 = inlined_call_operand.vmem [shape: bf16[16,128], index: 0, kind: input, shape index: {}]   ;;  %s7680_s3 = inlined_call_operand.vmem [shape: bf16[160,256], index: 3, kind: input, shape index: {}]   ;;  %s7681_s2 = inlined_call_operand.vmem [shape: f32[1,480], index: 2, kind: input, shape index: {}]   ;;  %s7682_s5 = inlined_call_operand.vmem [shape: bf16[256,192], index: 5, kind: input, shape index: {}]   ;;  %s7683_s4 = inlined_call_operand.vmem [shape: f32[1,256], index: 4, kind: input, shape index: {}]   ;;  %s7684_s6 = inlined_call_operand.vmem [shape: f32[1,192], index: 6, kind: input, shape index: {}]   ;;  %s7685_s7 = inlined_call_operand.vmem [shape: f32[1,192], index: 7, kind: input, shape index: {}]   ;;  %s7686_s8 = inlined_call_operand.vmem [shape: f32[1,192], index: 8, kind: input, shape index: {}]   ;;  %s7687_s9 = inlined_call_operand.vmem [shape: bf16[704,256], index: 9, kind: input, shape index: {}]   ;;  %s7688_s11 = inlined_call_operand.vmem [shape: bf16[256,64], index: 11, kind: input, shape index: {}]   ;;  %s7689_s13 = inlined_call_operand.vmem [shape: bf16[64,128], index: 13, kind: input, shape index: {}]   ;;  %s7690_s10 = inlined_call_operand.vmem [shape: f32[1,256], index: 10, kind: input, shape index: {}]   ;;  %s7691_s12 = inlined_call_operand.vmem [shape: f32[1,64], index: 12, kind: input, shape index: {}]   ;;  %s7692_s14 = inlined_call_operand.vmem [shape: f32[1,128], index: 14, kind: input, shape index: {}]   ;;  %s7693_s15 = inlined_call_operand.vmem [shape: f32[16,128], index: 15, kind: output, shape index: {}]  }
   0x1   :  { %v5225_v0 = vld [vmem:[%s7678_s1 + $0x4] ss:$16 sps:$4 sm:$0xff]   ;;  %196 = vmatprep.mubr.bf16.mxu0 %v5127_v1  ;;  %239 = vmatprep.mubr.bf16.mxu1 %v5127_v1  ;;  %v5236_v3 = vld [vmem:[%s7678_s1] ss:$16 sps:$4 sm:$0xff]   ;;  %v5241_v4 = vld [vmem:[%s7678_s1 + $0xc] ss:$16 sps:$4 sm:$0xff]  }
   0x2   :  { %v4841_v2 = vld [vmem:[%s7679_s0] sm:$0xff]   ;;  %164 = vmatprep.subr.bf16.mxu0 %v5225_v0  ;;  %v5246_v5 = vld [vmem:[%s7678_s1 + $0x8] ss:$16 sps:$4 sm:$0xff]   ;;  %s5129_s0 = smov 101   ;;  %207 = vmatprep.subr.bf16.mxu1 %v5241_v4  ;;  %s5131_s30 = smov 92   ;;  %v5413_v29 = vshrl.u32 %v115_v26, 7 }
   0x3   :  { %300 = vrot.lane.b32.xlu0 %v4841_v2, %s5128_s24  ;;  %578 = vrot.lane.b32.xlu1 %v4841_v2, %s5129_s0  ;;  %s5132_s1 = smov 83   ;;  %s5133_s16 = smov 74   ;;  %v5328_v15 = vld [vmem:[%s7680_s3 + $0x4] ss:$8 sps:$4 sm:$0xff]   ;;  %v5341_v17 = vld [vmem:[%s7680_s3] ss:$8 sps:$4 sm:$0xff]  }
   0x4   :  { %165 = vmatpush1.bf16.msra.mxu0 %v5236_v3  ;;  %208 = vmatpush1.bf16.msra.mxu1 %v5246_v5  ;;  %s5134_s17 = smov 65   ;;  %s5135_s18 = smov 56   ;;  %v5346_v18 = vld [vmem:[%s7680_s3 + $0x14] ss:$8 sps:$4 sm:$0xff]   ;;  %v5354_v19 = vld [vmem:[%s7680_s3 + $0x10] ss:$8 sps:$4 sm:$0xff]  }
   0x5   :  { %305 = vmatprep.subr.bf16.mxu0 %v5225_v0  ;;  %348 = vmatprep.subr.bf16.mxu1 %v5241_v4  ;;  %s5136_s19 = smov 47   ;;  %s5137_s20 = smov 38   ;;  %v5361_v20 = vld [vmem:[%s7680_s3 + $0x24] ss:$8 sps:$4 sm:$0xff]   ;;  %v5368_v21 = vld [vmem:[%s7680_s3 + $0x20] ss:$8 sps:$4 sm:$0xff]  }
   0x6   :  { %v5375_v22 = vld [vmem:[%s7680_s3 + $0x34] ss:$8 sps:$4 sm:$0xff]   ;;  %v5382_v23 = vld [vmem:[%s7680_s3 + $0x30] ss:$8 sps:$4 sm:$0xff]   ;;  %v5390_v24 = vld [vmem:[%s7680_s3 + $0x44] ss:$8 sps:$4 sm:$0xff]  }
   0x7   :  { %4301 = vmatmul.mubr.msk.bf16.vlgmr.msra.gmra.mrb[0].mxu0 %vm160_vm0, %v4841_v2  ;;  %439 = vrot.lane.b32.xlu0 %v4841_v2, %s5130_s29  ;;  %v5396_v25 = vld [vmem:[%s7680_s3 + $0x40] ss:$8 sps:$4 sm:$0xff]   ;;  %v5404_v27 = vld [vmem:[%s7680_s3 + $0x54] ss:$8 sps:$4 sm:$0xff]   ;;  %v5410_v28 = vld [vmem:[%s7680_s3 + $0x50] ss:$8 sps:$4 sm:$0xff]  }
   0x8   :  { %717 = vrot.lane.b32.xlu1 %v4841_v2, %s5131_s30  ;;  %306 = vmatpush1.bf16.msra.mxu0 %v5236_v3  ;;  %v5420_v30 = vld [vmem:[%s7680_s3 + $0x64] ss:$8 sps:$4 sm:$0xff]   ;;  %v5426_v31 = vld [vmem:[%s7680_s3 + $0x60] ss:$8 sps:$4 sm:$0xff]   ;;  %v5430_v32 = vsub.s32 1, %v5413_v29  ;;  %v125_v34 = vsub.s32 2, %v5413_v29 }
   0x9   :  { %4302 = vmatmul.mubr.msk.bf16.vlgmr.msra.gmra.mrb[0].mxu1 %vm160_vm0, %v4841_v2  ;;  %337 = vmatprep.mubr.bf16.mxu0 %v5127_v1  ;;  %v5437_v33 = vld [vmem:[%s7681_s2] sm:$0xf]  ;;  %v129_v35 = vsub.s32 3, %v5413_v29  ;;  %v5444_v36 = vld [vmem:[%s7680_s3 + $0x74] ss:$8 sps:$4 sm:$0xff]   ;;  %s5138_s28 = smov 96  }
   0xa   :  { %349 = vmatpush1.bf16.msra.mxu1 %v5246_v5  ;;  %380 = vmatprep.mubr.bf16.mxu1 %v5127_v1  ;;  %7713 = vst [vmem:[#allocation2_spill] sm:$0xff] %v5430_v32  ;;  %v5450_v37 = vld [vmem:[%s7680_s3 + $0x70] ss:$8 sps:$4 sm:$0xff]   ;;  %v5455_v38 = vrot.slane %v5437_v33, %v5430_v32  ;;  %v5460_v39 = vrot.slane %v5437_v33, %v125_v34  ;;  %v5470_v42 = vld [vmem:[%s7680_s3 + $0x84] ss:$8 sps:$4 sm:$0xff]   ;;  %s5139_s0 = smov 64  }
   0xb   :  { %856 = vrot.lane.b32.xlu0 %v4841_v2, %s5132_s1  ;;  %444 = vmatprep.subr.bf16.mxu0 %v5225_v0  ;;  %v5465_v41 = vrot.slane %v5437_v33, %v129_v35  ;;  %v5476_v44 = vld [vmem:[%s7680_s3 + $0x80] ss:$8 sps:$4 sm:$0xff]   ;;  %v5494_v54 = vld [vmem:[%s7680_s3 + $0x94] ss:$8 sps:$4 sm:$0xff]   ;;  %v5502_v58 = vld [vmem:[%s7680_s3 + $0x90] ss:$8 sps:$4 sm:$0xff]  }
   0xc   :  { %995 = vrot.lane.b32.xlu1 %v4841_v2, %s5133_s16  ;;  %487 = vmatprep.subr.bf16.mxu1 %v5241_v4  ;;  %vm283_vm2 = vcmask 523264   ;;  %vm1801_vm3 = vcmask 261120   ;;  %vm5141_vm4 = vmmov 0  }
   0xf   :  { %1134 = vrot.lane.b32.xlu0 %v4841_v2, %s5134_s17 }
  0x10   :  { %1273 = vrot.lane.b32.xlu1 %v4841_v2, %s5135_s18 }
  0x13   :  { %1412 = vrot.lane.b32.xlu0 %v4841_v2, %s5136_s19 }
  0x14   :  { %1551 = vrot.lane.b32.xlu1 %v4841_v2, %s5137_s20 }
  0x75   :  { %v301_v6 = vpop.permute.xlu0 %300  ;;  %v579_v8 = vpop.permute.xlu1 %578 }
  0x76   :  { %4303 = vmatmul.mubr.msk.bf16.vlgmr.msra.gmra.mrb[4].mxu0 %vm160_vm0, %v301_v6  ;;  %4304 = vmatmul.mubr.msk.bf16.vlgmr.msra.gmra.mrb[4].mxu1 %vm160_vm0, %v301_v6 }
  0x77   :  { %445 = vmatpush1.bf16.msra.mxu0 %v5236_v3  ;;  %488 = vmatpush1.bf16.msra.mxu1 %v5246_v5 }
  0x78   :  { %476 = vmatprep.mubr.bf16.mxu0 %v5127_v1  ;;  %519 = vmatprep.mubr.bf16.mxu1 %v5127_v1 }
  0x79   :  { %583 = vmatprep.subr.bf16.mxu0 %v5225_v0  ;;  %626 = vmatprep.subr.bf16.mxu1 %v5241_v4  ;;  %v440_v7 = vpop.permute.xlu0 %439 }
  0x7a   :  { %v718_v9 = vpop.permute.xlu1 %717 }
  0x7d   :  { %v857_v10 = vpop.permute.xlu0 %856 }
  0x7e   :  { %4305 = vmatmul.mubr.msk.bf16.vlgmr.msra.gmra.mrb[8].mxu0 %vm160_vm0, %v440_v7  ;;  %4306 = vmatmul.mubr.msk.bf16.vlgmr.msra.gmra.mrb[8].mxu1 %vm160_vm0, %v440_v7  ;;  %v996_v11 = vpop.permute.xlu1 %995 }
  0x7f   :  { %584 = vmatpush1.bf16.msra.mxu0 %v5236_v3  ;;  %627 = vmatpush1.bf16.msra.mxu1 %v5246_v5 }
  0x80   :  { %615 = vmatprep.mubr.bf16.mxu0 %v5127_v1  ;;  %658 = vmatprep.mubr.bf16.mxu1 %v5127_v1 }
  0x81   :  { %722 = vmatprep.subr.bf16.mxu0 %v5225_v0  ;;  %765 = vmatprep.subr.bf16.mxu1 %v5241_v4  ;;  %v1135_v12 = vpop.permute.xlu0 %1134 }
  0x82   :  { %v1274_v13 = vpop.permute.xlu1 %1273 }
  0x85   :  { %v1413_v14 = vpop.permute.xlu0 %1412 }
  0x86   :  { %4307 = vmatmul.mubr.msk.bf16.vlgmr.msra.gmra.mrb[12].mxu0 %vm160_vm0, %v579_v8  ;;  %4308 = vmatmul.mubr.msk.bf16.vlgmr.msra.gmra.mrb[12].mxu1 %vm160_vm0, %v579_v8  ;;  %v1552_v16 = vpop.permute.xlu1 %1551 }
  0x87   :  { %723 = vmatpush1.bf16.msra.mxu0 %v5236_v3  ;;  %766 = vmatpush1.bf16.msra.mxu1 %v5246_v5 }
  0x88   :  { %754 = vmatprep.mubr.bf16.mxu0 %v5127_v1  ;;  %797 = vmatprep.mubr.bf16.mxu1 %v5127_v1 }
  0x89   :  { %861 = vmatprep.subr.bf16.mxu0 %v5225_v0  ;;  %904 = vmatprep.subr.bf16.mxu1 %v5241_v4 }
  0x8e   :  { %4309 = vmatmul.mubr.msk.bf16.vlgmr.msra.gmra.mrb[16].mxu0 %vm160_vm0, %v718_v9  ;;  %4310 = vmatmul.mubr.msk.bf16.vlgmr.msra.gmra.mrb[16].mxu1 %vm160_vm0, %v718_v9 }
  0x8f   :  { %862 = vmatpush1.bf16.msra.mxu0 %v5236_v3  ;;  %905 = vmatpush1.bf16.msra.mxu1 %v5246_v5 }
  0x90   :  { %893 = vmatprep.mubr.bf16.mxu0 %v5127_v1  ;;  %936 = vmatprep.mubr.bf16.mxu1 %v5127_v1 }
  0x91   :  { %1000 = vmatprep.subr.bf16.mxu0 %v5225_v0  ;;  %1043 = vmatprep.subr.bf16.mxu1 %v5241_v4 }
  0x96   :  { %4311 = vmatmul.mubr.msk.bf16.vlgmr.msra.gmra.mrb[20].mxu0 %vm160_vm0, %v857_v10  ;;  %4312 = vmatmul.mubr.msk.bf16.vlgmr.msra.gmra.mrb[20].mxu1 %vm160_vm0, %v857_v10 }
  0x97   :  { %1001 = vmatpush1.bf16.msra.mxu0 %v5236_v3  ;;  %1044 = vmatpush1.bf16.msra.mxu1 %v5246_v5 }
  0x98   :  { %1032 = vmatprep.mubr.bf16.mxu0 %v5127_v1  ;;  %1075 = vmatprep.mubr.bf16.mxu1 %v5127_v1 }
  0x99   :  { %1139 = vmatprep.subr.bf16.mxu0 %v5225_v0  ;;  %1182 = vmatprep.subr.bf16.mxu1 %v5241_v4 }
  0x9e   :  { %4313 = vmatmul.mubr.msk.bf16.vlgmr.msra.gmra.mrb[24].mxu0 %vm160_vm0, %v996_v11  ;;  %4314 = vmatmul.mubr.msk.bf16.vlgmr.msra.gmra.mrb[24].mxu1 %vm160_vm0, %v996_v11 }
  0x9f   :  { %1140 = vmatpush1.bf16.msra.mxu0 %v5236_v3  ;;  %1183 = vmatpush1.bf16.msra.mxu1 %v5246_v5 }
  0xa0   :  { %1171 = vmatprep.mubr.bf16.mxu0 %v5127_v1  ;;  %1214 = vmatprep.mubr.bf16.mxu1 %v5127_v1 }
  0xa1   :  { %1278 = vmatprep.subr.bf16.mxu0 %v5225_v0  ;;  %1321 = vmatprep.subr.bf16.mxu1 %v5241_v4 }
  0xa6   :  { %4315 = vmatmul.mubr.msk.bf16.vlgmr.msra.gmra.mrb[28].mxu0 %vm160_vm0, %v1135_v12  ;;  %4316 = vmatmul.mubr.msk.bf16.vlgmr.msra.gmra.mrb[28].mxu1 %vm160_vm0, %v1135_v12 }
  0xa7   :  { %1279 = vmatpush1.bf16.msra.mxu0 %v5236_v3  ;;  %1322 = vmatpush1.bf16.msra.mxu1 %v5246_v5 }
  0xa8   :  { %1310 = vmatprep.mubr.bf16.mxu0 %v5127_v1  ;;  %1353 = vmatprep.mubr.bf16.mxu1 %v5127_v1 }
  0xa9   :  { %1417 = vmatprep.subr.bf16.mxu0 %v5225_v0  ;;  %1460 = vmatprep.subr.bf16.mxu1 %v5241_v4 }
  0xae   :  { %4317 = vmatmul.mubr.msk.bf16.vlgmr.msra.gmra.mrb[32].mxu0 %vm160_vm0, %v1274_v13  ;;  %4318 = vmatmul.mubr.msk.bf16.vlgmr.msra.gmra.mrb[32].mxu1 %vm160_vm0, %v1274_v13 }
  0xaf   :  { %1418 = vmatpush1.bf16.msra.mxu0 %v5236_v3  ;;  %1461 = vmatpush1.bf16.msra.mxu1 %v5246_v5 }
  0xb0   :  { %1449 = vmatprep.mubr.bf16.mxu0 %v5127_v1  ;;  %1492 = vmatprep.mubr.bf16.mxu1 %v5127_v1 }
  0xb1   :  { %1556 = vmatprep.subr.bf16.mxu0 %v5225_v0  ;;  %1599 = vmatprep.subr.bf16.mxu1 %v5241_v4 }
  0xb6   :  { %4319 = vmatmul.mubr.msk.bf16.vlgmr.msra.gmra.mrb[36].mxu0 %vm160_vm0, %v1413_v14  ;;  %4320 = vmatmul.mubr.msk.bf16.vlgmr.msra.gmra.mrb[36].mxu1 %vm160_vm0, %v1413_v14 }
  0xb7   :  { %1557 = vmatpush1.bf16.msra.mxu0 %v5236_v3  ;;  %1600 = vmatpush1.bf16.msra.mxu1 %v5246_v5 }
  0xb8   :  { %1588 = vmatprep.mubr.bf16.mxu0 %v5127_v1  ;;  %1631 = vmatprep.mubr.bf16.mxu1 %v5127_v1 }
  0xb9   :  { %1805 = vmatprep.subr.bf16.mxu0 %v5328_v15  ;;  %1857 = vmatprep.subr.bf16.mxu1 %v5328_v15 }
  0xbe   :  { %4321 = vmatmul.mubr.msk.bf16.vlgmr.msra.gmra.mrb[40].mxu0 %vm160_vm0, %v1552_v16  ;;  %4322 = vmatmul.mubr.msk.bf16.vlgmr.msra.gmra.mrb[40].mxu1 %vm160_vm0, %v1552_v16  ;;  %v5533_v16 = vsub.s32 0, %v5413_v29 }
  0xbf   :  { %1806 = vmatpush1.bf16.msra.mxu0 %v5341_v17  ;;  %1858 = vmatpush1.bf16.msra.mxu1 %v5341_v17 }
  0xc0   :  { %1807 = vmatprep.subr.bf16.mxu0 %v5346_v18  ;;  %1859 = vmatprep.subr.bf16.mxu1 %v5346_v18  ;;  %7714 = vst [vmem:[#allocation3_spill] sm:$0xff] %v5533_v16 }
  0xc3   :  { %1808 = vmatpush1.bf16.msra.mxu0 %v5354_v19  ;;  %1860 = vmatpush1.bf16.msra.mxu1 %v5354_v19 }
  0xc4   :  { %1809 = vmatprep.subr.bf16.mxu0 %v5361_v20  ;;  %1861 = vmatprep.subr.bf16.mxu1 %v5361_v20 }
  0xc7   :  { %1810 = vmatpush1.bf16.msra.mxu0 %v5368_v21  ;;  %1862 = vmatpush1.bf16.msra.mxu1 %v5368_v21 }
  0xc8   :  { %1811 = vmatprep.subr.bf16.mxu0 %v5375_v22  ;;  %1863 = vmatprep.subr.bf16.mxu1 %v5375_v22 }
  0xcb   :  { %1812 = vmatpush1.bf16.msra.mxu0 %v5382_v23  ;;  %1864 = vmatpush1.bf16.msra.mxu1 %v5382_v23 }
  0xcc   :  { %1813 = vmatprep.subr.bf16.mxu0 %v5390_v24  ;;  %1865 = vmatprep.subr.bf16.mxu1 %v5390_v24 }
  0xcf   :  { %1814 = vmatpush1.bf16.msra.mxu0 %v5396_v25  ;;  %1866 = vmatpush1.bf16.msra.mxu1 %v5396_v25 }
  0xd0   :  { %1815 = vmatprep.subr.bf16.mxu0 %v5404_v27  ;;  %1867 = vmatprep.subr.bf16.mxu1 %v5404_v27 }
  0xd3   :  { %1816 = vmatpush1.bf16.msra.mxu0 %v5410_v28  ;;  %1868 = vmatpush1.bf16.msra.mxu1 %v5410_v28 }
  0xd4   :  { %1817 = vmatprep.subr.bf16.mxu0 %v5420_v30  ;;  %1869 = vmatprep.subr.bf16.mxu1 %v5420_v30 }
  0xd7   :  { %1818 = vmatpush1.bf16.msra.mxu0 %v5426_v31  ;;  %1870 = vmatpush1.bf16.msra.mxu1 %v5426_v31 }
  0xd8   :  { %1819 = vmatprep.subr.bf16.mxu0 %v5444_v36  ;;  %1871 = vmatprep.subr.bf16.mxu1 %v5444_v36 }
  0xda   :  { %v5462_v40 = vpop.f32.mrb[0].mxu0 }
  0xdb   :  { %v200_v43 = vpop.f32.mrb[1].mxu0  ;;  %1820 = vmatpush1.bf16.msra.mxu0 %v5450_v37  ;;  %1872 = vmatpush1.bf16.msra.mxu1 %v5450_v37 }
  0xdc   :  { %v5480_v45 = vadd.f32 %v200_v43, %v5455_v38  ;;  %v241_v46 = vpop.f32.mrb[0].mxu1  ;;  %v5482_v47 = vpop.f32.mrb[2].mxu0  ;;  %1821 = vmatprep.subr.bf16.mxu0 %v5470_v42  ;;  %1873 = vmatprep.subr.bf16.mxu1 %v5470_v42 }
  0xdd   :  { %v242_v48 = vadd.f32 %v241_v46, %v5460_v39  ;;  %v243_v49 = vpop.f32.mrb[1].mxu1  ;;  %v204_v50 = vpop.f32.mrb[3].mxu0 }
  0xde   :  { %v244_v51 = vadd.f32 %v243_v49, %v5465_v41  ;;  %v5489_v52 = vadd.f32 %v204_v50, %v5455_v38  ;;  %v245_v53 = vpop.f32.mrb[2].mxu1  ;;  %v5543_v50 = vrot.slane %v5437_v33, %v5533_v16 }
  0xdf   :  { %v4564_v55 = vpack.i.bf16 %v242_v48, %v5480_v45  ;;  %v246_v56 = vadd.f32 %v245_v53, %v5460_v39  ;;  %v247_v57 = vpop.f32.mrb[3].mxu1  ;;  %1822 = vmatpush1.bf16.msra.mxu0 %v5476_v44  ;;  %1874 = vmatpush1.bf16.msra.mxu1 %v5476_v44 }
  0xe0   :  { %v4569_v59 = vpack.i.bf16 %v244_v51, %v242_v48  ;;  %v248_v60 = vadd.f32 %v247_v57, %v5465_v41  ;;  %1823 = vmatprep.subr.bf16.mxu0 %v5494_v54  ;;  %1875 = vmatprep.subr.bf16.mxu1 %v5494_v54 }
  0xe1   :  { %v4574_v61 = vpack.i.bf16 %v246_v56, %v5489_v52  ;;  %4565 = vrot.lane.b32.xlu0 %v4564_v55, %s5138_s28 }
  0xe2   :  { %v4579_v62 = vpack.i.bf16 %v248_v60, %v246_v56 }
  0xe3   :  { %4575 = vrot.lane.b32.xlu1 %v4574_v61, %s5138_s28  ;;  %1824 = vmatpush1.bf16.msra.mxu0 %v5502_v58 }
  0xe4   :  { %1909 = vmatprep.subr.bf16.mxu0 %v5328_v15  ;;  %1876 = vmatpush1.bf16.msra.mxu1 %v5502_v58 }
  0xe5   :  { %4570 = vrot.lane.b32.xlu0 %v4569_v59, %s5139_s0  ;;  %1961 = vmatprep.subr.bf16.mxu1 %v5328_v15 }
  0xe7   :  { %4580 = vrot.lane.b32.xlu1 %v4579_v62, %s5139_s0 }
 0x149   :  { %v5517_v63 = vpop.f32.mrb[4].mxu0  ;;  %v382_v0 = vpop.f32.mrb[4].mxu1 }
 0x14a   :  { %v383_v1 = vadd.f32 %v382_v0, %v5460_v39  ;;  %v341_v2 = vpop.f32.mrb[5].mxu0  ;;  %v384_v3 = vpop.f32.mrb[5].mxu1 }
 0x14b   :  { %v5521_v4 = vadd.f32 %v341_v2, %v5455_v38  ;;  %v385_v5 = vadd.f32 %v384_v3, %v5465_v41  ;;  %v5524_v6 = vpop.f32.mrb[6].mxu0  ;;  %v386_v7 = vpop.f32.mrb[6].mxu1 }
 0x14c   :  { %v387_v8 = vadd.f32 %v386_v7, %v5460_v39  ;;  %v345_v9 = vpop.f32.mrb[7].mxu0  ;;  %v388_v10 = vpop.f32.mrb[7].mxu1 }
 0x14d   :  { %v4584_v11 = vpack.i.bf16 %v383_v1, %v5521_v4  ;;  %v4589_v12 = vpack.i.bf16 %v385_v5, %v383_v1  ;;  %v5529_v13 = vadd.f32 %v345_v9, %v5455_v38  ;;  %v389_v14 = vadd.f32 %v388_v10, %v5465_v41 }
 0x14f   :  { %v4594_v26 = vpack.i.bf16 %v387_v8, %v5529_v13  ;;  %v4599_v34 = vpack.i.bf16 %v389_v14, %v387_v8  ;;  %4585 = vrot.lane.b32.xlu0 %v4584_v11, %s5138_s28  ;;  %v199_v8 = vadd.f32 %v5462_v40, %v5543_v50 }
 0x151   :  { %v5537_v35 = vpop.f32.mrb[8].mxu0  ;;  %v521_v43 = vpop.f32.mrb[8].mxu1  ;;  %4595 = vrot.lane.b32.xlu1 %v4594_v26, %s5138_s28 }
 0x152   :  { %v522_v46 = vadd.f32 %v521_v43, %v5460_v39  ;;  %v480_v48 = vpop.f32.mrb[9].mxu0  ;;  %v523_v49 = vpop.f32.mrb[9].mxu1  ;;  %v203_v43 = vadd.f32 %v5482_v47, %v5543_v50 }
 0x153   :  { %v5546_v29 = vadd.f32 %v480_v48, %v5455_v38  ;;  %v524_v51 = vadd.f32 %v523_v49, %v5465_v41  ;;  %v4566_v53 = vpop.permute.xlu0 %4565  ;;  %v5549_v55 = vpop.f32.mrb[10].mxu0  ;;  %4590 = vrot.lane.b32.xlu0 %v4589_v12, %s5139_s0 }
 0x154   :  { %v4568_v56 = vunpack.i.h.bf16 %v4566_v53  ;;  %v4567_v57 = vunpack.i.l.bf16 %v4566_v53  ;;  %v525_v59 = vpop.f32.mrb[10].mxu1  ;;  %v484_v60 = vpop.f32.mrb[11].mxu0 }
 0x155   :  { %v4604_v61 = vpack.i.bf16 %v522_v46, %v5546_v29  ;;  %v4609_v62 = vpack.i.bf16 %v524_v51, %v522_v46  ;;  %v526_v33 = vadd.f32 %v525_v59, %v5460_v39  ;;  %v5555_v0 = vadd.f32 %v484_v60, %v5455_v38  ;;  %v527_v1 = vpop.f32.mrb[11].mxu1  ;;  %v4576_v2 = vpop.permute.xlu1 %4575  ;;  %4600 = vrot.lane.b32.xlu1 %v4599_v34, %s5139_s0 }
 0x156   :  { %v263_v3 = vsel %vm262_vm1, %v4567_v57, %v4568_v56  ;;  %v528_v5 = vadd.f32 %v527_v1, %v5465_v41  ;;  %v4578_v7 = vunpack.i.h.bf16 %v4576_v2  ;;  %v4577_v10 = vunpack.i.l.bf16 %v4576_v2 }
 0x157   :  { %v4614_v9 = vpack.i.bf16 %v526_v33, %v5555_v0  ;;  %v4571_v11 = vpop.permute.xlu0 %4570  ;;  %4605 = vrot.lane.b32.xlu0 %v4604_v61, %s5138_s28  ;;  %v270_v12 = vmax.f32 %v5480_v45, %v4568_v56  ;;  %v269_v46 = vmax.f32 %v199_v8, %v263_v3 }
 0x158   :  { %v4619_v14 = vpack.i.bf16 %v528_v5, %v526_v33  ;;  %v4573_v26 = vunpack.i.h.bf16 %v4571_v11  ;;  %v4572_v34 = vunpack.i.l.bf16 %v4571_v11  ;;  %v264_v48 = vsel %vm262_vm1, %v4577_v10, %v4578_v7 }
 0x159   :  { %v4581_v49 = vpop.permute.xlu1 %4580  ;;  %v5568_v40 = vpop.f32.mrb[12].mxu0  ;;  %4615 = vrot.lane.b32.xlu1 %v4614_v9, %s5138_s28  ;;  %v272_v51 = vmax.f32 %v5489_v52, %v4578_v7  ;;  %v271_v1 = vmax.f32 %v203_v43, %v264_v48 }
 0x15a   :  { %v284_v53 = vsel %vm283_vm2, %v4572_v34, %v4573_v26  ;;  %v291_v57 = vmax.f32 %v270_v12, %v4573_v26  ;;  %v4583_v45 = vunpack.i.h.bf16 %v4581_v49  ;;  %v619_v56 = vpop.f32.mrb[13].mxu0  ;;  %v660_v59 = vpop.f32.mrb[12].mxu1  ;;  %v4582_v60 = vunpack.i.l.bf16 %v4581_v49 }
 0x15b   :  { %v5574_v61 = vadd.f32 %v619_v56, %v5455_v38  ;;  %v5576_v47 = vpop.f32.mrb[14].mxu0  ;;  %v662_v33 = vpop.f32.mrb[13].mxu1  ;;  %4610 = vrot.lane.b32.xlu0 %v4609_v62, %s5139_s0  ;;  %v290_v2 = vmax.f32 %v269_v46, %v284_v53  ;;  %v661_v52 = vadd.f32 %v660_v59, %v5460_v39 }
 0x15c   :  { %v293_v3 = vmax.f32 %v272_v51, %v4583_v45  ;;  %v623_v5 = vpop.f32.mrb[15].mxu0  ;;  %v664_v7 = vpop.f32.mrb[14].mxu1  ;;  %v295_v8 = vmax.f32 %v291_v57, 0.0  ;;  %v285_v9 = vsel %vm283_vm2, %v4582_v60, %v4583_v45  ;;  %v663_v10 = vadd.f32 %v662_v33, %v5465_v41 }
 0x15d   :  { %v5583_v11 = vadd.f32 %v623_v5, %v5455_v38  ;;  %4620 = vrot.lane.b32.xlu1 %v4619_v14, %s5139_s0  ;;  %v666_v12 = vpop.f32.mrb[15].mxu1  ;;  %v292_v26 = vmax.f32 %v271_v1, %v285_v9  ;;  %v4624_v34 = vpack.i.bf16 %v661_v52, %v5574_v61  ;;  %v665_v43 = vadd.f32 %v664_v7, %v5460_v39 }
 0x15e   :  { %v297_v62 = vmax.f32 %v293_v3, 0.0  ;;  %v4629_v46 = vpack.i.bf16 %v663_v10, %v661_v52  ;;  %v667_v48 = vadd.f32 %v666_v12, %v5465_v41  ;;  %v294_v49 = vmax.f32 %v290_v2, 0.0 }
 0x15f   :  { %v296_v51 = vmax.f32 %v292_v26, 0.0  ;;  %v4634_v57 = vpack.i.bf16 %v665_v43, %v5583_v11  ;;  %4625 = vrot.lane.b32.xlu0 %v4624_v34, %s5138_s28 }
 0x160   :  { %v299_v53 = vpack.c.bf16 %v297_v62, %v295_v8  ;;  %v4639_v45 = vpack.i.bf16 %v667_v48, %v665_v43 }
 0x161   :  { %v5591_v14 = vpop.f32.mrb[16].mxu0  ;;  %v799_v56 = vpop.f32.mrb[16].mxu1  ;;  %4635 = vrot.lane.b32.xlu1 %v4634_v57, %s5138_s28  ;;  %v298_v33 = vpack.c.bf16 %v296_v51, %v294_v49 }
 0x162   :  { %4343 = vmatprep.mubr.msk.bf16.mxu0 %vm1801_vm3, %v299_v53  ;;  %v758_v59 = vpop.f32.mrb[17].mxu0  ;;  %v800_v60 = vadd.f32 %v799_v56, %v5460_v39  ;;  %v801_v1 = vpop.f32.mrb[17].mxu1 }
 0x163   :  { %v5597_v2 = vadd.f32 %v758_v59, %v5455_v38  ;;  %v5599_v3 = vpop.f32.mrb[18].mxu0  ;;  %v802_v52 = vadd.f32 %v801_v1, %v5465_v41  ;;  %v803_v5 = vpop.f32.mrb[18].mxu1  ;;  %1838 = vmatmul.mubr.bf16.vlgmr.msra.gmra.mrb[44].mxu0 %v298_v33  ;;  %4630 = vrot.lane.b32.xlu0 %v4629_v46, %s5139_s0 }
 0x164   :  { %v762_v7 = vpop.f32.mrb[19].mxu0  ;;  %v804_v8 = vadd.f32 %v803_v5, %v5460_v39  ;;  %v805_v9 = vpop.f32.mrb[19].mxu1  ;;  %1910 = vmatpush1.bf16.msra.mxu0 %v5341_v17 }
 0x165   :  { %v4644_v10 = vpack.i.bf16 %v800_v60, %v5597_v2  ;;  %v4649_v12 = vpack.i.bf16 %v802_v52, %v800_v60  ;;  %v5606_v26 = vadd.f32 %v762_v7, %v5455_v38  ;;  %v806_v62 = vadd.f32 %v805_v9, %v5465_v41  ;;  %4640 = vrot.lane.b32.xlu1 %v4639_v45, %s5139_s0 }
 0x166   :  { %1911 = vmatprep.subr.bf16.mxu0 %v5346_v18 }
 0x167   :  { %v4654_v34 = vpack.i.bf16 %v804_v8, %v5606_v26  ;;  %v4659_v43 = vpack.i.bf16 %v806_v62, %v804_v8  ;;  %4645 = vrot.lane.b32.xlu0 %v4644_v10, %s5138_s28 }
 0x168   :  { %1912 = vmatpush1.bf16.msra.mxu0 %v5354_v19 }
 0x169   :  { %v5614_v46 = vpop.f32.mrb[20].mxu0  ;;  %v938_v48 = vpop.f32.mrb[20].mxu1  ;;  %4655 = vrot.lane.b32.xlu1 %v4654_v34, %s5138_s28  ;;  %1913 = vmatprep.subr.bf16.mxu0 %v5361_v20 }
 0x16a   :  { %v897_v49 = vpop.f32.mrb[21].mxu0  ;;  %v939_v51 = vadd.f32 %v938_v48, %v5460_v39  ;;  %v940_v53 = vpop.f32.mrb[21].mxu1 }
 0x16b   :  { %v5621_v57 = vadd.f32 %v897_v49, %v5455_v38  ;;  %v5623_v45 = vpop.f32.mrb[22].mxu0  ;;  %v941_v56 = vadd.f32 %v940_v53, %v5465_v41  ;;  %v942_v59 = vpop.f32.mrb[22].mxu1  ;;  %4650 = vrot.lane.b32.xlu0 %v4649_v12, %s5139_s0 }
 0x16c   :  { %v901_v60 = vpop.f32.mrb[23].mxu0  ;;  %v943_v33 = vadd.f32 %v942_v59, %v5460_v39  ;;  %v944_v1 = vpop.f32.mrb[23].mxu1  ;;  %1914 = vmatpush1.bf16.msra.mxu0 %v5368_v21 }
 0x16d   :  { %v4664_v52 = vpack.i.bf16 %v939_v51, %v5621_v57  ;;  %v4669_v5 = vpack.i.bf16 %v941_v56, %v939_v51  ;;  %v5630_v7 = vadd.f32 %v901_v60, %v5455_v38  ;;  %v945_v8 = vadd.f32 %v944_v1, %v5465_v41  ;;  %4660 = vrot.lane.b32.xlu1 %v4659_v43, %s5139_s0 }
 0x16e   :  { %1915 = vmatprep.subr.bf16.mxu0 %v5375_v22 }
 0x16f   :  { %v4674_v9 = vpack.i.bf16 %v943_v33, %v5630_v7  ;;  %v4679_v10 = vpack.i.bf16 %v945_v8, %v943_v33  ;;  %4665 = vrot.lane.b32.xlu0 %v4664_v52, %s5138_s28 }
 0x170   :  { %1916 = vmatpush1.bf16.msra.mxu0 %v5382_v23 }
 0x171   :  { %v5638_v12 = vpop.f32.mrb[24].mxu0  ;;  %v1077_v62 = vpop.f32.mrb[24].mxu1  ;;  %4675 = vrot.lane.b32.xlu1 %v4674_v9, %s5138_s28  ;;  %1917 = vmatprep.subr.bf16.mxu0 %v5390_v24 }
 0x172   :  { %v1036_v34 = vpop.f32.mrb[25].mxu0  ;;  %v1078_v48 = vadd.f32 %v1077_v62, %v5460_v39  ;;  %v1079_v49 = vpop.f32.mrb[25].mxu1 }
 0x173   :  { %v5645_v43 = vadd.f32 %v1036_v34, %v5455_v38  ;;  %v5647_v51 = vpop.f32.mrb[26].mxu0  ;;  %v1080_v53 = vadd.f32 %v1079_v49, %v5465_v41  ;;  %v1081_v56 = vpop.f32.mrb[26].mxu1  ;;  %4670 = vrot.lane.b32.xlu0 %v4669_v5, %s5139_s0 }
 0x174   :  { %v1040_v59 = vpop.f32.mrb[27].mxu0  ;;  %v1082_v60 = vadd.f32 %v1081_v56, %v5460_v39  ;;  %v1083_v33 = vpop.f32.mrb[27].mxu1  ;;  %1918 = vmatpush1.bf16.msra.mxu0 %v5396_v25 }
 0x175   :  { %v4684_v1 = vpack.i.bf16 %v1078_v48, %v5645_v43  ;;  %v4689_v52 = vpack.i.bf16 %v1080_v53, %v1078_v48  ;;  %v5654_v8 = vadd.f32 %v1040_v59, %v5455_v38  ;;  %v1084_v9 = vadd.f32 %v1083_v33, %v5465_v41  ;;  %4680 = vrot.lane.b32.xlu1 %v4679_v10, %s5139_s0 }
 0x176   :  { %1919 = vmatprep.subr.bf16.mxu0 %v5404_v27 }
 0x177   :  { %v4694_v5 = vpack.i.bf16 %v1082_v60, %v5654_v8  ;;  %v4699_v62 = vpack.i.bf16 %v1084_v9, %v1082_v60  ;;  %4685 = vrot.lane.b32.xlu0 %v4684_v1, %s5138_s28 }
 0x178   :  { %1920 = vmatpush1.bf16.msra.mxu0 %v5410_v28 }
 0x179   :  { %v5662_v34 = vpop.f32.mrb[28].mxu0  ;;  %v1216_v49 = vpop.f32.mrb[28].mxu1  ;;  %4695 = vrot.lane.b32.xlu1 %v4694_v5, %s5138_s28  ;;  %1921 = vmatprep.subr.bf16.mxu0 %v5420_v30 }
 0x17a   :  { %v1175_v48 = vpop.f32.mrb[29].mxu0  ;;  %v1217_v53 = vadd.f32 %v1216_v49, %v5460_v39  ;;  %v1218_v56 = vpop.f32.mrb[29].mxu1 }
 0x17b   :  { %v5669_v10 = vadd.f32 %v1175_v48, %v5455_v38  ;;  %v5671_v59 = vpop.f32.mrb[30].mxu0  ;;  %v1219_v60 = vadd.f32 %v1218_v56, %v5465_v41  ;;  %v1220_v33 = vpop.f32.mrb[30].mxu1  ;;  %4690 = vrot.lane.b32.xlu0 %v4689_v52, %s5139_s0 }
 0x17c   :  { %v1179_v1 = vpop.f32.mrb[31].mxu0  ;;  %v1221_v9 = vadd.f32 %v1220_v33, %v5460_v39  ;;  %v1222_v5 = vpop.f32.mrb[31].mxu1  ;;  %1922 = vmatpush1.bf16.msra.mxu0 %v5426_v31 }
 0x17d   :  { %7715 = vst [vmem:[#allocation4_spill] sm:$0xff] %v5669_v10  ;;  %v4704_v32 = vpack.i.bf16 %v1217_v53, %v5669_v10  ;;  %v4709_v49 = vpack.i.bf16 %v1219_v60, %v1217_v53  ;;  %v5678_v16 = vadd.f32 %v1179_v1, %v5455_v38  ;;  %v1223_v48 = vadd.f32 %v1222_v5, %v5465_v41 }
 0x17e   :  { %4700 = vrot.lane.b32.xlu1 %v4699_v62, %s5139_s0  ;;  %1923 = vmatprep.subr.bf16.mxu0 %v5444_v36 }
 0x17f   :  { %7716 = vst [vmem:[#allocation5_spill] sm:$0xff] %v5678_v16  ;;  %v4714_v52 = vpack.i.bf16 %v1221_v9, %v5678_v16  ;;  %v4719_v56 = vpack.i.bf16 %v1223_v48, %v1221_v9  ;;  %4705 = vrot.lane.b32.xlu0 %v4704_v32, %s5138_s28 }
 0x180   :  { %1924 = vmatpush1.bf16.msra.mxu0 %v5450_v37 }
 0x181   :  { %v5686_v33 = vpop.f32.mrb[32].mxu0  ;;  %v1355_v10 = vpop.f32.mrb[32].mxu1  ;;  %1925 = vmatprep.subr.bf16.mxu0 %v5470_v42 }
 0x182   :  { %7717 = vst [vmem:[#allocation6_spill] sm:$0xff] %v5686_v33  ;;  %4715 = vrot.lane.b32.xlu1 %v4714_v52, %s5138_s28  ;;  %v1314_v53 = vpop.f32.mrb[33].mxu0  ;;  %v1356_v60 = vadd.f32 %v1355_v10, %v5460_v39  ;;  %v1357_v1 = vpop.f32.mrb[33].mxu1 }
 0x183   :  { %v5693_v62 = vadd.f32 %v1314_v53, %v5455_v38  ;;  %v5695_v5 = vpop.f32.mrb[34].mxu0  ;;  %v1358_v32 = vadd.f32 %v1357_v1, %v5465_v41  ;;  %v1359_v9 = vpop.f32.mrb[34].mxu1  ;;  %4710 = vrot.lane.b32.xlu0 %v4709_v49, %s5139_s0 }
 0x184   :  { %7719 = vst [vmem:[#allocation8_spill] sm:$0xff] %v5695_v5  ;;  %v1318_v48 = vpop.f32.mrb[35].mxu0  ;;  %v1360_v37 = vadd.f32 %v1359_v9, %v5460_v39  ;;  %v1361_v52 = vpop.f32.mrb[35].mxu1  ;;  %1926 = vmatpush1.bf16.msra.mxu0 %v5476_v44 }
 0x185   :  { %7718 = vst [vmem:[#allocation7_spill] sm:$0xff] %v5693_v62  ;;  %v4724_v16 = vpack.i.bf16 %v1356_v60, %v5693_v62  ;;  %v4729_v10 = vpack.i.bf16 %v1358_v32, %v1356_v60  ;;  %v5702_v33 = vadd.f32 %v1318_v48, %v5455_v38  ;;  %v1362_v42 = vadd.f32 %v1361_v52, %v5465_v41 }
 0x186   :  { %4720 = vrot.lane.b32.xlu1 %v4719_v56, %s5139_s0  ;;  %1927 = vmatprep.subr.bf16.mxu0 %v5494_v54 }
 0x187   :  { %7720 = vst [vmem:[#allocation9_spill] sm:$0xff] %v5702_v33  ;;  %v4734_v49 = vpack.i.bf16 %v1360_v37, %v5702_v33  ;;  %v4739_v53 = vpack.i.bf16 %v1362_v42, %v1360_v37  ;;  %4725 = vrot.lane.b32.xlu0 %v4724_v16, %s5138_s28 }
 0x188   :  { %1928 = vmatpush1.bf16.msra.mxu0 %v5502_v58 }
 0x189   :  { %v5710_v1 = vpop.f32.mrb[36].mxu0  ;;  %v1494_v9 = vpop.f32.mrb[36].mxu1  ;;  %2013 = vmatprep.subr.bf16.mxu0 %v5328_v15 }
 0x18a   :  { %7721 = vst [vmem:[#allocation10_spill] sm:$0xff] %v5710_v1  ;;  %4735 = vrot.lane.b32.xlu1 %v4734_v49, %s5138_s28  ;;  %v1453_v60 = vpop.f32.mrb[37].mxu0  ;;  %v1495_v32 = vadd.f32 %v1494_v9, %v5460_v39  ;;  %v1496_v44 = vpop.f32.mrb[37].mxu1 }
 0x18b   :  { %v5717_v54 = vadd.f32 %v1453_v60, %v5455_v38  ;;  %v5719_v56 = vpop.f32.mrb[38].mxu0  ;;  %v1497_v16 = vadd.f32 %v1496_v44, %v5465_v41  ;;  %v1498_v48 = vpop.f32.mrb[38].mxu1  ;;  %4730 = vrot.lane.b32.xlu0 %v4729_v10, %s5139_s0 }
 0x18c   :  { %7723 = vst [vmem:[#allocation12_spill] sm:$0xff] %v5719_v56  ;;  %v1457_v37 = vpop.f32.mrb[39].mxu0  ;;  %v1499_v58 = vadd.f32 %v1498_v48, %v5460_v39  ;;  %v1500_v52 = vpop.f32.mrb[39].mxu1 }
 0x18d   :  { %7722 = vst [vmem:[#allocation11_spill] sm:$0xff] %v5717_v54  ;;  %v4744_v42 = vpack.i.bf16 %v1495_v32, %v5717_v54  ;;  %v4749_v49 = vpack.i.bf16 %v1497_v16, %v1495_v32  ;;  %v5726_v9 = vadd.f32 %v1457_v37, %v5455_v38  ;;  %v1501_v15 = vadd.f32 %v1500_v52, %v5465_v41 }
 0x18e   :  { %4740 = vrot.lane.b32.xlu1 %v4739_v53, %s5139_s0 }
 0x18f   :  { %7724 = vst [vmem:[#allocation13_spill] sm:$0xff] %v5726_v9  ;;  %v4754_v60 = vpack.i.bf16 %v1499_v58, %v5726_v9  ;;  %v4759_v44 = vpack.i.bf16 %v1501_v15, %v1499_v58  ;;  %4745 = vrot.lane.b32.xlu0 %v4744_v42, %s5138_s28 }
 0x191   :  { %v5732_v10 = vpop.f32.mrb[40].mxu0  ;;  %v1633_v62 = vpop.f32.mrb[40].mxu1 }
 0x192   :  { %7725 = vst [vmem:[#allocation14_spill] sm:$0xff] %v5732_v10  ;;  %4755 = vrot.lane.b32.xlu1 %v4754_v60, %s5138_s28  ;;  %v1592_v48 = vpop.f32.mrb[41].mxu0  ;;  %v1634_v32 = vadd.f32 %v1633_v62, %v5460_v39  ;;  %v1635_v16 = vpop.f32.mrb[41].mxu1 }
 0x193   :  { %v5737_v37 = vadd.f32 %v1592_v48, %v5455_v38  ;;  %v5739_v52 = vpop.f32.mrb[42].mxu0  ;;  %v1636_v53 = vadd.f32 %v1635_v16, %v5465_v41  ;;  %v1637_v54 = vpop.f32.mrb[42].mxu1  ;;  %4750 = vrot.lane.b32.xlu0 %v4749_v49, %s5139_s0 }
 0x194   :  { %7727 = vst [vmem:[#allocation16_spill] sm:$0xff] %v5739_v52  ;;  %v1596_v58 = vpop.f32.mrb[43].mxu0  ;;  %v1638_v42 = vadd.f32 %v1637_v54, %v5460_v39  ;;  %v1639_v15 = vpop.f32.mrb[43].mxu1 }
 0x195   :  { %7726 = vst [vmem:[#allocation15_spill] sm:$0xff] %v5737_v37  ;;  %v4764_v60 = vpack.i.bf16 %v1634_v32, %v5737_v37  ;;  %v4769_v9 = vpack.i.bf16 %v1636_v53, %v1634_v32  ;;  %v5746_v62 = vadd.f32 %v1596_v58, %v5455_v38  ;;  %v1640_v48 = vadd.f32 %v1639_v15, %v5465_v41 }
 0x196   :  { %4760 = vrot.lane.b32.xlu1 %v4759_v44, %s5139_s0  ;;  %v340_v44 = vadd.f32 %v5517_v63, %v5543_v50 }
 0x197   :  { %7728 = vst [vmem:[#allocation17_spill] sm:$0xff] %v5746_v62  ;;  %v4774_v33 = vpack.i.bf16 %v1638_v42, %v5746_v62  ;;  %v4779_v16 = vpack.i.bf16 %v1640_v48, %v1638_v42  ;;  %4765 = vrot.lane.b32.xlu0 %v4764_v60, %s5138_s28  ;;  %v344_v60 = vadd.f32 %v5524_v6, %v5543_v50 }
 0x19a   :  { %4775 = vrot.lane.b32.xlu1 %v4774_v33, %s5138_s28 }
 0x19b   :  { %4770 = vrot.lane.b32.xlu0 %v4769_v9, %s5139_s0 }
 0x19e   :  { %4780 = vrot.lane.b32.xlu1 %v4779_v16, %s5139_s0 }
 0x1c1   :  { %v4586_v39 = vpop.permute.xlu0 %4585 }
 0x1c2   :  { %v4588_v54 = vunpack.i.h.bf16 %v4586_v39  ;;  %v4587_v49 = vunpack.i.l.bf16 %v4586_v39 }
 0x1c3   :  { %v4596_v38 = vpop.permute.xlu1 %4595 }
 0x1c4   :  { %v403_v32 = vsel %vm262_vm1, %v4587_v49, %v4588_v54  ;;  %v4598_v41 = vunpack.i.h.bf16 %v4596_v38  ;;  %v4597_v53 = vunpack.i.l.bf16 %v4596_v38  ;;  %v410_v42 = vmax.f32 %v5521_v4, %v4588_v54 }
 0x1c5   :  { %v4591_v58 = vpop.permute.xlu0 %4590  ;;  %v409_v48 = vmax.f32 %v340_v44, %v403_v32 }
 0x1c6   :  { %v404_v33 = vsel %vm262_vm1, %v4597_v53, %v4598_v41  ;;  %v4593_v15 = vunpack.i.h.bf16 %v4591_v58  ;;  %v4592_v9 = vunpack.i.l.bf16 %v4591_v58  ;;  %v412_v16 = vmax.f32 %v5529_v13, %v4598_v41 }
 0x1c7   :  { %v4601_v39 = vpop.permute.xlu1 %4600  ;;  %v411_v63 = vmax.f32 %v344_v60, %v404_v33  ;;  %v479_v33 = vadd.f32 %v5537_v35, %v5543_v50 }
 0x1c8   :  { %v423_v49 = vsel %vm283_vm2, %v4592_v9, %v4593_v15  ;;  %v430_v38 = vmax.f32 %v410_v42, %v4593_v15  ;;  %v4603_v37 = vunpack.i.h.bf16 %v4601_v39  ;;  %v4602_v62 = vunpack.i.l.bf16 %v4601_v39 }
 0x1c9   :  { %v429_v52 = vmax.f32 %v409_v48, %v423_v49  ;;  %v4606_v10 = vpop.permute.xlu0 %4605 }
 0x1ca   :  { %v424_v4 = vsel %vm283_vm2, %v4602_v62, %v4603_v37  ;;  %v432_v54 = vmax.f32 %v412_v16, %v4603_v37  ;;  %v4608_v53 = vunpack.i.h.bf16 %v4606_v10  ;;  %v4607_v56 = vunpack.i.l.bf16 %v4606_v10 }
 0x1cb   :  { %v431_v58 = vmax.f32 %v411_v63, %v424_v4  ;;  %v4616_v1 = vpop.permute.xlu1 %4615  ;;  %v434_v6 = vmax.f32 %v430_v38, 0.0  ;;  %v433_v41 = vmax.f32 %v429_v52, 0.0  ;;  %v483_v62 = vadd.f32 %v5549_v55, %v5543_v50 }
 0x1cc   :  { %v436_v32 = vmax.f32 %v432_v54, 0.0  ;;  %v4618_v44 = vunpack.i.h.bf16 %v4616_v1  ;;  %v4617_v13 = vunpack.i.l.bf16 %v4616_v1  ;;  %v542_v42 = vsel %vm262_vm1, %v4607_v56, %v4608_v53 }
 0x1cd   :  { %v435_v5 = vmax.f32 %v431_v58, 0.0  ;;  %v4611_v15 = vpop.permute.xlu0 %4610  ;;  %v549_v10 = vmax.f32 %v5546_v29, %v4608_v53  ;;  %v548_v52 = vmax.f32 %v479_v33, %v542_v42 }
 0x1ce   :  { %v438_v37 = vpack.c.bf16 %v436_v32, %v434_v6  ;;  %v543_v9 = vsel %vm262_vm1, %v4617_v13, %v4618_v44  ;;  %v4613_v60 = vunpack.i.h.bf16 %v4611_v15  ;;  %v4612_v48 = vunpack.i.l.bf16 %v4611_v15 }
 0x1cf   :  { %v4621_v16 = vpop.permute.xlu1 %4620  ;;  %v437_v1 = vpack.c.bf16 %v435_v5, %v433_v41  ;;  %v551_v39 = vmax.f32 %v5555_v0, %v4618_v44  ;;  %v550_v35 = vmax.f32 %v483_v62, %v543_v9 }
 0x1d0   :  { %v4623_v56 = vunpack.i.h.bf16 %v4621_v16  ;;  %v4622_v49 = vunpack.i.l.bf16 %v4621_v16  ;;  %4344 = vmatprep.mubr.msk.bf16.mxu1 %vm1801_vm3, %v438_v37  ;;  %v562_v38 = vsel %vm283_vm2, %v4612_v48, %v4613_v60  ;;  %v569_v55 = vmax.f32 %v549_v10, %v4613_v60 }
 0x1d1   :  { %1890 = vmatmul.mubr.bf16.vlgmr.msra.gmra.mrb[44].mxu1 %v437_v1  ;;  %v568_v63 = vmax.f32 %v548_v52, %v562_v38  ;;  %v4626_v54 = vpop.permute.xlu0 %4625  ;;  %v618_v48 = vadd.f32 %v5568_v40, %v5543_v50  ;;  %v622_v16 = vadd.f32 %v5576_v47, %v5543_v50 }
 0x1d2   :  { %v563_v4 = vsel %vm283_vm2, %v4622_v49, %v4623_v56  ;;  %v571_v29 = vmax.f32 %v551_v39, %v4623_v56  ;;  %1962 = vmatpush1.bf16.msra.mxu1 %v5341_v17  ;;  %v4628_v53 = vunpack.i.h.bf16 %v4626_v54  ;;  %v4627_v58 = vunpack.i.l.bf16 %v4626_v54 }
 0x1d3   :  { %v570_v5 = vmax.f32 %v550_v35, %v563_v4  ;;  %1963 = vmatprep.subr.bf16.mxu1 %v5346_v18  ;;  %v573_v0 = vmax.f32 %v569_v55, 0.0  ;;  %v4636_v32 = vpop.permute.xlu1 %4635  ;;  %v572_v44 = vmax.f32 %v568_v63, 0.0 }
 0x1d4   :  { %v575_v6 = vmax.f32 %v571_v29, 0.0  ;;  %v4638_v41 = vunpack.i.h.bf16 %v4636_v32  ;;  %v688_v15 = vmax.f32 %v5574_v61, %v4628_v53  ;;  %v4637_v33 = vunpack.i.l.bf16 %v4636_v32 }
 0x1d5   :  { %v574_v13 = vmax.f32 %v570_v5, 0.0  ;;  %v4631_v62 = vpop.permute.xlu0 %4630  ;;  %v681_v37 = vsel %vm262_vm1, %v4627_v58, %v4628_v53 }
 0x1d6   :  { %v577_v42 = vpack.c.bf16 %v575_v6, %v573_v0  ;;  %1964 = vmatpush1.bf16.msra.mxu1 %v5354_v19  ;;  %v4633_v9 = vunpack.i.h.bf16 %v4631_v62  ;;  %v4632_v10 = vunpack.i.l.bf16 %v4631_v62  ;;  %v682_v1 = vsel %vm262_vm1, %v4637_v33, %v4638_v41 }
 0x1d7   :  { %1965 = vmatprep.subr.bf16.mxu1 %v5361_v20  ;;  %v576_v60 = vpack.c.bf16 %v574_v13, %v572_v44  ;;  %v4641_v61 = vpop.permute.xlu1 %4640  ;;  %v690_v52 = vmax.f32 %v5583_v11, %v4638_v41  ;;  %v687_v35 = vmax.f32 %v618_v48, %v681_v37  ;;  %v689_v40 = vmax.f32 %v622_v16, %v682_v1 }
 0x1d8   :  { %4345 = vmatprep.mubr.msk.bf16.mxu0 %vm1801_vm3, %v577_v42  ;;  %v701_v39 = vsel %vm283_vm2, %v4632_v10, %v4633_v9  ;;  %v708_v56 = vmax.f32 %v688_v15, %v4633_v9  ;;  %v4643_v49 = vunpack.i.h.bf16 %v4641_v61  ;;  %v4642_v38 = vunpack.i.l.bf16 %v4641_v61 }
 0x1d9   :  { %1942 = vmatmul.mubr.bf16.vlgmr.msra.gmra.mrb[48].mxu0 %v576_v60  ;;  %v4646_v55 = vpop.permute.xlu0 %4645  ;;  %v707_v11 = vmax.f32 %v687_v35, %v701_v39  ;;  %v761_v15 = vadd.f32 %v5599_v3, %v5543_v50 }
 0x1da   :  { %1966 = vmatpush1.bf16.msra.mxu1 %v5368_v21  ;;  %2014 = vmatpush1.bf16.msra.mxu0 %v5341_v17  ;;  %v710_v47 = vmax.f32 %v690_v52, %v4643_v49  ;;  %v4648_v63 = vunpack.i.h.bf16 %v4646_v55  ;;  %v4647_v4 = vunpack.i.l.bf16 %v4646_v55  ;;  %v702_v29 = vsel %vm283_vm2, %v4642_v38, %v4643_v49 }
 0x1db   :  { %1967 = vmatprep.subr.bf16.mxu1 %v5375_v22  ;;  %2015 = vmatprep.subr.bf16.mxu0 %v5346_v18  ;;  %v4656_v54 = vpop.permute.xlu1 %4655  ;;  %v712_v5 = vmax.f32 %v708_v56, 0.0  ;;  %v709_v53 = vmax.f32 %v689_v40, %v702_v29  ;;  %v711_v33 = vmax.f32 %v707_v11, 0.0  ;;  %v900_v29 = vadd.f32 %v5623_v45, %v5543_v50 }
 0x1dc   :  { %v714_v58 = vmax.f32 %v710_v47, 0.0  ;;  %v827_v0 = vmax.f32 %v5597_v2, %v4648_v63  ;;  %v820_v6 = vsel %vm262_vm1, %v4647_v4, %v4648_v63  ;;  %v4658_v17 = vunpack.i.h.bf16 %v4656_v54  ;;  %v5829_v63 = vld [vmem:[%s7680_s3 + $0x44] ss:$8 sps:$4 sm:$0xff]  }
 0x1dd   :  { %v4657_v32 = vunpack.i.l.bf16 %v4656_v54  ;;  %v4651_v44 = vpop.permute.xlu0 %4650  ;;  %v713_v13 = vmax.f32 %v709_v53, 0.0  ;;  %v757_v2 = vadd.f32 %v5591_v14, %v5543_v50  ;;  %v896_v4 = vadd.f32 %v5614_v46, %v5543_v50  ;;  %v5845_v46 = vld [vmem:[%s7680_s3 + $0x40] ss:$8 sps:$4 sm:$0xff]  }
 0x1de   :  { %1968 = vmatpush1.bf16.msra.mxu1 %v5382_v23  ;;  %2016 = vmatpush1.bf16.msra.mxu0 %v5354_v19  ;;  %v716_v18 = vpack.c.bf16 %v714_v58, %v712_v5  ;;  %v4653_v41 = vunpack.i.h.bf16 %v4651_v44  ;;  %v4652_v42 = vunpack.i.l.bf16 %v4651_v44  ;;  %v829_v19 = vmax.f32 %v5606_v26, %v4658_v17 }
 0x1df   :  { %1969 = vmatprep.subr.bf16.mxu1 %v5390_v24  ;;  %2017 = vmatprep.subr.bf16.mxu0 %v5361_v20  ;;  %v821_v62 = vsel %vm262_vm1, %v4657_v32, %v4658_v17  ;;  %v4661_v37 = vpop.permute.xlu1 %4660  ;;  %v826_v24 = vmax.f32 %v757_v2, %v820_v6  ;;  %v5813_v14 = vpack.c.bf16 %v713_v13, %v711_v33  ;;  %v5872_v33 = vld [vmem:[%s7680_s3 + $0x50] ss:$8 sps:$4 sm:$0xff]  }
 0x1e0   :  { %v840_v9 = vsel %vm283_vm2, %v4652_v42, %v4653_v41  ;;  %v847_v10 = vmax.f32 %v827_v0, %v4653_v41  ;;  %v4663_v60 = vunpack.i.h.bf16 %v4661_v37  ;;  %4346 = vmatprep.mubr.msk.bf16.mxu1 %vm1801_vm3, %v716_v18  ;;  %v4662_v20 = vunpack.i.l.bf16 %v4661_v37 }
 0x1e1   :  { %v5809_v48 = vpop.permute.xlu0 %4665  ;;  %v828_v3 = vmax.f32 %v761_v15, %v821_v62  ;;  %v846_v61 = vmax.f32 %v826_v24, %v840_v9  ;;  %v5883_v9 = vld [vmem:[%s7680_s3 + $0x84] ss:$8 sps:$4 sm:$0xff]  }
 0x1e2   :  { %1970 = vmatpush1.bf16.msra.mxu1 %v5396_v25  ;;  %2018 = vmatpush1.bf16.msra.mxu0 %v5368_v21  ;;  %v849_v16 = vmax.f32 %v829_v19, %v4663_v60  ;;  %v4668_v26 = vunpack.i.h.bf16 %v5809_v48  ;;  %v4667_v1 = vunpack.i.l.bf16 %v5809_v48  ;;  %v841_v52 = vsel %vm283_vm2, %v4662_v20, %v4663_v60 }
 0x1e3   :  { %1971 = vmatprep.subr.bf16.mxu1 %v5404_v27  ;;  %2019 = vmatprep.subr.bf16.mxu0 %v5375_v22  ;;  %v4676_v39 = vpop.permute.xlu1 %4675  ;;  %v851_v56 = vmax.f32 %v847_v10, 0.0  ;;  %v848_v25 = vmax.f32 %v828_v3, %v841_v52  ;;  %v850_v11 = vmax.f32 %v846_v61, 0.0  ;;  %v5889_v10 = vld [vmem:[%s7680_s3 + $0x64] ss:$8 sps:$4 sm:$0xff]   ;;  %v1035_v60 = vadd.f32 %v5638_v12, %v5543_v50 }
 0x1e4   :  { %v853_v49 = vmax.f32 %v849_v16, 0.0  ;;  %v959_v21 = vsel %vm262_vm1, %v4667_v1, %v4668_v26  ;;  %v4678_v35 = vunpack.i.h.bf16 %v4676_v39  ;;  %v4677_v38 = vunpack.i.l.bf16 %v4676_v39 }
 0x1e5   :  { %v4671_v55 = vpop.permute.xlu0 %4670  ;;  %v852_v27 = vmax.f32 %v848_v25, 0.0  ;;  %v965_v5 = vmax.f32 %v896_v4, %v959_v21  ;;  %v966_v24 = vmax.f32 %v5621_v57, %v4668_v26  ;;  %v1039_v1 = vadd.f32 %v5647_v51, %v5543_v50  ;;  %v5908_v57 = vld [vmem:[%s7680_s3 + $0x80] ss:$8 sps:$4 sm:$0xff]  }
 0x1e6   :  { %1972 = vmatpush1.bf16.msra.mxu1 %v5410_v28  ;;  %2020 = vmatpush1.bf16.msra.mxu0 %v5382_v23  ;;  %v855_v22 = vpack.c.bf16 %v853_v49, %v851_v56  ;;  %v4673_v40 = vunpack.i.h.bf16 %v4671_v55  ;;  %v4672_v47 = vunpack.i.l.bf16 %v4671_v55  ;;  %v960_v28 = vsel %vm262_vm1, %v4677_v38, %v4678_v35  ;;  %v5914_v51 = vld [vmem:[%s7680_s3 + $0x60] ss:$8 sps:$4 sm:$0xff]   ;;  %v5924_v38 = vld [vmem:[%s7680_s3 + $0x94] ss:$8 sps:$4 sm:$0xff]  }
 0x1e7   :  { %1973 = vmatprep.subr.bf16.mxu1 %v5420_v30  ;;  %2021 = vmatprep.subr.bf16.mxu0 %v5829_v63  ;;  %v4681_v23 = vpop.permute.xlu1 %4680  ;;  %v5848_v0 = vpack.c.bf16 %v852_v27, %v850_v11  ;;  %v967_v45 = vmax.f32 %v900_v29, %v960_v28  ;;  %v968_v41 = vmax.f32 %v5630_v7, %v4678_v35  ;;  %v5930_v55 = vld [vmem:[%s7680_s3 + $0x74] ss:$8 sps:$4 sm:$0xff]  }
 0x1e8   :  { %v979_v54 = vsel %vm283_vm2, %v4672_v47, %v4673_v40  ;;  %v4683_v30 = vunpack.i.h.bf16 %v4681_v23  ;;  %4347 = vmatprep.mubr.msk.bf16.mxu0 %vm1801_vm3, %v855_v22  ;;  %v4682_v53 = vunpack.i.l.bf16 %v4681_v23  ;;  %v986_v56 = vmax.f32 %v966_v24, %v4673_v40 }
 0x1e9   :  { %v5839_v58 = vpop.permute.xlu0 %4685  ;;  %v985_v32 = vmax.f32 %v965_v5, %v979_v54  ;;  %v1174_v47 = vadd.f32 %v5662_v34, %v5543_v50  ;;  %v5946_v5 = vld [vmem:[%s7680_s3 + $0x90] ss:$8 sps:$4 sm:$0xff]  }
 0x1ea   :  { %1974 = vmatpush1.bf16.msra.mxu1 %v5426_v31  ;;  %2022 = vmatpush1.bf16.msra.mxu0 %v5845_v46  ;;  %v4688_v6 = vunpack.i.h.bf16 %v5839_v58  ;;  %v4687_v17 = vunpack.i.l.bf16 %v5839_v58  ;;  %v5856_v31 = vld [vmem:[%s7680_s3 + $0x54] ss:$8 sps:$4 sm:$0xff]   ;;  %v980_v44 = vsel %vm283_vm2, %v4682_v53, %v4683_v30  ;;  %v988_v61 = vmax.f32 %v968_v41, %v4683_v30 }
 0x1eb   :  { %1975 = vmatprep.subr.bf16.mxu1 %v5444_v36  ;;  %2023 = vmatprep.subr.bf16.mxu0 %v5856_v31  ;;  %v4696_v13 = vpop.permute.xlu1 %4695  ;;  %v987_v18 = vmax.f32 %v967_v45, %v980_v44  ;;  %v5866_v36 = vld [vmem:[%s7680_s3 + $0x70] ss:$8 sps:$4 sm:$0xff]   ;;  %v989_v20 = vmax.f32 %v985_v32, 0.0  ;;  %v990_v28 = vmax.f32 %v986_v56, 0.0  ;;  %v1178_v32 = vadd.f32 %v5671_v59, %v5543_v50 }
 0x1ec   :  { %v4698_v42 = vunpack.i.h.bf16 %v4696_v13  ;;  %v4697_v2 = vunpack.i.l.bf16 %v4696_v13  ;;  %v1098_v7 = vsel %vm262_vm1, %v4687_v17, %v4688_v6  ;;  %v992_v4 = vmax.f32 %v988_v61, 0.0  ;;  %v5959_v17 = vld [vmem:[%s7680_s3 + $0x4] ss:$8 sps:$4 sm:$0xff]  }
 0x1ed   :  { %v5861_v15 = vpop.permute.xlu0 %4690  ;;  %v991_v62 = vmax.f32 %v987_v18, 0.0  ;;  %v1104_v25 = vmax.f32 %v1035_v60, %v1098_v7  ;;  %v1105_v44 = vmax.f32 %v5645_v43, %v4688_v6 }
 0x1ee   :  { %1976 = vmatpush1.bf16.msra.mxu1 %v5866_v36  ;;  %2024 = vmatpush1.bf16.msra.mxu0 %v5872_v33  ;;  %v4693_v37 = vunpack.i.h.bf16 %v5861_v15  ;;  %v4692_v19 = vunpack.i.l.bf16 %v5861_v15  ;;  %v1099_v3 = vsel %vm262_vm1, %v4697_v2, %v4698_v42  ;;  %v1107_v23 = vmax.f32 %v5654_v8, %v4698_v42 }
 0x1ef   :  { %1977 = vmatprep.subr.bf16.mxu1 %v5883_v9  ;;  %2025 = vmatprep.subr.bf16.mxu0 %v5889_v10  ;;  %v5917_v48 = vpack.c.bf16 %v991_v62, %v989_v20  ;;  %v1106_v26 = vmax.f32 %v1039_v1, %v1099_v3  ;;  %v994_v42 = vpack.c.bf16 %v992_v4, %v990_v28  ;;  %v7729_v4 = vld [vmem:[#allocation6_spill] sm:$0xff] }
 0x1f0   :  { %v4701_v16 = vpop.permute.xlu1 %4700  ;;  %v1118_v52 = vsel %vm283_vm2, %v4692_v19, %v4693_v37  ;;  %v1125_v43 = vmax.f32 %v1105_v44, %v4693_v37  ;;  %v5986_v19 = vld [vmem:[%s7680_s3] ss:$8 sps:$4 sm:$0xff]  }
 0x1f1   :  { %v4703_v39 = vunpack.i.h.bf16 %v4701_v16  ;;  %v4702_v12 = vunpack.i.l.bf16 %v4701_v16  ;;  %v5903_v49 = vpop.permute.xlu0 %4705  ;;  %v1124_v27 = vmax.f32 %v1104_v25, %v1118_v52  ;;  %v6003_v16 = vld [vmem:[%s7680_s3 + $0x14] ss:$8 sps:$4 sm:$0xff]  }
 0x1f2   :  { %1978 = vmatpush1.bf16.msra.mxu1 %v5908_v57  ;;  %2026 = vmatpush1.bf16.msra.mxu0 %v5914_v51  ;;  %v4708_v21 = vunpack.i.h.bf16 %v5903_v49  ;;  %v4707_v35 = vunpack.i.l.bf16 %v5903_v49  ;;  %v1129_v52 = vmax.f32 %v1125_v43, 0.0 }
 0x1f3   :  { %1979 = vmatprep.subr.bf16.mxu1 %v5924_v38  ;;  %2027 = vmatprep.subr.bf16.mxu0 %v5930_v55  ;;  %v1119_v22 = vsel %vm283_vm2, %v4702_v12, %v4703_v39  ;;  %v1128_v13 = vmax.f32 %v1124_v27, 0.0  ;;  %v1127_v2 = vmax.f32 %v1107_v23, %v4703_v39  ;;  %v6014_v12 = vld [vmem:[%s7680_s3 + $0x10] ss:$8 sps:$4 sm:$0xff]  }
 0x1f4   :  { %v5934_v40 = vpop.permute.xlu1 %4715  ;;  %v1126_v11 = vmax.f32 %v1106_v26, %v1119_v22  ;;  %v1237_v8 = vsel %vm262_vm1, %v4707_v35, %v4708_v21 }
 0x1f5   :  { %v4718_v29 = vunpack.i.h.bf16 %v5934_v40  ;;  %v4717_v54 = vunpack.i.l.bf16 %v5934_v40  ;;  %v5941_v30 = vpop.permute.xlu0 %4710  ;;  %v1243_v59 = vmax.f32 %v1174_v47, %v1237_v8  ;;  %v1131_v1 = vmax.f32 %v1127_v2, 0.0  ;;  %v6025_v47 = vld [vmem:[%s7680_s3 + $0x24] ss:$8 sps:$4 sm:$0xff]   ;;  %v6049_v2 = vld [vmem:[%s7680_s3 + $0x20] ss:$8 sps:$4 sm:$0xff]  }
 0x1f6   :  { %1980 = vmatpush1.bf16.msra.mxu1 %v5946_v5  ;;  %2028 = vmatpush1.bf16.msra.mxu0 %v5866_v36  ;;  %v1130_v34 = vmax.f32 %v1126_v11, 0.0  ;;  %v4713_v53 = vunpack.i.h.bf16 %v5941_v30  ;;  %v4712_v45 = vunpack.i.l.bf16 %v5941_v30  ;;  %v1313_v11 = vadd.f32 %v7729_v4, %v5543_v50 }
 0x1f7   :  { %2029 = vmatprep.subr.bf16.mxu0 %v5883_v9  ;;  %2065 = vmatprep.subr.bf16.mxu1 %v5959_v17  ;;  %v1238_v18 = vsel %vm262_vm1, %v4717_v54, %v4718_v29 }
 0x1f8   :  { %v5970_v41 = vpop.permute.xlu1 %4720  ;;  %v1257_v62 = vsel %vm283_vm2, %v4712_v45, %v4713_v53  ;;  %v5989_v60 = vpack.c.bf16 %v1130_v34, %v1128_v13  ;;  %v7730_v34 = vld [vmem:[#allocation8_spill] sm:$0xff]  ;;  %v1133_v45 = vpack.c.bf16 %v1131_v1, %v1129_v52 }
 0x1f9   :  { %v4723_v7 = vunpack.i.h.bf16 %v5970_v41  ;;  %1994 = vmatmul.mubr.bf16.vlgmr.msra.gmra.mrb[48].mxu1 %v5813_v14  ;;  %v4722_v58 = vunpack.i.l.bf16 %v5970_v41  ;;  %v5980_v6 = vpop.permute.xlu0 %4725  ;;  %v1245_v14 = vmax.f32 %v1178_v32, %v1238_v18  ;;  %v1263_v24 = vmax.f32 %v1243_v59, %v1257_v62 }
 0x1fa   :  { %2030 = vmatpush1.bf16.msra.mxu0 %v5908_v57  ;;  %2066 = vmatpush1.bf16.msra.mxu1 %v5986_v19  ;;  %v4728_v15 = vunpack.i.h.bf16 %v5980_v6  ;;  %v4727_v37 = vunpack.i.l.bf16 %v5980_v6  ;;  %v1317_v8 = vadd.f32 %v7730_v34, %v5543_v50 }
 0x1fb   :  { %4348 = vmatprep.mubr.msk.bf16.mxu1 %vm1801_vm3, %v994_v42  ;;  %2031 = vmatprep.subr.bf16.mxu0 %v5924_v38  ;;  %v1258_v20 = vsel %vm283_vm2, %v4722_v58, %v4723_v7  ;;  %v1267_v28 = vmax.f32 %v1263_v24, 0.0  ;;  %v6061_v58 = vld [vmem:[%s7680_s3 + $0x34] ss:$8 sps:$4 sm:$0xff]  }
 0x1fc   :  { %v5998_v3 = vpop.permute.xlu1 %4735  ;;  %2067 = vmatprep.subr.bf16.mxu1 %v6003_v16  ;;  %v1265_v61 = vmax.f32 %v1245_v14, %v1258_v20  ;;  %v1376_v35 = vsel %vm262_vm1, %v4727_v37, %v4728_v15 }
 0x1fd   :  { %v4738_v39 = vunpack.i.h.bf16 %v5998_v3  ;;  %v4737_v56 = vunpack.i.l.bf16 %v5998_v3  ;;  %v6008_v25 = vpop.permute.xlu0 %4730  ;;  %v1382_v13 = vmax.f32 %v1313_v11, %v1376_v35  ;;  %v7731_v11 = vld [vmem:[#allocation10_spill] sm:$0xff] }
 0x1fe   :  { %2032 = vmatpush1.bf16.msra.mxu0 %v5946_v5  ;;  %2068 = vmatpush1.bf16.msra.mxu1 %v6014_v12  ;;  %v1269_v26 = vmax.f32 %v1265_v61, 0.0  ;;  %v7711_v27 = vunpack.i.h.bf16 %v6008_v25  ;;  %v4732_v22 = vunpack.i.l.bf16 %v6008_v25  ;;  %v7739_v3 = vunpack.i.h.bf16 %v6008_v25  ;;  %v7740_v25 = vld [vmem:[#allocation3_spill] sm:$0xff] }
 0x1ff   :  { %2069 = vmatprep.subr.bf16.mxu1 %v6025_v47  ;;  %2117 = vmatprep.subr.bf16.mxu0 %v5959_v17  ;;  %v1377_v23 = vsel %vm262_vm1, %v4737_v56, %v4738_v39  ;;  %v6077_v56 = vld [vmem:[%s7680_s3 + $0x30] ss:$8 sps:$4 sm:$0xff]  }
 0x200   :  { %v6034_v54 = vpop.permute.xlu1 %4740  ;;  %v1396_v32 = vsel %vm283_vm2, %v4732_v22, %v7711_v27  ;;  %v6053_v62 = vpack.c.bf16 %v1269_v26, %v1267_v28  ;;  %v1384_v43 = vmax.f32 %v1317_v8, %v1377_v23  ;;  %v1452_v28 = vadd.f32 %v7731_v11, %v5543_v50 }
 0x201   :  { %v4743_v44 = vunpack.i.h.bf16 %v6034_v54  ;;  %2046 = vmatmul.mubr.bf16.vlgmr.msra.gmra.mrb[52].mxu0 %v5848_v0  ;;  %v4742_v18 = vunpack.i.l.bf16 %v6034_v54  ;;  %v6044_v42 = vpop.permute.xlu0 %4745  ;;  %v1402_v14 = vmax.f32 %v1382_v13, %v1396_v32 }
 0x202   :  { %2070 = vmatpush1.bf16.msra.mxu1 %v6049_v2  ;;  %2118 = vmatpush1.bf16.msra.mxu0 %v5986_v19  ;;  %v7709_v59 = vunpack.i.h.bf16 %v6044_v42  ;;  %v4747_v0 = vunpack.i.l.bf16 %v6044_v42 }
 0x203   :  { %4349 = vmatprep.mubr.msk.bf16.mxu0 %vm1801_vm3, %v1133_v45  ;;  %2071 = vmatprep.subr.bf16.mxu1 %v6061_v58  ;;  %v1397_v37 = vsel %vm283_vm2, %v4742_v18, %v4743_v44  ;;  %v1406_v23 = vmax.f32 %v1402_v14, 0.0  ;;  %v7732_v45 = vld [vmem:[#allocation12_spill] sm:$0xff] }
 0x204   :  { %v6067_v24 = vpop.permute.xlu1 %4755  ;;  %2119 = vmatprep.subr.bf16.mxu0 %v6003_v16  ;;  %v1404_v20 = vmax.f32 %v1384_v43, %v1397_v37  ;;  %v1515_v35 = vsel %vm262_vm1, %v4747_v0, %v7709_v59  ;;  %v1456_v32 = vadd.f32 %v7732_v45, %v5543_v50 }
 0x205   :  { %v7710_v1 = vunpack.i.h.bf16 %v6067_v24  ;;  %v4757_v61 = vunpack.i.l.bf16 %v6067_v24  ;;  %v6072_v52 = vpop.permute.xlu0 %4750  ;;  %v1521_v43 = vmax.f32 %v1452_v28, %v1515_v35 }
 0x206   :  { %2072 = vmatpush1.bf16.msra.mxu1 %v6077_v56  ;;  %2120 = vmatpush1.bf16.msra.mxu0 %v6014_v12  ;;  %v1408_v26 = vmax.f32 %v1404_v20, 0.0  ;;  %v7707_v22 = vunpack.i.h.bf16 %v6072_v52  ;;  %v4752_v4 = vunpack.i.l.bf16 %v6072_v52 }
 0x207   :  { %2073 = vmatprep.subr.bf16.mxu1 %v5829_v63  ;;  %2121 = vmatprep.subr.bf16.mxu0 %v6025_v47  ;;  %v1516_v34 = vsel %vm262_vm1, %v4757_v61, %v7710_v1 }
 0x208   :  { %v6093_v8 = vpop.permute.xlu1 %4760  ;;  %v1535_v13 = vsel %vm283_vm2, %v4752_v4, %v7707_v22  ;;  %v6106_v14 = vpack.c.bf16 %v1408_v26, %v1406_v23  ;;  %v1523_v20 = vmax.f32 %v1456_v32, %v1516_v34 }
 0x209   :  { %v7708_v18 = vunpack.i.h.bf16 %v6093_v8  ;;  %v4762_v0 = vunpack.i.l.bf16 %v6093_v8  ;;  %v6102_v37 = vpop.permute.xlu0 %4765  ;;  %v1541_v35 = vmax.f32 %v1521_v43, %v1535_v13  ;;  %v7733_v13 = vld [vmem:[#allocation14_spill] sm:$0xff] }
 0x20a   :  { %2074 = vmatpush1.bf16.msra.mxu1 %v5845_v46  ;;  %2122 = vmatpush1.bf16.msra.mxu0 %v6049_v2  ;;  %v7706_v61 = vunpack.i.h.bf16 %v6102_v37  ;;  %v4767_v11 = vunpack.i.l.bf16 %v6102_v37  ;;  %v1591_v43 = vadd.f32 %v7733_v13, %v5543_v50 }
 0x20b   :  { %2075 = vmatprep.subr.bf16.mxu1 %v5856_v31  ;;  %2123 = vmatprep.subr.bf16.mxu0 %v6061_v58  ;;  %v1536_v4 = vsel %vm283_vm2, %v4762_v0, %v7708_v18  ;;  %v7734_v18 = vld [vmem:[#allocation16_spill] sm:$0xff] }
 0x20c   :  { %v6115_v28 = vpop.permute.xlu1 %4775  ;;  %v1543_v45 = vmax.f32 %v1523_v20, %v1536_v4  ;;  %v1654_v26 = vsel %vm262_vm1, %v4767_v11, %v7706_v61  ;;  %v1545_v11 = vmax.f32 %v1541_v35, 0.0  ;;  %v1595_v59 = vadd.f32 %v7734_v18, %v5543_v50 }
 0x20d   :  { %v7712_v23 = vunpack.i.h.bf16 %v6115_v28  ;;  %v4777_v34 = vunpack.i.l.bf16 %v6115_v28  ;;  %v6122_v32 = vpop.permute.xlu0 %4770  ;;  %v1660_v13 = vmax.f32 %v1591_v43, %v1654_v26  ;;  %v7735_v26 = vld [vmem:[#allocation5_spill] sm:$0xff] }
 0x20e   :  { %2076 = vmatpush1.bf16.msra.mxu1 %v5872_v33  ;;  %2124 = vmatpush1.bf16.msra.mxu0 %v6077_v56  ;;  %v1547_v0 = vmax.f32 %v1543_v45, 0.0  ;;  %v4773_v20 = vunpack.i.h.bf16 %v6122_v32  ;;  %v4772_v4 = vunpack.i.l.bf16 %v6122_v32  ;;  %v1246_v43 = vmax.f32 %v7735_v26, %v4718_v29  ;;  %v6468_v32 = vld [vmem:[%s7682_s5 + $0xb4] ss:$8 sps:$4 sm:$0xff]  }
 0x20f   :  { %2077 = vmatprep.subr.bf16.mxu1 %v5889_v10  ;;  %2125 = vmatprep.subr.bf16.mxu0 %v5829_v63  ;;  %v1655_v61 = vsel %vm262_vm1, %v4777_v34, %v7712_v23 }
 0x210   :  { %v6135_v22 = vpop.permute.xlu1 %4780  ;;  %v1674_v45 = vsel %vm283_vm2, %v4772_v4, %v4773_v20  ;;  %v6146_v35 = vpack.c.bf16 %v1547_v0, %v1545_v11  ;;  %v1662_v34 = vmax.f32 %v1595_v59, %v1655_v61  ;;  %v7736_v61 = vld [vmem:[#allocation4_spill] sm:$0xff] }
 0x211   :  { %v4783_v1 = vunpack.i.h.bf16 %v6135_v22  ;;  %v4782_v27 = vunpack.i.l.bf16 %v6135_v22  ;;  %v1680_v23 = vmax.f32 %v1660_v13, %v1674_v45  ;;  %v1244_v4 = vmax.f32 %v7736_v61, %v4708_v21  ;;  %v7737_v21 = vld [vmem:[#allocation9_spill] sm:$0xff]  ;;  %v6454_v22 = vld [vmem:[%s7682_s5 + $0xa4] ss:$8 sps:$4 sm:$0xff]  }
 0x212   :  { %2078 = vmatpush1.bf16.msra.mxu1 %v5914_v51  ;;  %2126 = vmatpush1.bf16.msra.mxu0 %v5845_v46  ;;  %v1385_v41 = vmax.f32 %v7737_v21, %v4738_v39  ;;  %v7743_v21 = vld [vmem:[#allocation13_spill] sm:$0xff] }
 0x213   :  { %2079 = vmatprep.subr.bf16.mxu1 %v5930_v55  ;;  %2127 = vmatprep.subr.bf16.mxu0 %v5856_v31  ;;  %v1675_v50 = vsel %vm283_vm2, %v4782_v27, %v4783_v1  ;;  %v1684_v0 = vmax.f32 %v1680_v23, 0.0  ;;  %v1266_v27 = vmax.f32 %v1246_v43, %v4723_v7  ;;  %v1264_v40 = vmax.f32 %v1244_v4, %v4713_v53  ;;  %v7738_v53 = vld [vmem:[#allocation7_spill] sm:$0xff] }
 0x214   :  { %v1682_v18 = vmax.f32 %v1662_v34, %v1675_v50  ;;  %v1383_v7 = vmax.f32 %v7738_v53, %v4728_v15  ;;  %v1405_v23 = vmax.f32 %v1385_v41, %v4743_v44  ;;  %v7741_v44 = vld [vmem:[#allocation2_spill] sm:$0xff]  ;;  %v7744_v53 = vunpack.i.h.bf16 %v6044_v42 }
 0x215   :  { %v1270_v29 = vmax.f32 %v1266_v27, 0.0  ;;  %v1268_v49 = vmax.f32 %v1264_v40, 0.0 }
 0x216   :  { %2080 = vmatpush1.bf16.msra.mxu1 %v5866_v36  ;;  %2128 = vmatpush1.bf16.msra.mxu0 %v5872_v33  ;;  %v1686_v59 = vmax.f32 %v1682_v18, 0.0  ;;  %v1403_v39 = vmax.f32 %v1383_v7, %v7739_v3  ;;  %v1409_v6 = vmax.f32 %v1405_v23, 0.0  ;;  %v7745_v7 = vld [vmem:[#allocation11_spill] sm:$0xff]  ;;  %v7746_v3 = vunpack.i.h.bf16 %v6093_v8 }
 0x217   :  { %2081 = vmatprep.subr.bf16.mxu1 %v5883_v9  ;;  %2129 = vmatprep.subr.bf16.mxu0 %v5889_v10  ;;  %v1272_v30 = vpack.c.bf16 %v1270_v29, %v1268_v49  ;;  %v7742_v49 = vunpack.i.h.bf16 %v6067_v24  ;;  %v1522_v23 = vmax.f32 %v7745_v7, %v7744_v53  ;;  %v7747_v24 = vunpack.i.h.bf16 %v6072_v52 }
 0x218   :  { %v6165_v11 = vpack.c.bf16 %v1686_v59, %v1684_v0  ;;  %v1407_v15 = vmax.f32 %v1403_v39, 0.0  ;;  %v7748_v8 = vunpack.i.h.bf16 %v6115_v28 }
 0x219   :  { %v1524_v41 = vmax.f32 %v7743_v21, %v7742_v49  ;;  %v6519_v49 = vld [vmem:[%s7682_s5 + $0xe0] ss:$8 sps:$4 sm:$0xff]  }
 0x21a   :  { %2082 = vmatpush1.bf16.msra.mxu1 %v5908_v57  ;;  %2130 = vmatpush1.bf16.msra.mxu0 %v5914_v51 }
 0x21b   :  { %2083 = vmatprep.subr.bf16.mxu1 %v5924_v38  ;;  %2131 = vmatprep.subr.bf16.mxu0 %v5930_v55  ;;  %v1544_v39 = vmax.f32 %v1524_v41, %v7746_v3 }
 0x21e   :  { %2084 = vmatpush1.bf16.msra.mxu1 %v5946_v5  ;;  %2132 = vmatpush1.bf16.msra.mxu0 %v5866_v36 }
 0x21f   :  { %2133 = vmatprep.subr.bf16.mxu0 %v5883_v9  ;;  %2169 = vmatprep.subr.bf16.mxu1 %v5959_v17 }
 0x221   :  { %2098 = vmatmul.mubr.bf16.vlgmr.msra.gmra.mrb[52].mxu1 %v5917_v48  ;;  %v1411_v48 = vpack.c.bf16 %v1409_v6, %v1407_v15  ;;  %v1542_v6 = vmax.f32 %v1522_v23, %v7747_v24  ;;  %v1548_v15 = vmax.f32 %v1544_v39, 0.0  ;;  %v6535_v24 = vld [vmem:[%s7682_s5 + $0xf0] ss:$8 sps:$4 sm:$0xff]  }
 0x222   :  { %2134 = vmatpush1.bf16.msra.mxu0 %v5908_v57  ;;  %2170 = vmatpush1.bf16.msra.mxu1 %v5986_v19 }
 0x223   :  { %4350 = vmatprep.mubr.msk.bf16.mxu1 %vm1801_vm3, %v1272_v30  ;;  %2135 = vmatprep.subr.bf16.mxu0 %v5924_v38  ;;  %v1546_v42 = vmax.f32 %v1542_v6, 0.0 }
 0x224   :  { %2171 = vmatprep.subr.bf16.mxu1 %v6003_v16 }
 0x225   :  { %v1550_v52 = vpack.c.bf16 %v1548_v15, %v1546_v42 }
 0x226   :  { %2136 = vmatpush1.bf16.msra.mxu0 %v5946_v5  ;;  %2172 = vmatpush1.bf16.msra.mxu1 %v6014_v12 }
 0x227   :  { %2173 = vmatprep.subr.bf16.mxu1 %v6025_v47  ;;  %2221 = vmatprep.subr.bf16.mxu0 %v5959_v17 }
 0x229   :  { %2150 = vmatmul.mubr.bf16.vlgmr.msra.gmra.mrb[56].mxu0 %v5989_v60  ;;  %v78_v60 = vld [vmem:[%s7683_s4] sm:$0x3] }
 0x22a   :  { %2174 = vmatpush1.bf16.msra.mxu1 %v6049_v2  ;;  %2222 = vmatpush1.bf16.msra.mxu0 %v5986_v19  ;;  %v6215_v54 = vrot.slane %v78_v60, %v7740_v25  ;;  %v6218_v13 = vrot.slane %v78_v60, %v7741_v44 }
 0x22b   :  { %4351 = vmatprep.mubr.msk.bf16.mxu0 %vm1801_vm3, %v1411_v48  ;;  %2175 = vmatprep.subr.bf16.mxu1 %v6061_v58  ;;  %v7749_v48 = vld [vmem:[#allocation17_spill] sm:$0xff] }
 0x22c   :  { %2223 = vmatprep.subr.bf16.mxu0 %v6003_v16  ;;  %v1663_v60 = vmax.f32 %v7749_v48, %v7748_v8 }
 0x22e   :  { %2176 = vmatpush1.bf16.msra.mxu1 %v6077_v56  ;;  %2224 = vmatpush1.bf16.msra.mxu0 %v6014_v12 }
 0x22f   :  { %2177 = vmatprep.subr.bf16.mxu1 %v5829_v63  ;;  %2225 = vmatprep.subr.bf16.mxu0 %v6025_v47 }
 0x232   :  { %2178 = vmatpush1.bf16.msra.mxu1 %v5845_v46  ;;  %2226 = vmatpush1.bf16.msra.mxu0 %v6049_v2 }
 0x233   :  { %2179 = vmatprep.subr.bf16.mxu1 %v5856_v31  ;;  %2227 = vmatprep.subr.bf16.mxu0 %v6061_v58 }
 0x236   :  { %2180 = vmatpush1.bf16.msra.mxu1 %v5872_v33  ;;  %2228 = vmatpush1.bf16.msra.mxu0 %v6077_v56  ;;  %v1839_v45 = vpop.f32.mrb[44].mxu0 }
 0x237   :  { %2181 = vmatprep.subr.bf16.mxu1 %v5889_v10  ;;  %2229 = vmatprep.subr.bf16.mxu0 %v5829_v63  ;;  %v1840_v34 = vadd.f32 %v1839_v45, %v6215_v54  ;;  %v1841_v50 = vpop.f32.mrb[45].mxu0  ;;  %v7750_v45 = vunpack.i.h.bf16 %v6102_v37 }
 0x238   :  { %v1842_v18 = vadd.f32 %v1841_v50, %v6218_v13  ;;  %v1843_v26 = vpop.f32.mrb[46].mxu0 }
 0x239   :  { %v1844_v43 = vadd.f32 %v1843_v26, %v6215_v54  ;;  %v1845_v0 = vpop.f32.mrb[47].mxu0  ;;  %v1848_v61 = vmax.f32 %v1840_v34, 0.0  ;;  %v7751_v34 = vld [vmem:[#allocation15_spill] sm:$0xff]  ;;  %v6496_v26 = vld [vmem:[%s7682_s5 + $0xd4] ss:$8 sps:$4 sm:$0xff]  }
 0x23a   :  { %2182 = vmatpush1.bf16.msra.mxu1 %v5914_v51  ;;  %2230 = vmatpush1.bf16.msra.mxu0 %v5845_v46  ;;  %v1846_v59 = vadd.f32 %v1845_v0, %v6218_v13  ;;  %v1849_v27 = vmax.f32 %v1842_v18, 0.0  ;;  %v1661_v50 = vmax.f32 %v7751_v34, %v7750_v45  ;;  %v1683_v18 = vmax.f32 %v1663_v60, %v4783_v1  ;;  %v6510_v0 = vld [vmem:[%s7682_s5 + $0xe4] ss:$8 sps:$4 sm:$0xff]  }
 0x23b   :  { %2183 = vmatprep.subr.bf16.mxu1 %v5930_v55  ;;  %2231 = vmatprep.subr.bf16.mxu0 %v5856_v31  ;;  %v1850_v4 = vmax.f32 %v1844_v43, 0.0  ;;  %v6503_v43 = vld [vmem:[%s7682_s5 + $0xd0] ss:$8 sps:$4 sm:$0xff]  }
 0x23c   :  { %v1851_v40 = vmax.f32 %v1846_v59, 0.0  ;;  %v1681_v28 = vmax.f32 %v1661_v50, %v4773_v20  ;;  %v1687_v37 = vmax.f32 %v1683_v18, 0.0  ;;  %v6475_v20 = vld [vmem:[%s7682_s5 + $0xb0] ss:$8 sps:$4 sm:$0xff]  }
 0x23d   :  { %v6232_v29 = vpack.c.bf16 %v1850_v4, %v1848_v61 }
 0x23e   :  { %2184 = vmatpush1.bf16.msra.mxu1 %v5866_v36  ;;  %2232 = vmatpush1.bf16.msra.mxu0 %v5872_v33  ;;  %v6239_v30 = vpack.c.bf16 %v1851_v40, %v1849_v27  ;;  %v1685_v1 = vmax.f32 %v1681_v28, 0.0 }
 0x23f   :  { %2185 = vmatprep.subr.bf16.mxu1 %v5883_v9  ;;  %2233 = vmatprep.subr.bf16.mxu0 %v5889_v10 }
 0x242   :  { %2186 = vmatpush1.bf16.msra.mxu1 %v5908_v57  ;;  %2234 = vmatpush1.bf16.msra.mxu0 %v5914_v51 }
 0x243   :  { %2187 = vmatprep.subr.bf16.mxu1 %v5924_v38  ;;  %2235 = vmatprep.subr.bf16.mxu0 %v5930_v55 }
 0x246   :  { %2188 = vmatpush1.bf16.msra.mxu1 %v5946_v5  ;;  %2236 = vmatpush1.bf16.msra.mxu0 %v5866_v36 }
 0x247   :  { %2237 = vmatprep.subr.bf16.mxu0 %v5883_v9  ;;  %2273 = vmatprep.subr.bf16.mxu1 %v5959_v17 }
 0x249   :  { %2202 = vmatmul.mubr.bf16.vlgmr.msra.gmra.mrb[56].mxu1 %v6053_v62  ;;  %v1689_v62 = vpack.c.bf16 %v1687_v37, %v1685_v1 }
 0x24a   :  { %2238 = vmatpush1.bf16.msra.mxu0 %v5908_v57  ;;  %2274 = vmatpush1.bf16.msra.mxu1 %v5986_v19 }
 0x24b   :  { %4352 = vmatprep.mubr.msk.bf16.mxu1 %vm1801_vm3, %v1550_v52  ;;  %2239 = vmatprep.subr.bf16.mxu0 %v5924_v38 }
 0x24c   :  { %2275 = vmatprep.subr.bf16.mxu1 %v6003_v16 }
 0x24e   :  { %2240 = vmatpush1.bf16.msra.mxu0 %v5946_v5  ;;  %2276 = vmatpush1.bf16.msra.mxu1 %v6014_v12 }
 0x24f   :  { %2277 = vmatprep.subr.bf16.mxu1 %v6025_v47  ;;  %2325 = vmatprep.subr.bf16.mxu0 %v5959_v17  ;;  %v6398_v17 = vld [vmem:[%s7682_s5 + $0x64] ss:$8 sps:$4 sm:$0xff]  }
 0x251   :  { %2254 = vmatmul.mubr.bf16.vlgmr.msra.gmra.mrb[60].mxu0 %v6106_v14  ;;  %v6461_v14 = vld [vmem:[%s7682_s5 + $0xa0] ss:$8 sps:$4 sm:$0xff]  }
 0x252   :  { %2278 = vmatpush1.bf16.msra.mxu1 %v6049_v2  ;;  %2326 = vmatpush1.bf16.msra.mxu0 %v5986_v19  ;;  %v6405_v19 = vld [vmem:[%s7682_s5 + $0x60] ss:$8 sps:$4 sm:$0xff]  }
 0x253   :  { %4353 = vmatprep.mubr.msk.bf16.mxu0 %vm1801_vm3, %v1689_v62  ;;  %2279 = vmatprep.subr.bf16.mxu1 %v6061_v58 }
 0x254   :  { %2327 = vmatprep.subr.bf16.mxu0 %v6003_v16  ;;  %v6412_v16 = vld [vmem:[%s7682_s5 + $0x74] ss:$8 sps:$4 sm:$0xff]  }
 0x256   :  { %2280 = vmatpush1.bf16.msra.mxu1 %v6077_v56  ;;  %2328 = vmatpush1.bf16.msra.mxu0 %v6014_v12  ;;  %v6419_v12 = vld [vmem:[%s7682_s5 + $0x70] ss:$8 sps:$4 sm:$0xff]  }
 0x257   :  { %2281 = vmatprep.subr.bf16.mxu1 %v5829_v63  ;;  %2329 = vmatprep.subr.bf16.mxu0 %v6025_v47  ;;  %v6426_v47 = vld [vmem:[%s7682_s5 + $0x84] ss:$8 sps:$4 sm:$0xff]  }
 0x25a   :  { %2282 = vmatpush1.bf16.msra.mxu1 %v5845_v46  ;;  %2330 = vmatpush1.bf16.msra.mxu0 %v6049_v2  ;;  %v6433_v2 = vld [vmem:[%s7682_s5 + $0x80] ss:$8 sps:$4 sm:$0xff]  }
 0x25b   :  { %2283 = vmatprep.subr.bf16.mxu1 %v5856_v31  ;;  %2331 = vmatprep.subr.bf16.mxu0 %v6061_v58  ;;  %v6440_v58 = vld [vmem:[%s7682_s5 + $0x94] ss:$8 sps:$4 sm:$0xff]  }
 0x25e   :  { %2284 = vmatpush1.bf16.msra.mxu1 %v5872_v33  ;;  %2332 = vmatpush1.bf16.msra.mxu0 %v6077_v56  ;;  %v6447_v56 = vld [vmem:[%s7682_s5 + $0x90] ss:$8 sps:$4 sm:$0xff]  }
 0x25f   :  { %2285 = vmatprep.subr.bf16.mxu1 %v5889_v10  ;;  %2333 = vmatprep.subr.bf16.mxu0 %v5829_v63  ;;  %v6311_v63 = vld [vmem:[%s7682_s5 + $0x4] ss:$8 sps:$4 sm:$0xff]  }
 0x262   :  { %2286 = vmatpush1.bf16.msra.mxu1 %v5914_v51  ;;  %2334 = vmatpush1.bf16.msra.mxu0 %v5845_v46  ;;  %v6318_v46 = vld [vmem:[%s7682_s5] ss:$8 sps:$4 sm:$0xff]  }
 0x263   :  { %2287 = vmatprep.subr.bf16.mxu1 %v5930_v55  ;;  %2335 = vmatprep.subr.bf16.mxu0 %v5856_v31  ;;  %v6325_v31 = vld [vmem:[%s7682_s5 + $0x14] ss:$8 sps:$4 sm:$0xff]  }
 0x266   :  { %2288 = vmatpush1.bf16.msra.mxu1 %v5866_v36  ;;  %2336 = vmatpush1.bf16.msra.mxu0 %v5872_v33  ;;  %v6340_v33 = vld [vmem:[%s7682_s5 + $0x24] ss:$8 sps:$4 sm:$0xff]  }
 0x267   :  { %2289 = vmatprep.subr.bf16.mxu1 %v5883_v9  ;;  %2337 = vmatprep.subr.bf16.mxu0 %v5889_v10  ;;  %v6355_v10 = vld [vmem:[%s7682_s5 + $0x34] ss:$8 sps:$4 sm:$0xff]  }
 0x26a   :  { %2290 = vmatpush1.bf16.msra.mxu1 %v5908_v57  ;;  %2338 = vmatpush1.bf16.msra.mxu0 %v5914_v51  ;;  %v6370_v51 = vld [vmem:[%s7682_s5 + $0x44] ss:$8 sps:$4 sm:$0xff]  }
 0x26b   :  { %2291 = vmatprep.subr.bf16.mxu1 %v5924_v38  ;;  %2339 = vmatprep.subr.bf16.mxu0 %v5930_v55  ;;  %v6384_v55 = vld [vmem:[%s7682_s5 + $0x54] ss:$8 sps:$4 sm:$0xff]  }
 0x26e   :  { %2292 = vmatpush1.bf16.msra.mxu1 %v5946_v5  ;;  %2340 = vmatpush1.bf16.msra.mxu0 %v5866_v36  ;;  %v6333_v36 = vld [vmem:[%s7682_s5 + $0x10] ss:$8 sps:$4 sm:$0xff]  }
 0x26f   :  { %2341 = vmatprep.subr.bf16.mxu0 %v5883_v9  ;;  %2545 = vmatprep.subr.bf16.mxu1 %v6311_v63  ;;  %v6348_v9 = vld [vmem:[%s7682_s5 + $0x20] ss:$8 sps:$4 sm:$0xff]  }
 0x271   :  { %2306 = vmatmul.mubr.bf16.vlgmr.msra.gmra.mrb[60].mxu1 %v6146_v35  ;;  %v6482_v35 = vld [vmem:[%s7682_s5 + $0xc4] ss:$8 sps:$4 sm:$0xff]  }
 0x272   :  { %2342 = vmatpush1.bf16.msra.mxu0 %v5908_v57  ;;  %2546 = vmatpush1.bf16.msra.mxu1 %v6318_v46  ;;  %v6363_v57 = vld [vmem:[%s7682_s5 + $0x30] ss:$8 sps:$4 sm:$0xff]  }
 0x273   :  { %2577 = vmatprep.mubr.bf16.mxu1 %v6239_v30  ;;  %2343 = vmatprep.subr.bf16.mxu0 %v5924_v38  ;;  %v6377_v38 = vld [vmem:[%s7682_s5 + $0x40] ss:$8 sps:$4 sm:$0xff]   ;;  %v6527_v30 = vld [vmem:[%s7682_s5 + $0xf4] ss:$8 sps:$4 sm:$0xff]  }
 0x274   :  { %2547 = vmatprep.subr.bf16.mxu1 %v6325_v31 }
 0x276   :  { %2344 = vmatpush1.bf16.msra.mxu0 %v5946_v5  ;;  %2548 = vmatpush1.bf16.msra.mxu1 %v6333_v36  ;;  %v6391_v5 = vld [vmem:[%s7682_s5 + $0x50] ss:$8 sps:$4 sm:$0xff]  }
 0x277   :  { %2549 = vmatprep.subr.bf16.mxu1 %v6340_v33  ;;  %2635 = vmatprep.subr.bf16.mxu0 %v6311_v63 }
 0x279   :  { %2358 = vmatmul.mubr.bf16.vlgmr.msra.gmra.mrb[64].mxu0 %v6165_v11  ;;  %v6489_v11 = vld [vmem:[%s7682_s5 + $0xc0] ss:$8 sps:$4 sm:$0xff]  }
 0x27a   :  { %2550 = vmatpush1.bf16.msra.mxu1 %v6348_v9  ;;  %2636 = vmatpush1.bf16.msra.mxu0 %v6318_v46 }
 0x27b   :  { %2551 = vmatprep.subr.bf16.mxu1 %v6355_v10  ;;  %2637 = vmatprep.subr.bf16.mxu0 %v6325_v31 }
 0x27e   :  { %2552 = vmatpush1.bf16.msra.mxu1 %v6363_v57  ;;  %2638 = vmatpush1.bf16.msra.mxu0 %v6333_v36 }
 0x27f   :  { %2553 = vmatprep.subr.bf16.mxu1 %v6370_v51  ;;  %2639 = vmatprep.subr.bf16.mxu0 %v6340_v33 }
 0x282   :  { %2554 = vmatpush1.bf16.msra.mxu1 %v6377_v38  ;;  %2640 = vmatpush1.bf16.msra.mxu0 %v6348_v9 }
 0x283   :  { %2555 = vmatprep.subr.bf16.mxu1 %v6384_v55  ;;  %2641 = vmatprep.subr.bf16.mxu0 %v6355_v10 }
 0x286   :  { %2556 = vmatpush1.bf16.msra.mxu1 %v6391_v5  ;;  %2642 = vmatpush1.bf16.msra.mxu0 %v6363_v57 }
 0x287   :  { %2557 = vmatprep.subr.bf16.mxu1 %v6398_v17  ;;  %2643 = vmatprep.subr.bf16.mxu0 %v6370_v51 }
 0x28a   :  { %2558 = vmatpush1.bf16.msra.mxu1 %v6405_v19  ;;  %2644 = vmatpush1.bf16.msra.mxu0 %v6377_v38 }
 0x28b   :  { %2559 = vmatprep.subr.bf16.mxu1 %v6412_v16  ;;  %2645 = vmatprep.subr.bf16.mxu0 %v6384_v55 }
 0x28e   :  { %2560 = vmatpush1.bf16.msra.mxu1 %v6419_v12  ;;  %2646 = vmatpush1.bf16.msra.mxu0 %v6391_v5 }
 0x28f   :  { %2561 = vmatprep.subr.bf16.mxu1 %v6426_v47  ;;  %2647 = vmatprep.subr.bf16.mxu0 %v6398_v17 }
 0x292   :  { %2562 = vmatpush1.bf16.msra.mxu1 %v6433_v2  ;;  %2648 = vmatpush1.bf16.msra.mxu0 %v6405_v19 }
 0x293   :  { %2563 = vmatprep.subr.bf16.mxu1 %v6440_v58  ;;  %2649 = vmatprep.subr.bf16.mxu0 %v6412_v16 }
 0x296   :  { %2564 = vmatpush1.bf16.msra.mxu1 %v6447_v56  ;;  %2650 = vmatpush1.bf16.msra.mxu0 %v6419_v12 }
 0x297   :  { %2565 = vmatprep.subr.bf16.mxu1 %v6454_v22  ;;  %2651 = vmatprep.subr.bf16.mxu0 %v6426_v47 }
 0x29a   :  { %2566 = vmatpush1.bf16.msra.mxu1 %v6461_v14  ;;  %2652 = vmatpush1.bf16.msra.mxu0 %v6433_v2 }
 0x29b   :  { %2567 = vmatprep.subr.bf16.mxu1 %v6468_v32  ;;  %2653 = vmatprep.subr.bf16.mxu0 %v6440_v58 }
 0x29e   :  { %2568 = vmatpush1.bf16.msra.mxu1 %v6475_v20  ;;  %2654 = vmatpush1.bf16.msra.mxu0 %v6447_v56 }
 0x29f   :  { %2569 = vmatprep.subr.bf16.mxu1 %v6482_v35  ;;  %2655 = vmatprep.subr.bf16.mxu0 %v6454_v22 }
 0x2a2   :  { %2570 = vmatpush1.bf16.msra.mxu1 %v6489_v11  ;;  %2656 = vmatpush1.bf16.msra.mxu0 %v6461_v14 }
 0x2a3   :  { %2571 = vmatprep.subr.bf16.mxu1 %v6496_v26  ;;  %2657 = vmatprep.subr.bf16.mxu0 %v6468_v32 }
 0x2a4   :  { %v1891_v59 = vpop.f32.mrb[44].mxu1 }
 0x2a5   :  { %v1892_v61 = vadd.f32 %v1891_v59, %v6215_v54  ;;  %v1893_v4 = vpop.f32.mrb[45].mxu1 }
 0x2a6   :  { %v1894_v27 = vadd.f32 %v1893_v4, %v6218_v13  ;;  %2572 = vmatpush1.bf16.msra.mxu1 %v6503_v43  ;;  %2658 = vmatpush1.bf16.msra.mxu0 %v6475_v20  ;;  %v1895_v40 = vpop.f32.mrb[46].mxu1 }
 0x2a7   :  { %v1896_v21 = vadd.f32 %v1895_v40, %v6215_v54  ;;  %v1897_v41 = vpop.f32.mrb[47].mxu1  ;;  %2573 = vmatprep.subr.bf16.mxu1 %v6510_v0  ;;  %2659 = vmatprep.subr.bf16.mxu0 %v6482_v35  ;;  %v1900_v7 = vmax.f32 %v1892_v61, 0.0 }
 0x2a8   :  { %v1898_v53 = vadd.f32 %v1897_v41, %v6218_v13  ;;  %v1901_v3 = vmax.f32 %v1894_v27, 0.0 }
 0x2a9   :  { %v1902_v23 = vmax.f32 %v1896_v21, 0.0 }
 0x2aa   :  { %v1903_v39 = vmax.f32 %v1898_v53, 0.0  ;;  %2574 = vmatpush1.bf16.msra.mxu1 %v6519_v49  ;;  %2660 = vmatpush1.bf16.msra.mxu0 %v6489_v11 }
 0x2ab   :  { %v1904_v6 = vpack.c.bf16 %v1902_v23, %v1900_v7  ;;  %2575 = vmatprep.subr.bf16.mxu1 %v6527_v30  ;;  %2661 = vmatprep.subr.bf16.mxu0 %v6496_v26 }
 0x2ac   :  { %v1905_v15 = vpack.c.bf16 %v1903_v39, %v1901_v3  ;;  %v1943_v42 = vpop.f32.mrb[48].mxu0 }
 0x2ad   :  { %v1944_v8 = vadd.f32 %v1943_v42, %v6215_v54  ;;  %v1945_v48 = vpop.f32.mrb[49].mxu0 }
 0x2ae   :  { %v1946_v60 = vadd.f32 %v1945_v48, %v6218_v13  ;;  %2576 = vmatpush1.bf16.msra.mxu1 %v6535_v24  ;;  %2662 = vmatpush1.bf16.msra.mxu0 %v6503_v43  ;;  %v1947_v52 = vpop.f32.mrb[50].mxu0 }
 0x2af   :  { %v1948_v45 = vadd.f32 %v1947_v52, %v6215_v54  ;;  %2667 = vmatprep.mubr.bf16.mxu0 %v1905_v15  ;;  %v1949_v34 = vpop.f32.mrb[51].mxu0  ;;  %2663 = vmatprep.subr.bf16.mxu0 %v6510_v0  ;;  %v1952_v18 = vmax.f32 %v1944_v8, 0.0 }
 0x2b0   :  { %v1950_v50 = vadd.f32 %v1949_v34, %v6218_v13  ;;  %2703 = vmatprep.subr.bf16.mxu1 %v6311_v63  ;;  %v1953_v37 = vmax.f32 %v1946_v60, 0.0 }
 0x2b1   :  { %v1954_v28 = vmax.f32 %v1948_v45, 0.0  ;;  %2578 = vmatmul.mubr.bf16.vlgmr.msra.gmra.mrb[64].mxu1 %v6232_v29 }
 0x2b2   :  { %v1955_v1 = vmax.f32 %v1950_v50, 0.0  ;;  %2664 = vmatpush1.bf16.msra.mxu0 %v6519_v49  ;;  %2704 = vmatpush1.bf16.msra.mxu1 %v6318_v46 }
 0x2b3   :  { %v6550_v62 = vpack.c.bf16 %v1954_v28, %v1952_v18  ;;  %2665 = vmatprep.subr.bf16.mxu0 %v6527_v30  ;;  %2705 = vmatprep.subr.bf16.mxu1 %v6325_v31 }
 0x2b4   :  { %v1957_v59 = vpack.c.bf16 %v1955_v1, %v1953_v37 }
 0x2b6   :  { %2666 = vmatpush1.bf16.msra.mxu0 %v6535_v24  ;;  %2706 = vmatpush1.bf16.msra.mxu1 %v6333_v36 }
 0x2b7   :  { %2735 = vmatprep.mubr.bf16.mxu1 %v1957_v59  ;;  %2707 = vmatprep.subr.bf16.mxu1 %v6340_v33 }
 0x2b8   :  { %2771 = vmatprep.subr.bf16.mxu0 %v6311_v63 }
 0x2b9   :  { %2668 = vmatmul.mubr.bf16.vlgmr.msra.gmra.mrb[68].mxu0 %v1904_v6 }
 0x2ba   :  { %2708 = vmatpush1.bf16.msra.mxu1 %v6348_v9  ;;  %2772 = vmatpush1.bf16.msra.mxu0 %v6318_v46 }
 0x2bb   :  { %2709 = vmatprep.subr.bf16.mxu1 %v6355_v10  ;;  %2773 = vmatprep.subr.bf16.mxu0 %v6325_v31 }
 0x2be   :  { %2710 = vmatpush1.bf16.msra.mxu1 %v6363_v57  ;;  %2774 = vmatpush1.bf16.msra.mxu0 %v6333_v36 }
 0x2bf   :  { %2711 = vmatprep.subr.bf16.mxu1 %v6370_v51  ;;  %2775 = vmatprep.subr.bf16.mxu0 %v6340_v33 }
 0x2c2   :  { %2712 = vmatpush1.bf16.msra.mxu1 %v6377_v38  ;;  %2776 = vmatpush1.bf16.msra.mxu0 %v6348_v9 }
 0x2c3   :  { %2713 = vmatprep.subr.bf16.mxu1 %v6384_v55  ;;  %2777 = vmatprep.subr.bf16.mxu0 %v6355_v10 }
 0x2c6   :  { %2714 = vmatpush1.bf16.msra.mxu1 %v6391_v5  ;;  %2778 = vmatpush1.bf16.msra.mxu0 %v6363_v57 }
 0x2c7   :  { %2715 = vmatprep.subr.bf16.mxu1 %v6398_v17  ;;  %2779 = vmatprep.subr.bf16.mxu0 %v6370_v51 }
 0x2ca   :  { %2716 = vmatpush1.bf16.msra.mxu1 %v6405_v19  ;;  %2780 = vmatpush1.bf16.msra.mxu0 %v6377_v38 }
 0x2cb   :  { %2717 = vmatprep.subr.bf16.mxu1 %v6412_v16  ;;  %2781 = vmatprep.subr.bf16.mxu0 %v6384_v55 }
 0x2cc   :  { %v1995_v29 = vpop.f32.mrb[48].mxu1 }
 0x2cd   :  { %v1996_v61 = vadd.f32 %v1995_v29, %v6215_v54  ;;  %v1997_v4 = vpop.f32.mrb[49].mxu1 }
 0x2ce   :  { %v1998_v27 = vadd.f32 %v1997_v4, %v6218_v13  ;;  %v1999_v40 = vpop.f32.mrb[50].mxu1  ;;  %2718 = vmatpush1.bf16.msra.mxu1 %v6419_v12  ;;  %2782 = vmatpush1.bf16.msra.mxu0 %v6391_v5 }
 0x2cf   :  { %v2000_v21 = vadd.f32 %v1999_v40, %v6215_v54  ;;  %v2001_v41 = vpop.f32.mrb[51].mxu1  ;;  %2719 = vmatprep.subr.bf16.mxu1 %v6426_v47  ;;  %2783 = vmatprep.subr.bf16.mxu0 %v6398_v17  ;;  %v2004_v7 = vmax.f32 %v1996_v61, 0.0 }
 0x2d0   :  { %v2002_v53 = vadd.f32 %v2001_v41, %v6218_v13  ;;  %v2005_v3 = vmax.f32 %v1998_v27, 0.0 }
 0x2d1   :  { %v2006_v23 = vmax.f32 %v2000_v21, 0.0 }
 0x2d2   :  { %v2007_v39 = vmax.f32 %v2002_v53, 0.0  ;;  %2720 = vmatpush1.bf16.msra.mxu1 %v6433_v2  ;;  %2784 = vmatpush1.bf16.msra.mxu0 %v6405_v19 }
 0x2d3   :  { %v6588_v6 = vpack.c.bf16 %v2006_v23, %v2004_v7  ;;  %2721 = vmatprep.subr.bf16.mxu1 %v6440_v58  ;;  %2785 = vmatprep.subr.bf16.mxu0 %v6412_v16 }
 0x2d4   :  { %v2009_v15 = vpack.c.bf16 %v2007_v39, %v2005_v3  ;;  %v2047_v42 = vpop.f32.mrb[52].mxu0 }
 0x2d5   :  { %v2048_v8 = vadd.f32 %v2047_v42, %v6215_v54  ;;  %v2049_v48 = vpop.f32.mrb[53].mxu0 }
 0x2d6   :  { %v2050_v60 = vadd.f32 %v2049_v48, %v6218_v13  ;;  %v2051_v52 = vpop.f32.mrb[54].mxu0  ;;  %2722 = vmatpush1.bf16.msra.mxu1 %v6447_v56  ;;  %2786 = vmatpush1.bf16.msra.mxu0 %v6419_v12 }
 0x2d7   :  { %v2052_v45 = vadd.f32 %v2051_v52, %v6215_v54  ;;  %2803 = vmatprep.mubr.bf16.mxu0 %v2009_v15  ;;  %v2053_v34 = vpop.f32.mrb[55].mxu0  ;;  %2723 = vmatprep.subr.bf16.mxu1 %v6454_v22  ;;  %v2056_v18 = vmax.f32 %v2048_v8, 0.0 }
 0x2d8   :  { %v2054_v50 = vadd.f32 %v2053_v34, %v6218_v13  ;;  %2787 = vmatprep.subr.bf16.mxu0 %v6426_v47  ;;  %v2057_v37 = vmax.f32 %v2050_v60, 0.0 }
 0x2d9   :  { %v2058_v28 = vmax.f32 %v2052_v45, 0.0 }
 0x2da   :  { %v2059_v1 = vmax.f32 %v2054_v50, 0.0  ;;  %2724 = vmatpush1.bf16.msra.mxu1 %v6461_v14  ;;  %2788 = vmatpush1.bf16.msra.mxu0 %v6433_v2 }
 0x2db   :  { %v6602_v59 = vpack.c.bf16 %v2058_v28, %v2056_v18  ;;  %2725 = vmatprep.subr.bf16.mxu1 %v6468_v32  ;;  %2789 = vmatprep.subr.bf16.mxu0 %v6440_v58 }
 0x2dc   :  { %v2061_v29 = vpack.c.bf16 %v2059_v1, %v2057_v37 }
 0x2de   :  { %2726 = vmatpush1.bf16.msra.mxu1 %v6475_v20  ;;  %2790 = vmatpush1.bf16.msra.mxu0 %v6447_v56 }
 0x2df   :  { %2727 = vmatprep.subr.bf16.mxu1 %v6482_v35  ;;  %2791 = vmatprep.subr.bf16.mxu0 %v6454_v22 }
 0x2e2   :  { %2728 = vmatpush1.bf16.msra.mxu1 %v6489_v11  ;;  %2792 = vmatpush1.bf16.msra.mxu0 %v6461_v14 }
 0x2e3   :  { %2729 = vmatprep.subr.bf16.mxu1 %v6496_v26  ;;  %2793 = vmatprep.subr.bf16.mxu0 %v6468_v32 }
 0x2e6   :  { %2730 = vmatpush1.bf16.msra.mxu1 %v6503_v43  ;;  %2794 = vmatpush1.bf16.msra.mxu0 %v6475_v20 }
 0x2e7   :  { %2731 = vmatprep.subr.bf16.mxu1 %v6510_v0  ;;  %2795 = vmatprep.subr.bf16.mxu0 %v6482_v35 }
 0x2ea   :  { %2732 = vmatpush1.bf16.msra.mxu1 %v6519_v49  ;;  %2796 = vmatpush1.bf16.msra.mxu0 %v6489_v11 }
 0x2eb   :  { %2733 = vmatprep.subr.bf16.mxu1 %v6527_v30  ;;  %2797 = vmatprep.subr.bf16.mxu0 %v6496_v26 }
 0x2ee   :  { %2734 = vmatpush1.bf16.msra.mxu1 %v6535_v24  ;;  %2798 = vmatpush1.bf16.msra.mxu0 %v6503_v43 }
 0x2ef   :  { %2799 = vmatprep.subr.bf16.mxu0 %v6510_v0  ;;  %2839 = vmatprep.subr.bf16.mxu1 %v6311_v63 }
 0x2f1   :  { %2736 = vmatmul.mubr.bf16.vlgmr.msra.gmra.mrb[68].mxu1 %v6550_v62 }
 0x2f2   :  { %2800 = vmatpush1.bf16.msra.mxu0 %v6519_v49  ;;  %2840 = vmatpush1.bf16.msra.mxu1 %v6318_v46 }
 0x2f3   :  { %2871 = vmatprep.mubr.bf16.mxu1 %v2061_v29  ;;  %2801 = vmatprep.subr.bf16.mxu0 %v6527_v30 }
 0x2f4   :  { %v2099_v61 = vpop.f32.mrb[52].mxu1  ;;  %2841 = vmatprep.subr.bf16.mxu1 %v6325_v31 }
 0x2f5   :  { %v2100_v4 = vadd.f32 %v2099_v61, %v6215_v54  ;;  %v2101_v27 = vpop.f32.mrb[53].mxu1 }
 0x2f6   :  { %v2102_v40 = vadd.f32 %v2101_v27, %v6218_v13  ;;  %v2103_v21 = vpop.f32.mrb[54].mxu1  ;;  %2802 = vmatpush1.bf16.msra.mxu0 %v6535_v24  ;;  %2842 = vmatpush1.bf16.msra.mxu1 %v6333_v36 }
 0x2f7   :  { %v2104_v62 = vadd.f32 %v2103_v21, %v6215_v54  ;;  %v2105_v41 = vpop.f32.mrb[55].mxu1  ;;  %2843 = vmatprep.subr.bf16.mxu1 %v6340_v33  ;;  %2907 = vmatprep.subr.bf16.mxu0 %v6311_v63  ;;  %v2108_v7 = vmax.f32 %v2100_v4, 0.0 }
 0x2f8   :  { %v2106_v53 = vadd.f32 %v2105_v41, %v6218_v13  ;;  %v2109_v3 = vmax.f32 %v2102_v40, 0.0 }
 0x2f9   :  { %v2110_v23 = vmax.f32 %v2104_v62, 0.0  ;;  %2804 = vmatmul.mubr.bf16.vlgmr.msra.gmra.mrb[72].mxu0 %v6588_v6 }
 0x2fa   :  { %v2111_v39 = vmax.f32 %v2106_v53, 0.0  ;;  %2844 = vmatpush1.bf16.msra.mxu1 %v6348_v9  ;;  %2908 = vmatpush1.bf16.msra.mxu0 %v6318_v46 }
 0x2fb   :  { %v6642_v15 = vpack.c.bf16 %v2110_v23, %v2108_v7  ;;  %2845 = vmatprep.subr.bf16.mxu1 %v6355_v10  ;;  %2909 = vmatprep.subr.bf16.mxu0 %v6325_v31 }
 0x2fc   :  { %v2113_v42 = vpack.c.bf16 %v2111_v39, %v2109_v3  ;;  %v2151_v8 = vpop.f32.mrb[56].mxu0 }
 0x2fd   :  { %v2152_v48 = vadd.f32 %v2151_v8, %v6215_v54  ;;  %v2153_v60 = vpop.f32.mrb[57].mxu0 }
 0x2fe   :  { %v2154_v52 = vadd.f32 %v2153_v60, %v6218_v13  ;;  %v2155_v6 = vpop.f32.mrb[58].mxu0  ;;  %2846 = vmatpush1.bf16.msra.mxu1 %v6363_v57  ;;  %2910 = vmatpush1.bf16.msra.mxu0 %v6333_v36 }
 0x2ff   :  { %v2156_v45 = vadd.f32 %v2155_v6, %v6215_v54  ;;  %2939 = vmatprep.mubr.bf16.mxu0 %v2113_v42  ;;  %v2157_v34 = vpop.f32.mrb[59].mxu0  ;;  %2847 = vmatprep.subr.bf16.mxu1 %v6370_v51  ;;  %v2160_v18 = vmax.f32 %v2152_v48, 0.0 }
 0x300   :  { %v2158_v50 = vadd.f32 %v2157_v34, %v6218_v13  ;;  %2911 = vmatprep.subr.bf16.mxu0 %v6340_v33  ;;  %v2161_v37 = vmax.f32 %v2154_v52, 0.0 }
 0x301   :  { %v2162_v28 = vmax.f32 %v2156_v45, 0.0 }
 0x302   :  { %v2163_v1 = vmax.f32 %v2158_v50, 0.0  ;;  %2848 = vmatpush1.bf16.msra.mxu1 %v6377_v38  ;;  %2912 = vmatpush1.bf16.msra.mxu0 %v6348_v9 }
 0x303   :  { %v6656_v29 = vpack.c.bf16 %v2162_v28, %v2160_v18  ;;  %2849 = vmatprep.subr.bf16.mxu1 %v6384_v55  ;;  %2913 = vmatprep.subr.bf16.mxu0 %v6355_v10 }
 0x304   :  { %v6660_v61 = vpack.c.bf16 %v2163_v1, %v2161_v37 }
 0x306   :  { %2850 = vmatpush1.bf16.msra.mxu1 %v6391_v5  ;;  %2914 = vmatpush1.bf16.msra.mxu0 %v6363_v57 }
 0x307   :  { %2851 = vmatprep.subr.bf16.mxu1 %v6398_v17  ;;  %2915 = vmatprep.subr.bf16.mxu0 %v6370_v51 }
 0x30a   :  { %2852 = vmatpush1.bf16.msra.mxu1 %v6405_v19  ;;  %2916 = vmatpush1.bf16.msra.mxu0 %v6377_v38 }
 0x30b   :  { %2853 = vmatprep.subr.bf16.mxu1 %v6412_v16  ;;  %2917 = vmatprep.subr.bf16.mxu0 %v6384_v55 }
 0x30e   :  { %2854 = vmatpush1.bf16.msra.mxu1 %v6419_v12  ;;  %2918 = vmatpush1.bf16.msra.mxu0 %v6391_v5 }
 0x30f   :  { %2855 = vmatprep.subr.bf16.mxu1 %v6426_v47  ;;  %2919 = vmatprep.subr.bf16.mxu0 %v6398_v17 }
 0x312   :  { %2856 = vmatpush1.bf16.msra.mxu1 %v6433_v2  ;;  %2920 = vmatpush1.bf16.msra.mxu0 %v6405_v19 }
 0x313   :  { %2857 = vmatprep.subr.bf16.mxu1 %v6440_v58  ;;  %2921 = vmatprep.subr.bf16.mxu0 %v6412_v16 }
 0x316   :  { %2858 = vmatpush1.bf16.msra.mxu1 %v6447_v56  ;;  %2922 = vmatpush1.bf16.msra.mxu0 %v6419_v12 }
 0x317   :  { %2859 = vmatprep.subr.bf16.mxu1 %v6454_v22  ;;  %2923 = vmatprep.subr.bf16.mxu0 %v6426_v47 }
 0x31a   :  { %2860 = vmatpush1.bf16.msra.mxu1 %v6461_v14  ;;  %2924 = vmatpush1.bf16.msra.mxu0 %v6433_v2 }
 0x31b   :  { %2861 = vmatprep.subr.bf16.mxu1 %v6468_v32  ;;  %2925 = vmatprep.subr.bf16.mxu0 %v6440_v58 }
 0x31c   :  { %v2203_v4 = vpop.f32.mrb[56].mxu1 }
 0x31d   :  { %v2204_v27 = vadd.f32 %v2203_v4, %v6215_v54  ;;  %v2205_v40 = vpop.f32.mrb[57].mxu1 }
 0x31e   :  { %v2206_v21 = vadd.f32 %v2205_v40, %v6218_v13  ;;  %v2207_v62 = vpop.f32.mrb[58].mxu1  ;;  %2862 = vmatpush1.bf16.msra.mxu1 %v6475_v20  ;;  %2926 = vmatpush1.bf16.msra.mxu0 %v6447_v56 }
 0x31f   :  { %v2208_v41 = vadd.f32 %v2207_v62, %v6215_v54  ;;  %v2209_v53 = vpop.f32.mrb[59].mxu1  ;;  %2863 = vmatprep.subr.bf16.mxu1 %v6482_v35  ;;  %2927 = vmatprep.subr.bf16.mxu0 %v6454_v22  ;;  %v2212_v23 = vmax.f32 %v2204_v27, 0.0 }
 0x320   :  { %v2210_v7 = vadd.f32 %v2209_v53, %v6218_v13  ;;  %v2213_v39 = vmax.f32 %v2206_v21, 0.0 }
 0x321   :  { %v2214_v3 = vmax.f32 %v2208_v41, 0.0 }
 0x322   :  { %v2215_v42 = vmax.f32 %v2210_v7, 0.0  ;;  %2864 = vmatpush1.bf16.msra.mxu1 %v6489_v11  ;;  %2928 = vmatpush1.bf16.msra.mxu0 %v6461_v14 }
 0x323   :  { %v6696_v8 = vpack.c.bf16 %v2214_v3, %v2212_v23  ;;  %2865 = vmatprep.subr.bf16.mxu1 %v6496_v26  ;;  %2929 = vmatprep.subr.bf16.mxu0 %v6468_v32 }
 0x324   :  { %v2217_v48 = vpack.c.bf16 %v2215_v42, %v2213_v39  ;;  %v2255_v60 = vpop.f32.mrb[60].mxu0 }
 0x325   :  { %v2256_v52 = vadd.f32 %v2255_v60, %v6215_v54  ;;  %v2257_v6 = vpop.f32.mrb[61].mxu0 }
 0x326   :  { %v2258_v45 = vadd.f32 %v2257_v6, %v6218_v13  ;;  %v2259_v34 = vpop.f32.mrb[62].mxu0  ;;  %2866 = vmatpush1.bf16.msra.mxu1 %v6503_v43  ;;  %2930 = vmatpush1.bf16.msra.mxu0 %v6475_v20 }
 0x327   :  { %v2260_v50 = vadd.f32 %v2259_v34, %v6215_v54  ;;  %v2261_v18 = vpop.f32.mrb[63].mxu0  ;;  %2867 = vmatprep.subr.bf16.mxu1 %v6510_v0  ;;  %2931 = vmatprep.subr.bf16.mxu0 %v6482_v35  ;;  %v2264_v37 = vmax.f32 %v2256_v52, 0.0 }
 0x328   :  { %v2262_v28 = vadd.f32 %v2261_v18, %v6218_v13  ;;  %v2265_v4 = vmax.f32 %v2258_v45, 0.0 }
 0x329   :  { %v2266_v1 = vmax.f32 %v2260_v50, 0.0 }
 0x32a   :  { %v2267_v27 = vmax.f32 %v2262_v28, 0.0  ;;  %2868 = vmatpush1.bf16.msra.mxu1 %v6519_v49  ;;  %2932 = vmatpush1.bf16.msra.mxu0 %v6489_v11 }
 0x32b   :  { %v6710_v40 = vpack.c.bf16 %v2266_v1, %v2264_v37  ;;  %2869 = vmatprep.subr.bf16.mxu1 %v6527_v30  ;;  %2933 = vmatprep.subr.bf16.mxu0 %v6496_v26 }
 0x32c   :  { %v6714_v21 = vpack.c.bf16 %v2267_v27, %v2265_v4 }
 0x32e   :  { %2870 = vmatpush1.bf16.msra.mxu1 %v6535_v24  ;;  %2934 = vmatpush1.bf16.msra.mxu0 %v6503_v43 }
 0x32f   :  { %2935 = vmatprep.subr.bf16.mxu0 %v6510_v0  ;;  %2975 = vmatprep.subr.bf16.mxu1 %v6311_v63 }
 0x331   :  { %2872 = vmatmul.mubr.bf16.vlgmr.msra.gmra.mrb[72].mxu1 %v6602_v59 }
 0x332   :  { %2936 = vmatpush1.bf16.msra.mxu0 %v6519_v49  ;;  %2976 = vmatpush1.bf16.msra.mxu1 %v6318_v46 }
 0x333   :  { %3007 = vmatprep.mubr.bf16.mxu1 %v6660_v61  ;;  %2937 = vmatprep.subr.bf16.mxu0 %v6527_v30 }
 0x334   :  { %2977 = vmatprep.subr.bf16.mxu1 %v6325_v31 }
 0x336   :  { %2938 = vmatpush1.bf16.msra.mxu0 %v6535_v24  ;;  %2978 = vmatpush1.bf16.msra.mxu1 %v6333_v36 }
 0x337   :  { %2979 = vmatprep.subr.bf16.mxu1 %v6340_v33  ;;  %3043 = vmatprep.subr.bf16.mxu0 %v6311_v63 }
 0x339   :  { %2940 = vmatmul.mubr.bf16.vlgmr.msra.gmra.mrb[76].mxu0 %v6642_v15 }
 0x33a   :  { %2980 = vmatpush1.bf16.msra.mxu1 %v6348_v9  ;;  %3044 = vmatpush1.bf16.msra.mxu0 %v6318_v46 }
 0x33b   :  { %3075 = vmatprep.mubr.bf16.mxu0 %v2217_v48  ;;  %2981 = vmatprep.subr.bf16.mxu1 %v6355_v10 }
 0x33c   :  { %3045 = vmatprep.subr.bf16.mxu0 %v6325_v31 }
 0x33e   :  { %2982 = vmatpush1.bf16.msra.mxu1 %v6363_v57  ;;  %3046 = vmatpush1.bf16.msra.mxu0 %v6333_v36 }
 0x33f   :  { %2983 = vmatprep.subr.bf16.mxu1 %v6370_v51  ;;  %3047 = vmatprep.subr.bf16.mxu0 %v6340_v33 }
 0x342   :  { %2984 = vmatpush1.bf16.msra.mxu1 %v6377_v38  ;;  %3048 = vmatpush1.bf16.msra.mxu0 %v6348_v9 }
 0x343   :  { %2985 = vmatprep.subr.bf16.mxu1 %v6384_v55  ;;  %3049 = vmatprep.subr.bf16.mxu0 %v6355_v10 }
 0x344   :  { %v2307_v59 = vpop.f32.mrb[60].mxu1 }
 0x345   :  { %v2308_v15 = vadd.f32 %v2307_v59, %v6215_v54  ;;  %v2309_v61 = vpop.f32.mrb[61].mxu1 }
 0x346   :  { %v2310_v62 = vadd.f32 %v2309_v61, %v6218_v13  ;;  %v2311_v41 = vpop.f32.mrb[62].mxu1  ;;  %2986 = vmatpush1.bf16.msra.mxu1 %v6391_v5  ;;  %3050 = vmatpush1.bf16.msra.mxu0 %v6363_v57 }
 0x347   :  { %v2312_v53 = vadd.f32 %v2311_v41, %v6215_v54  ;;  %v2313_v7 = vpop.f32.mrb[63].mxu1  ;;  %2987 = vmatprep.subr.bf16.mxu1 %v6398_v17  ;;  %3051 = vmatprep.subr.bf16.mxu0 %v6370_v51  ;;  %v2316_v3 = vmax.f32 %v2308_v15, 0.0 }
 0x348   :  { %v2314_v23 = vadd.f32 %v2313_v7, %v6218_v13  ;;  %v2317_v42 = vmax.f32 %v2310_v62, 0.0  ;;  %v6872_v7 = vld [vmem:[%s7686_s8] sm:$0x3] }
 0x349   :  { %v2318_v39 = vmax.f32 %v2312_v53, 0.0 }
 0x34a   :  { %v2319_v48 = vmax.f32 %v2314_v23, 0.0  ;;  %2988 = vmatpush1.bf16.msra.mxu1 %v6405_v19  ;;  %3052 = vmatpush1.bf16.msra.mxu0 %v6377_v38 }
 0x34b   :  { %v6753_v60 = vpack.c.bf16 %v2318_v39, %v2316_v3  ;;  %2989 = vmatprep.subr.bf16.mxu1 %v6412_v16  ;;  %3053 = vmatprep.subr.bf16.mxu0 %v6384_v55  ;;  %v6879_v39 = vrot.slane %v6872_v7, %v7740_v25 }
 0x34c   :  { %v6757_v52 = vpack.c.bf16 %v2319_v48, %v2317_v42  ;;  %v2359_v6 = vpop.f32.mrb[64].mxu0 }
 0x34d   :  { %v2360_v45 = vadd.f32 %v2359_v6, %v6215_v54  ;;  %v2361_v34 = vpop.f32.mrb[65].mxu0 }
 0x34e   :  { %v2362_v50 = vadd.f32 %v2361_v34, %v6218_v13  ;;  %v2363_v18 = vpop.f32.mrb[66].mxu0  ;;  %2990 = vmatpush1.bf16.msra.mxu1 %v6419_v12  ;;  %3054 = vmatpush1.bf16.msra.mxu0 %v6391_v5  ;;  %v5109_v34 = vld [vmem:[%s7682_s5 + $0x60] ss:$8 sps:$4 sm:$0xff]  }
 0x34f   :  { %v2364_v28 = vadd.f32 %v2363_v18, %v6215_v54  ;;  %v2365_v37 = vpop.f32.mrb[67].mxu0  ;;  %2991 = vmatprep.subr.bf16.mxu1 %v6426_v47  ;;  %3055 = vmatprep.subr.bf16.mxu0 %v6398_v17  ;;  %v2368_v4 = vmax.f32 %v2360_v45, 0.0  ;;  %v5110_v18 = vld [vmem:[%s7682_s5 + $0x74] ss:$8 sps:$4 sm:$0xff]  }
 0x350   :  { %v2366_v1 = vadd.f32 %v2365_v37, %v6218_v13  ;;  %v2369_v59 = vmax.f32 %v2362_v50, 0.0 }
 0x351   :  { %v2370_v27 = vmax.f32 %v2364_v28, 0.0 }
 0x352   :  { %v2371_v15 = vmax.f32 %v2366_v1, 0.0  ;;  %2992 = vmatpush1.bf16.msra.mxu1 %v6433_v2  ;;  %3056 = vmatpush1.bf16.msra.mxu0 %v6405_v19 }
 0x353   :  { %v6769_v61 = vpack.c.bf16 %v2370_v27, %v2368_v4  ;;  %2993 = vmatprep.subr.bf16.mxu1 %v6440_v58  ;;  %3057 = vmatprep.subr.bf16.mxu0 %v6412_v16 }
 0x354   :  { %v6773_v54 = vpack.c.bf16 %v2371_v15, %v2369_v59  ;;  %v5111_v59 = vld [vmem:[%s7682_s5 + $0x70] ss:$8 sps:$4 sm:$0xff]  }
 0x356   :  { %2994 = vmatpush1.bf16.msra.mxu1 %v6447_v56  ;;  %3058 = vmatpush1.bf16.msra.mxu0 %v6419_v12 }
 0x357   :  { %2995 = vmatprep.subr.bf16.mxu1 %v6454_v22  ;;  %3059 = vmatprep.subr.bf16.mxu0 %v6426_v47 }
 0x35a   :  { %2996 = vmatpush1.bf16.msra.mxu1 %v6461_v14  ;;  %3060 = vmatpush1.bf16.msra.mxu0 %v6433_v2 }
 0x35b   :  { %2997 = vmatprep.subr.bf16.mxu1 %v6468_v32  ;;  %3061 = vmatprep.subr.bf16.mxu0 %v6440_v58 }
 0x35e   :  { %2998 = vmatpush1.bf16.msra.mxu1 %v6475_v20  ;;  %3062 = vmatpush1.bf16.msra.mxu0 %v6447_v56 }
 0x35f   :  { %2999 = vmatprep.subr.bf16.mxu1 %v6482_v35  ;;  %3063 = vmatprep.subr.bf16.mxu0 %v6454_v22 }
 0x362   :  { %3000 = vmatpush1.bf16.msra.mxu1 %v6489_v11  ;;  %3064 = vmatpush1.bf16.msra.mxu0 %v6461_v14 }
 0x363   :  { %3001 = vmatprep.subr.bf16.mxu1 %v6496_v26  ;;  %3065 = vmatprep.subr.bf16.mxu0 %v6468_v32 }
 0x366   :  { %3002 = vmatpush1.bf16.msra.mxu1 %v6503_v43  ;;  %3066 = vmatpush1.bf16.msra.mxu0 %v6475_v20 }
 0x367   :  { %3003 = vmatprep.subr.bf16.mxu1 %v6510_v0  ;;  %3067 = vmatprep.subr.bf16.mxu0 %v6482_v35 }
 0x36a   :  { %3004 = vmatpush1.bf16.msra.mxu1 %v6519_v49  ;;  %3068 = vmatpush1.bf16.msra.mxu0 %v6489_v11 }
 0x36b   :  { %3005 = vmatprep.subr.bf16.mxu1 %v6527_v30  ;;  %3069 = vmatprep.subr.bf16.mxu0 %v6496_v26 }
 0x36e   :  { %3006 = vmatpush1.bf16.msra.mxu1 %v6535_v24  ;;  %3070 = vmatpush1.bf16.msra.mxu0 %v6503_v43 }
 0x36f   :  { %3071 = vmatprep.subr.bf16.mxu0 %v6510_v0  ;;  %3111 = vmatprep.subr.bf16.mxu1 %v6311_v63 }
 0x371   :  { %3008 = vmatmul.mubr.bf16.vlgmr.msra.gmra.mrb[76].mxu1 %v6656_v29 }
 0x372   :  { %3072 = vmatpush1.bf16.msra.mxu0 %v6519_v49  ;;  %3112 = vmatpush1.bf16.msra.mxu1 %v6318_v46 }
 0x373   :  { %3143 = vmatprep.mubr.bf16.mxu1 %v6714_v21  ;;  %3073 = vmatprep.subr.bf16.mxu0 %v6527_v30 }
 0x374   :  { %3113 = vmatprep.subr.bf16.mxu1 %v6325_v31 }
 0x376   :  { %3074 = vmatpush1.bf16.msra.mxu0 %v6535_v24  ;;  %3114 = vmatpush1.bf16.msra.mxu1 %v6333_v36 }
 0x377   :  { %3115 = vmatprep.subr.bf16.mxu1 %v6340_v33  ;;  %3179 = vmatprep.subr.bf16.mxu0 %v6311_v63 }
 0x379   :  { %3076 = vmatmul.mubr.bf16.vlgmr.msra.gmra.mrb[80].mxu0 %v6696_v8 }
 0x37a   :  { %3116 = vmatpush1.bf16.msra.mxu1 %v6348_v9  ;;  %3180 = vmatpush1.bf16.msra.mxu0 %v6318_v46  ;;  %v6832_v46 = vld [vmem:[%s7684_s6] sm:$0x3] }
 0x37b   :  { %3211 = vmatprep.mubr.bf16.mxu0 %v6757_v52  ;;  %3117 = vmatprep.subr.bf16.mxu1 %v6355_v10 }
 0x37c   :  { %3181 = vmatprep.subr.bf16.mxu0 %v6325_v31 }
 0x37e   :  { %3118 = vmatpush1.bf16.msra.mxu1 %v6363_v57  ;;  %3182 = vmatpush1.bf16.msra.mxu0 %v6333_v36 }
 0x37f   :  { %3119 = vmatprep.subr.bf16.mxu1 %v6370_v51  ;;  %3183 = vmatprep.subr.bf16.mxu0 %v6340_v33  ;;  %v6842_v33 = vrot.slane %v6832_v46, %v7740_v25 }
 0x382   :  { %3120 = vmatpush1.bf16.msra.mxu1 %v6377_v38  ;;  %3184 = vmatpush1.bf16.msra.mxu0 %v6348_v9 }
 0x383   :  { %3121 = vmatprep.subr.bf16.mxu1 %v6384_v55  ;;  %3185 = vmatprep.subr.bf16.mxu0 %v6355_v10  ;;  %v6852_v10 = vld [vmem:[%s7685_s7] sm:$0x3] }
 0x384   :  { %v2579_v13 = vpop.f32.mrb[64].mxu1 }
 0x385   :  { %v6827_v63 = vpop.f32.mrb[65].mxu1 }
 0x386   :  { %v2583_v31 = vpop.f32.mrb[66].mxu1  ;;  %3122 = vmatpush1.bf16.msra.mxu1 %v6391_v5  ;;  %3186 = vmatpush1.bf16.msra.mxu0 %v6363_v57 }
 0x387   :  { %v6836_v36 = vpop.f32.mrb[67].mxu1  ;;  %3123 = vmatprep.subr.bf16.mxu1 %v6398_v17  ;;  %3187 = vmatprep.subr.bf16.mxu0 %v6370_v51  ;;  %v2584_v9 = vadd.f32 %v2583_v31, %v6842_v33  ;;  %v2580_v51 = vadd.f32 %v2579_v13, %v6842_v33 }
 0x38a   :  { %3124 = vmatpush1.bf16.msra.mxu1 %v6405_v19  ;;  %3188 = vmatpush1.bf16.msra.mxu0 %v6377_v38  ;;  %v6862_v38 = vrot.slane %v6852_v10, %v7740_v25 }
 0x38b   :  { %3125 = vmatprep.subr.bf16.mxu1 %v6412_v16  ;;  %3189 = vmatprep.subr.bf16.mxu0 %v6384_v55  ;;  %v2590_v55 = vmax.f32 %v2584_v9, 0.0  ;;  %v5112_v9 = vld [vmem:[%s7682_s5 + $0x84] ss:$8 sps:$4 sm:$0xff]  }
 0x38c   :  { %v2669_v57 = vpop.f32.mrb[68].mxu0 }
 0x38d   :  { %v2670_v29 = vadd.f32 %v2669_v57, %v6842_v33  ;;  %v6856_v8 = vpop.f32.mrb[69].mxu0  ;;  %v2605_v42 = vmul.f32 %v6862_v38, %v2590_v55 }
 0x38e   :  { %v2673_v21 = vpop.f32.mrb[70].mxu0  ;;  %3126 = vmatpush1.bf16.msra.mxu1 %v6419_v12  ;;  %3190 = vmatpush1.bf16.msra.mxu0 %v6391_v5  ;;  %v2588_v5 = vmax.f32 %v2580_v51, 0.0 }
 0x38f   :  { %v2678_v62 = vmax.f32 %v2670_v29, 0.0  ;;  %v2674_v41 = vadd.f32 %v2673_v21, %v6842_v33  ;;  %v6865_v53 = vpop.f32.mrb[71].mxu0  ;;  %3127 = vmatprep.subr.bf16.mxu1 %v6426_v47  ;;  %3191 = vmatprep.subr.bf16.mxu0 %v6398_v17  ;;  %v5113_v21 = vld [vmem:[%s7682_s5 + $0x80] ss:$8 sps:$4 sm:$0xff]  }
 0x390   :  { %v2603_v48 = vmul.f32 %v6862_v38, %v2588_v5 }
 0x391   :  { %v2682_v23 = vmul.f32 %v2678_v62, %v6862_v38  ;;  %v2680_v3 = vmax.f32 %v2674_v41, 0.0  ;;  %v5114_v41 = vld [vmem:[%s7682_s5 + $0x94] ss:$8 sps:$4 sm:$0xff]  }
 0x392   :  { %3128 = vmatpush1.bf16.msra.mxu1 %v6433_v2  ;;  %3192 = vmatpush1.bf16.msra.mxu0 %v6405_v19  ;;  %v6895_v19 = vadd.f32 %v6879_v39, %v2605_v42  ;;  %v6902_v45 = vadd.f32 %v6879_v39, %v2603_v48  ;;  %v5115_v42 = vld [vmem:[%s7682_s5 + $0x90] ss:$8 sps:$4 sm:$0xff]  }
 0x393   :  { %v2684_v17 = vmul.f32 %v2680_v3, %v6862_v38  ;;  %3129 = vmatprep.subr.bf16.mxu1 %v6440_v58  ;;  %3193 = vmatprep.subr.bf16.mxu0 %v6412_v16  ;;  %v6887_v52 = vadd.f32 %v2682_v23, %v6879_v39 }
 0x395   :  { %v6890_v6 = vadd.f32 %v2684_v17, %v6879_v39 }
 0x396   :  { %3130 = vmatpush1.bf16.msra.mxu1 %v6447_v56  ;;  %3194 = vmatpush1.bf16.msra.mxu0 %v6419_v12  ;;  %v4799_v12 = vpack.i.bf16 %v6895_v19, %v6902_v45 }
 0x397   :  { %3195 = vmatprep.subr.bf16.mxu0 %v6426_v47  ;;  %v4789_v16 = vpack.i.bf16 %v6890_v6, %v6887_v52  ;;  %3131 = vmatprep.subr.bf16.mxu1 %v6454_v22  ;;  %v5096_v47 = vld [vmem:[%s7682_s5 + $0x4] ss:$8 sps:$4 sm:$0xff]  }
 0x399   :  { %4790 = vrot.lane.b32.xlu1 %v4789_v16, %s5139_s0  ;;  %v5116_v16 = vld [vmem:[%s7682_s5 + $0xa4] ss:$8 sps:$4 sm:$0xff]  }
 0x39a   :  { %3132 = vmatpush1.bf16.msra.mxu1 %v6461_v14  ;;  %3196 = vmatpush1.bf16.msra.mxu0 %v6433_v2  ;;  %v5097_v2 = vld [vmem:[%s7682_s5] ss:$8 sps:$4 sm:$0xff]  }
 0x39b   :  { %3133 = vmatprep.subr.bf16.mxu1 %v6468_v32  ;;  %3197 = vmatprep.subr.bf16.mxu0 %v6440_v58  ;;  %v5098_v58 = vld [vmem:[%s7682_s5 + $0x14] ss:$8 sps:$4 sm:$0xff]  }
 0x39d   :  { %4800 = vrot.lane.b32.xlu1 %v4799_v12, %s5139_s0 }
 0x39e   :  { %3134 = vmatpush1.bf16.msra.mxu1 %v6475_v20  ;;  %3198 = vmatpush1.bf16.msra.mxu0 %v6447_v56  ;;  %v5099_v56 = vld [vmem:[%s7682_s5 + $0x10] ss:$8 sps:$4 sm:$0xff]  }
 0x39f   :  { %3135 = vmatprep.subr.bf16.mxu1 %v6482_v35  ;;  %3199 = vmatprep.subr.bf16.mxu0 %v6454_v22  ;;  %v5100_v22 = vld [vmem:[%s7682_s5 + $0x24] ss:$8 sps:$4 sm:$0xff]  }
 0x3a2   :  { %3136 = vmatpush1.bf16.msra.mxu1 %v6489_v11  ;;  %3200 = vmatpush1.bf16.msra.mxu0 %v6461_v14  ;;  %v5101_v14 = vld [vmem:[%s7682_s5 + $0x20] ss:$8 sps:$4 sm:$0xff]  }
 0x3a3   :  { %3137 = vmatprep.subr.bf16.mxu1 %v6496_v26  ;;  %3201 = vmatprep.subr.bf16.mxu0 %v6468_v32  ;;  %v5102_v32 = vld [vmem:[%s7682_s5 + $0x34] ss:$8 sps:$4 sm:$0xff]  }
 0x3a6   :  { %3138 = vmatpush1.bf16.msra.mxu1 %v6503_v43  ;;  %3202 = vmatpush1.bf16.msra.mxu0 %v6475_v20  ;;  %v5103_v20 = vld [vmem:[%s7682_s5 + $0x30] ss:$8 sps:$4 sm:$0xff]  }
 0x3a7   :  { %3139 = vmatprep.subr.bf16.mxu1 %v6510_v0  ;;  %3203 = vmatprep.subr.bf16.mxu0 %v6482_v35  ;;  %v5104_v35 = vld [vmem:[%s7682_s5 + $0x44] ss:$8 sps:$4 sm:$0xff]  }
 0x3aa   :  { %3140 = vmatpush1.bf16.msra.mxu1 %v6519_v49  ;;  %3204 = vmatpush1.bf16.msra.mxu0 %v6489_v11  ;;  %v5105_v11 = vld [vmem:[%s7682_s5 + $0x40] ss:$8 sps:$4 sm:$0xff]  }
 0x3ab   :  { %3141 = vmatprep.subr.bf16.mxu1 %v6527_v30  ;;  %3205 = vmatprep.subr.bf16.mxu0 %v6496_v26  ;;  %v5106_v26 = vld [vmem:[%s7682_s5 + $0x54] ss:$8 sps:$4 sm:$0xff]  }
 0x3ae   :  { %3142 = vmatpush1.bf16.msra.mxu1 %v6535_v24  ;;  %3206 = vmatpush1.bf16.msra.mxu0 %v6503_v43 }
 0x3af   :  { %3207 = vmatprep.subr.bf16.mxu0 %v6510_v0  ;;  %3247 = vmatprep.subr.bf16.mxu1 %v5096_v47  ;;  %v5117_v47 = vld [vmem:[%s7682_s5 + $0xa0] ss:$8 sps:$4 sm:$0xff]  }
 0x3b1   :  { %3144 = vmatmul.mubr.bf16.vlgmr.msra.gmra.mrb[80].mxu1 %v6710_v40 }
 0x3b2   :  { %3208 = vmatpush1.bf16.msra.mxu0 %v6519_v49  ;;  %3248 = vmatpush1.bf16.msra.mxu1 %v5097_v2  ;;  %v5118_v2 = vld [vmem:[%s7682_s5 + $0xb4] ss:$8 sps:$4 sm:$0xff]  }
 0x3b3   :  { %3279 = vmatprep.mubr.bf16.mxu1 %v6773_v54  ;;  %3209 = vmatprep.subr.bf16.mxu0 %v6527_v30  ;;  %v5107_v30 = vld [vmem:[%s7682_s5 + $0x50] ss:$8 sps:$4 sm:$0xff]  }
 0x3b4   :  { %3249 = vmatprep.subr.bf16.mxu1 %v5098_v58 }
 0x3b6   :  { %3210 = vmatpush1.bf16.msra.mxu0 %v6535_v24  ;;  %3250 = vmatpush1.bf16.msra.mxu1 %v5099_v56  ;;  %v5119_v56 = vld [vmem:[%s7682_s5 + $0xb0] ss:$8 sps:$4 sm:$0xff]  }
 0x3b7   :  { %3251 = vmatprep.subr.bf16.mxu1 %v5100_v22  ;;  %v5120_v22 = vld [vmem:[%s7682_s5 + $0xc4] ss:$8 sps:$4 sm:$0xff]  }
 0x3b9   :  { %3212 = vmatmul.mubr.bf16.vlgmr.msra.gmra.mrb[84].mxu0 %v6753_v60  ;;  %v5108_v60 = vld [vmem:[%s7682_s5 + $0x64] ss:$8 sps:$4 sm:$0xff]  }
 0x3ba   :  { %3252 = vmatpush1.bf16.msra.mxu1 %v5101_v14  ;;  %v5121_v14 = vld [vmem:[%s7682_s5 + $0xc0] ss:$8 sps:$4 sm:$0xff]  }
 0x3bb   :  { %3253 = vmatprep.subr.bf16.mxu1 %v5102_v32  ;;  %v5122_v32 = vld [vmem:[%s7682_s5 + $0xd4] ss:$8 sps:$4 sm:$0xff]  }
 0x3be   :  { %3254 = vmatpush1.bf16.msra.mxu1 %v5103_v20  ;;  %v5123_v20 = vld [vmem:[%s7682_s5 + $0xd0] ss:$8 sps:$4 sm:$0xff]  }
 0x3bf   :  { %3255 = vmatprep.subr.bf16.mxu1 %v5104_v35  ;;  %v5124_v35 = vld [vmem:[%s7682_s5 + $0xe4] ss:$8 sps:$4 sm:$0xff]  }
 0x3c2   :  { %3256 = vmatpush1.bf16.msra.mxu1 %v5105_v11  ;;  %v5125_v11 = vld [vmem:[%s7682_s5 + $0xe0] ss:$8 sps:$4 sm:$0xff]  }
 0x3c3   :  { %3257 = vmatprep.subr.bf16.mxu1 %v5106_v26  ;;  %v5126_v26 = vld [vmem:[%s7682_s5 + $0xf4] ss:$8 sps:$4 sm:$0xff]  }
 0x3c4   :  { %v2737_v43 = vpop.f32.mrb[68].mxu1 }
 0x3c5   :  { %v6970_v0 = vpop.f32.mrb[69].mxu1  ;;  %v2738_v37 = vadd.f32 %v2737_v43, %v6842_v33  ;;  %v7068_v43 = vrot.slane %v6832_v46, %v7741_v44 }
 0x3c6   :  { %v2741_v49 = vpop.f32.mrb[70].mxu1  ;;  %3258 = vmatpush1.bf16.msra.mxu1 %v5107_v30 }
 0x3c7   :  { %v6975_v40 = vpop.f32.mrb[71].mxu1  ;;  %3259 = vmatprep.subr.bf16.mxu1 %v5108_v60  ;;  %v2742_v50 = vadd.f32 %v2741_v49, %v6842_v33  ;;  %v2746_v57 = vmax.f32 %v2738_v37, 0.0  ;;  %v2672_v49 = vadd.f32 %v6856_v8, %v7068_v43  ;;  %v2676_v30 = vadd.f32 %v6865_v53, %v7068_v43 }
 0x3c8   :  { %v2586_v46 = vadd.f32 %v6836_v36, %v7068_v43  ;;  %v7088_v8 = vrot.slane %v6852_v10, %v7741_v44  ;;  %v7100_v10 = vrot.slane %v6872_v7, %v7741_v44 }
 0x3c9   :  { %v2748_v15 = vmax.f32 %v2742_v50, 0.0  ;;  %v2750_v5 = vmul.f32 %v2746_v57, %v6862_v38 }
 0x3ca   :  { %3260 = vmatpush1.bf16.msra.mxu1 %v5109_v34  ;;  %v2582_v34 = vadd.f32 %v6827_v63, %v7068_v43  ;;  %v4926_v63 = vld [vmem:[%s7687_s9 + $0x4] ss:$8 sps:$4 sm:$0xff]   ;;  %v2591_v36 = vmax.f32 %v2586_v46, 0.0 }
 0x3cb   :  { %3261 = vmatprep.subr.bf16.mxu1 %v5110_v18  ;;  %v2752_v55 = vmul.f32 %v2748_v15, %v6862_v38  ;;  %v7028_v12 = vadd.f32 %v2750_v5, %v6879_v39  ;;  %v2681_v18 = vmax.f32 %v2676_v30, 0.0  ;;  %3893 = vmatprep.subr.bf16.mxu0 %v4926_v63  ;;  %v4927_v5 = vld [vmem:[%s7687_s9 + $0x10] ss:$8 sps:$4 sm:$0xff]   ;;  %v4935_v63 = vld [vmem:[%s7687_s9 + $0x34] ss:$8 sps:$4 sm:$0xff]  }
 0x3cc   :  { %v2805_v28 = vpop.f32.mrb[72].mxu0  ;;  %v2589_v53 = vmax.f32 %v2582_v34, 0.0 }
 0x3cd   :  { %v2806_v1 = vadd.f32 %v2805_v28, %v6842_v33  ;;  %v6989_v4 = vpop.f32.mrb[73].mxu0  ;;  %v7020_v17 = vadd.f32 %v2752_v55, %v6879_v39 }
 0x3ce   :  { %v2809_v27 = vpop.f32.mrb[74].mxu0  ;;  %3262 = vmatpush1.bf16.msra.mxu1 %v5111_v59 }
 0x3cf   :  { %v2814_v54 = vmax.f32 %v2806_v1, 0.0  ;;  %v2810_v13 = vadd.f32 %v2809_v27, %v6842_v33  ;;  %v6995_v31 = vpop.f32.mrb[75].mxu0  ;;  %3263 = vmatprep.subr.bf16.mxu1 %v5112_v9  ;;  %v4794_v58 = vpack.i.bf16 %v7020_v17, %v7028_v12  ;;  %v2685_v1 = vmul.f32 %v2681_v18, %v7088_v8  ;;  %v4924_v27 = vld [vmem:[%s7687_s9] ss:$8 sps:$4 sm:$0xff]  }
 0x3d0   :  { %3894 = vmatpush1.bf16.msra.mxu0 %v4924_v27  ;;  %v2604_v9 = vmul.f32 %v7088_v8, %v2589_v53 }
 0x3d1   :  { %v2818_v51 = vmul.f32 %v2814_v54, %v6862_v38  ;;  %v2816_v29 = vmax.f32 %v2810_v13, 0.0  ;;  %v2689_v55 = vadd.f32 %v2685_v1, %v7100_v10 }
 0x3d2   :  { %3264 = vmatpush1.bf16.msra.mxu1 %v5113_v21 }
 0x3d3   :  { %v2820_v62 = vmul.f32 %v2816_v29, %v6862_v38  ;;  %3265 = vmatprep.subr.bf16.mxu1 %v5114_v41  ;;  %v7011_v23 = vadd.f32 %v2818_v51, %v6879_v39  ;;  %v4929_v29 = vld [vmem:[%s7687_s9 + $0x14] ss:$8 sps:$4 sm:$0xff]  }
 0x3d4   :  { %3895 = vmatprep.subr.bf16.mxu0 %v4929_v29  ;;  %v4948_v29 = vld [vmem:[%s7687_s9 + $0x80] ss:$8 sps:$4 sm:$0xff]  }
 0x3d5   :  { %v7014_v3 = vadd.f32 %v2820_v62, %v6879_v39  ;;  %3896 = vmatpush1.bf16.msra.mxu0 %v4927_v5  ;;  %v4957_v5 = vld [vmem:[%s7687_s9 + $0xb0] ss:$8 sps:$4 sm:$0xff]  }
 0x3d6   :  { %3266 = vmatpush1.bf16.msra.mxu1 %v5115_v42  ;;  %v2606_v42 = vmul.f32 %v7088_v8, %v2591_v36  ;;  %v4941_v36 = vld [vmem:[%s7687_s9 + $0x54] ss:$8 sps:$4 sm:$0xff]  }
 0x3d7   :  { %v4784_v48 = vpack.i.bf16 %v7014_v3, %v7011_v23  ;;  %3267 = vmatprep.subr.bf16.mxu1 %v5116_v16 }
 0x3d9   :  { %4785 = vrot.lane.b32.xlu0 %v4784_v48, %s5139_s0 }
 0x3da   :  { %3268 = vmatpush1.bf16.msra.mxu1 %v5117_v47 }
 0x3db   :  { %3269 = vmatprep.subr.bf16.mxu1 %v5118_v2 }
 0x3dd   :  { %4795 = vrot.lane.b32.xlu0 %v4794_v58, %s5139_s0 }
 0x3de   :  { %3270 = vmatpush1.bf16.msra.mxu1 %v5119_v56 }
 0x3df   :  { %3271 = vmatprep.subr.bf16.mxu1 %v5120_v22 }
 0x3e2   :  { %3272 = vmatpush1.bf16.msra.mxu1 %v5121_v14 }
 0x3e3   :  { %3273 = vmatprep.subr.bf16.mxu1 %v5122_v32  ;;  %v4932_v32 = vld [vmem:[%s7687_s9 + $0x24] ss:$8 sps:$4 sm:$0xff]  }
 0x3e4   :  { %3897 = vmatprep.subr.bf16.mxu0 %v4932_v32 }
 0x3e6   :  { %3274 = vmatpush1.bf16.msra.mxu1 %v5123_v20  ;;  %v2619_v20 = vadd.f32 %v7100_v10, %v2604_v9  ;;  %v4945_v9 = vld [vmem:[%s7687_s9 + $0x70] ss:$8 sps:$4 sm:$0xff]  }
 0x3e7   :  { %3275 = vmatprep.subr.bf16.mxu1 %v5124_v35 }
 0x3ea   :  { %3276 = vmatpush1.bf16.msra.mxu1 %v5125_v11  ;;  %v4930_v11 = vld [vmem:[%s7687_s9 + $0x20] ss:$8 sps:$4 sm:$0xff]  }
 0x3eb   :  { %3277 = vmatprep.subr.bf16.mxu1 %v5126_v26  ;;  %v2621_v26 = vadd.f32 %v7100_v10, %v2606_v42  ;;  %3898 = vmatpush1.bf16.msra.mxu0 %v4930_v11  ;;  %v4962_v42 = vld [vmem:[%s7687_s9 + $0xc4] ss:$8 sps:$4 sm:$0xff]  }
 0x3ec   :  { %3899 = vmatprep.subr.bf16.mxu0 %v4935_v63 }
 0x3ee   :  { %3278 = vmatpush1.bf16.msra.mxu1 %v6535_v24  ;;  %v2679_v24 = vmax.f32 %v2672_v49, 0.0 }
 0x3f0   :  { %v2683_v37 = vmul.f32 %v2679_v24, %v7088_v8 }
 0x3f1   :  { %3280 = vmatmul.mubr.bf16.vlgmr.msra.gmra.mrb[84].mxu1 %v6769_v61 }
 0x3f2   :  { %v2687_v21 = vadd.f32 %v2683_v37, %v7100_v10  ;;  %v4938_v37 = vld [vmem:[%s7687_s9 + $0x44] ss:$8 sps:$4 sm:$0xff]  }
 0x404   :  { %v7074_v60 = vpop.f32.mrb[72].mxu1 }
 0x405   :  { %v7078_v50 = vpop.f32.mrb[73].mxu1 }
 0x406   :  { %v7080_v61 = vpop.f32.mrb[74].mxu1 }
 0x407   :  { %v7084_v28 = vpop.f32.mrb[75].mxu1 }
 0x40b   :  { %v4791_v59 = vpop.permute.xlu1 %4790 }
 0x40c   :  { %v4793_v15 = vunpack.i.h.bf16 %v4791_v59  ;;  %v4792_v54 = vunpack.i.l.bf16 %v4791_v59  ;;  %v2941_v13 = vpop.f32.mrb[76].mxu0  ;;  %v4939_v59 = vld [vmem:[%s7687_s9 + $0x50] ss:$8 sps:$4 sm:$0xff]  }
 0x40d   :  { %v2942_v57 = vadd.f32 %v2941_v13, %v6842_v33  ;;  %v7104_v51 = vpop.f32.mrb[77].mxu0  ;;  %v4947_v13 = vld [vmem:[%s7687_s9 + $0x74] ss:$8 sps:$4 sm:$0xff]  }
 0x40e   :  { %v2699_v7 = vmax.f32 %v6890_v6, %v4793_v15  ;;  %v2698_v62 = vmax.f32 %v6887_v52, %v4792_v54  ;;  %v2945_v41 = vpop.f32.mrb[78].mxu0  ;;  %v4944_v15 = vld [vmem:[%s7687_s9 + $0x64] ss:$8 sps:$4 sm:$0xff]   ;;  %v4942_v54 = vld [vmem:[%s7687_s9 + $0x60] ss:$8 sps:$4 sm:$0xff]  }
 0x40f   :  { %v2950_v48 = vmax.f32 %v2942_v57, 0.0  ;;  %v2946_v16 = vadd.f32 %v2945_v41, %v6842_v33  ;;  %v7118_v47 = vpop.f32.mrb[79].mxu0  ;;  %v4801_v2 = vpop.permute.xlu1 %4800  ;;  %v4950_v57 = vld [vmem:[%s7687_s9 + $0x84] ss:$8 sps:$4 sm:$0xff]   ;;  %v4959_v41 = vld [vmem:[%s7687_s9 + $0xb4] ss:$8 sps:$4 sm:$0xff]  }
 0x410   :  { %v2701_v58 = vmax.f32 %v2699_v7, %v2689_v55  ;;  %v2700_v56 = vmax.f32 %v2698_v62, %v2687_v21  ;;  %v4803_v22 = vunpack.i.h.bf16 %v4801_v2  ;;  %v4802_v14 = vunpack.i.l.bf16 %v4801_v2  ;;  %v4953_v21 = vld [vmem:[%s7687_s9 + $0x94] ss:$8 sps:$4 sm:$0xff]   ;;  %v4951_v55 = vld [vmem:[%s7687_s9 + $0x90] ss:$8 sps:$4 sm:$0xff]   ;;  %v4956_v7 = vld [vmem:[%s7687_s9 + $0xa4] ss:$8 sps:$4 sm:$0xff]  }
 0x411   :  { %v2954_v6 = vmul.f32 %v2950_v48, %v6862_v38  ;;  %v2952_v52 = vmax.f32 %v2946_v16, 0.0  ;;  %v4954_v62 = vld [vmem:[%s7687_s9 + $0xa0] ss:$8 sps:$4 sm:$0xff]   ;;  %v4965_v16 = vld [vmem:[%s7687_s9 + $0xd4] ss:$8 sps:$4 sm:$0xff]  }
 0x412   :  { %v2702_v35 = vpack.c.bf16 %v2701_v58, %v2700_v56  ;;  %v2631_v30 = vmax.f32 %v6895_v19, %v4803_v22  ;;  %v2630_v34 = vmax.f32 %v6902_v45, %v4802_v14  ;;  %v4933_v19 = vld [vmem:[%s7687_s9 + $0x30] ss:$8 sps:$4 sm:$0xff]   ;;  %v4936_v45 = vld [vmem:[%s7687_s9 + $0x40] ss:$8 sps:$4 sm:$0xff]   ;;  %v4968_v58 = vld [vmem:[%s7687_s9 + $0xe4] ss:$8 sps:$4 sm:$0xff]   ;;  %v2740_v14 = vadd.f32 %v6970_v0, %v7068_v43 }
 0x413   :  { %v2956_v49 = vmul.f32 %v2952_v52, %v6862_v38  ;;  %v7133_v24 = vadd.f32 %v2954_v6, %v6879_v39  ;;  %3900 = vmatpush1.bf16.msra.mxu0 %v4933_v19  ;;  %v4960_v48 = vld [vmem:[%s7687_s9 + $0xc0] ss:$8 sps:$4 sm:$0xff]   ;;  %v4963_v2 = vld [vmem:[%s7687_s9 + $0xd0] ss:$8 sps:$4 sm:$0xff]   ;;  %v2808_v6 = vadd.f32 %v6989_v4, %v7068_v43  ;;  %v2812_v52 = vadd.f32 %v6995_v31, %v7068_v43 }
 0x414   :  { %v2633_v46 = vmax.f32 %v2631_v30, %v2621_v26  ;;  %v2632_v53 = vmax.f32 %v2630_v34, %v2619_v20  ;;  %3901 = vmatprep.subr.bf16.mxu0 %v4938_v37  ;;  %v4966_v56 = vld [vmem:[%s7687_s9 + $0xe0] ss:$8 sps:$4 sm:$0xff]   ;;  %v4969_v4 = vld [vmem:[%s7687_s9 + $0xf0] ss:$8 sps:$4 sm:$0xff]   ;;  %v2744_v31 = vadd.f32 %v6975_v40, %v7068_v43 }
 0x415   :  { %v7136_v18 = vadd.f32 %v2956_v49, %v6879_v39  ;;  %v2815_v11 = vmax.f32 %v2808_v6, 0.0  ;;  %v2817_v26 = vmax.f32 %v2812_v52, 0.0 }
 0x416   :  { %v7152_v27 = vpack.c.bf16 %v2633_v46, %v2632_v53  ;;  %v2747_v46 = vmax.f32 %v2740_v14, 0.0  ;;  %v2749_v37 = vmax.f32 %v2744_v31, 0.0 }
 0x417   :  { %v4804_v1 = vpack.i.bf16 %v7136_v18, %v7133_v24  ;;  %3902 = vmatpush1.bf16.msra.mxu0 %v4936_v45  ;;  %v2819_v19 = vmul.f32 %v2815_v11, %v7088_v8  ;;  %v2821_v45 = vmul.f32 %v2817_v26, %v7088_v8 }
 0x418   :  { %3903 = vmatprep.subr.bf16.mxu0 %v4941_v36 }
 0x419   :  { %4805 = vrot.lane.b32.xlu1 %v4804_v1, %s5139_s0 }
 0x41b   :  { %3904 = vmatpush1.bf16.msra.mxu0 %v4939_v59 }
 0x41c   :  { %3905 = vmatprep.subr.bf16.mxu0 %v4944_v15 }
 0x41d   :  { %3316 = vrot.lane.b32.xlu1 %v2702_v35, %s5139_s0  ;;  %v4971_v35 = vld [vmem:[%s7687_s9 + $0xf4] ss:$8 sps:$4 sm:$0xff]  }
 0x41f   :  { %3906 = vmatpush1.bf16.msra.mxu0 %v4942_v54  ;;  %v2751_v54 = vmul.f32 %v2747_v46, %v7088_v8 }
 0x420   :  { %3907 = vmatprep.subr.bf16.mxu0 %v4947_v13 }
 0x423   :  { %3908 = vmatpush1.bf16.msra.mxu0 %v4945_v9 }
 0x424   :  { %3909 = vmatprep.subr.bf16.mxu0 %v4950_v57 }
 0x427   :  { %3910 = vmatpush1.bf16.msra.mxu0 %v4948_v29 }
 0x428   :  { %3911 = vmatprep.subr.bf16.mxu0 %v4953_v21  ;;  %v2823_v21 = vadd.f32 %v2819_v19, %v7100_v10 }
 0x42b   :  { %3912 = vmatpush1.bf16.msra.mxu0 %v4951_v55  ;;  %v2825_v55 = vadd.f32 %v2821_v45, %v7100_v10 }
 0x42c   :  { %3913 = vmatprep.subr.bf16.mxu0 %v4956_v7 }
 0x42f   :  { %3914 = vmatpush1.bf16.msra.mxu0 %v4954_v62 }
 0x430   :  { %3915 = vmatprep.subr.bf16.mxu0 %v4959_v41 }
 0x433   :  { %3916 = vmatpush1.bf16.msra.mxu0 %v4957_v5  ;;  %v2753_v5 = vmul.f32 %v2749_v37, %v7088_v8 }
 0x434   :  { %3917 = vmatprep.subr.bf16.mxu0 %v4962_v42 }
 0x437   :  { %3918 = vmatpush1.bf16.msra.mxu0 %v4960_v48 }
 0x438   :  { %3919 = vmatprep.subr.bf16.mxu0 %v4965_v16 }
 0x43b   :  { %3920 = vmatpush1.bf16.msra.mxu0 %v4963_v2 }
 0x43c   :  { %3921 = vmatprep.subr.bf16.mxu0 %v4968_v58 }
 0x43f   :  { %3922 = vmatpush1.bf16.msra.mxu0 %v4966_v56 }
 0x440   :  { %3923 = vmatprep.subr.bf16.mxu0 %v4971_v35  ;;  %v2757_v35 = vadd.f32 %v2753_v5, %v7100_v10 }
 0x443   :  { %3924 = vmatpush1.bf16.msra.mxu0 %v4969_v4 }
 0x444   :  { %v3009_v22 = vpop.f32.mrb[76].mxu1 }
 0x445   :  { %v3010_v32 = vadd.f32 %v3009_v22, %v6842_v33  ;;  %v7223_v20 = vpop.f32.mrb[77].mxu1 }
 0x446   :  { %v3013_v49 = vpop.f32.mrb[78].mxu1 }
 0x447   :  { %v3018_v30 = vmax.f32 %v3010_v32, 0.0  ;;  %v3014_v0 = vadd.f32 %v3013_v49, %v6842_v33  ;;  %v7234_v34 = vpop.f32.mrb[79].mxu1 }
 0x449   :  { %v3022_v53 = vmul.f32 %v3018_v30, %v6862_v38  ;;  %v3020_v63 = vmax.f32 %v3014_v0, 0.0 }
 0x44b   :  { %v3024_v1 = vmul.f32 %v3020_v63, %v6862_v38  ;;  %v4786_v36 = vpop.permute.xlu0 %4785  ;;  %v7242_v13 = vadd.f32 %v3022_v53, %v6879_v39 }
 0x44c   :  { %v4788_v40 = vunpack.i.h.bf16 %v4786_v36  ;;  %v4787_v59 = vunpack.i.l.bf16 %v4786_v36  ;;  %v3077_v15 = vpop.f32.mrb[80].mxu0 }
 0x44d   :  { %v7245_v9 = vadd.f32 %v3024_v1, %v6879_v39  ;;  %v3078_v57 = vadd.f32 %v3077_v15, %v6842_v33  ;;  %v7248_v29 = vpop.f32.mrb[81].mxu0 }
 0x44e   :  { %v2835_v7 = vmax.f32 %v7014_v3, %v4788_v40  ;;  %v2834_v62 = vmax.f32 %v7011_v23, %v4787_v59  ;;  %v3081_v41 = vpop.f32.mrb[82].mxu0  ;;  %v2755_v23 = vadd.f32 %v2751_v54, %v7100_v10 }
 0x44f   :  { %v3086_v42 = vmax.f32 %v3078_v57, 0.0  ;;  %v3082_v48 = vadd.f32 %v3081_v41, %v6842_v33  ;;  %v7256_v16 = vpop.f32.mrb[83].mxu0  ;;  %v4796_v2 = vpop.permute.xlu0 %4795  ;;  %v4819_v58 = vpack.i.bf16 %v7245_v9, %v7242_v13 }
 0x450   :  { %v2837_v56 = vmax.f32 %v2835_v7, %v2825_v55  ;;  %v2836_v6 = vmax.f32 %v2834_v62, %v2823_v21  ;;  %v4798_v3 = vunpack.i.h.bf16 %v4796_v2  ;;  %v4797_v14 = vunpack.i.l.bf16 %v4796_v2 }
 0x451   :  { %v3090_v52 = vmul.f32 %v3086_v42, %v6862_v38  ;;  %v3088_v22 = vmax.f32 %v3082_v48, 0.0  ;;  %4820 = vrot.lane.b32.xlu1 %v4819_v58, %s5139_s0  ;;  %v2878_v55 = vadd.f32 %v7080_v61, %v6842_v33  ;;  %v2874_v48 = vadd.f32 %v7074_v60, %v6842_v33 }
 0x452   :  { %v2838_v32 = vpack.c.bf16 %v2837_v56, %v2836_v6  ;;  %v2767_v26 = vmax.f32 %v7020_v17, %v4798_v3  ;;  %v2766_v49 = vmax.f32 %v7028_v12, %v4797_v14  ;;  %v2944_v17 = vadd.f32 %v7104_v51, %v7068_v43  ;;  %v4974_v51 = vld [vmem:[%s7687_s9 + $0x104] ss:$8 sps:$4 sm:$0xff]  }
 0x453   :  { %v3092_v11 = vmul.f32 %v3088_v22, %v6862_v38  ;;  %v7269_v4 = vadd.f32 %v3090_v52, %v6879_v39  ;;  %v2948_v12 = vadd.f32 %v7118_v47, %v7068_v43  ;;  %3936 = vmatprep.subr.bf16.mxu0 %v4974_v51  ;;  %v2884_v60 = vmax.f32 %v2878_v55, 0.0 }
 0x454   :  { %3319 = vrot.lane.b32.xlu0 %v2838_v32, %s5139_s0  ;;  %v2769_v30 = vmax.f32 %v2767_v26, %v2757_v35  ;;  %v2768_v0 = vmax.f32 %v2766_v49, %v2755_v23  ;;  %v2951_v37 = vmax.f32 %v2944_v17, 0.0  ;;  %v3016_v51 = vadd.f32 %v7234_v34, %v7068_v43 }
 0x455   :  { %v7272_v31 = vadd.f32 %v3092_v11, %v6879_v39  ;;  %v2953_v1 = vmax.f32 %v2948_v12, 0.0  ;;  %v3080_v55 = vadd.f32 %v7248_v29, %v7068_v43 }
 0x456   :  { %v7276_v53 = vpack.c.bf16 %v2769_v30, %v2768_v0  ;;  %v2955_v57 = vmul.f32 %v2951_v37, %v7088_v8  ;;  %v2882_v30 = vmax.f32 %v2874_v48, 0.0 }
 0x457   :  { %v4809_v46 = vpack.i.bf16 %v7272_v31, %v7269_v4  ;;  %v2957_v21 = vmul.f32 %v2953_v1, %v7088_v8  ;;  %v3087_v34 = vmax.f32 %v3080_v55, 0.0 }
 0x458   :  { %v2959_v61 = vadd.f32 %v2955_v57, %v7100_v10  ;;  %v2886_v12 = vmul.f32 %v2882_v30, %v6862_v38 }
 0x459   :  { %4810 = vrot.lane.b32.xlu0 %v4809_v46, %s5139_s0  ;;  %v2961_v52 = vadd.f32 %v2957_v21, %v7100_v10 }
 0x484   :  { %v3145_v63 = vpop.f32.mrb[80].mxu1 }
 0x485   :  { %v3146_v19 = vadd.f32 %v3145_v63, %v6842_v33  ;;  %v7284_v45 = vpop.f32.mrb[81].mxu1 }
 0x486   :  { %v3149_v36 = vpop.f32.mrb[82].mxu1 }
 0x487   :  { %v3154_v40 = vmax.f32 %v3146_v19, 0.0  ;;  %v3150_v59 = vadd.f32 %v3149_v36, %v6842_v33  ;;  %v7287_v15 = vpop.f32.mrb[83].mxu1  ;;  %v7337_v36 = vadd.f32 %v2886_v12, %v6879_v39 }
 0x489   :  { %v3158_v54 = vmul.f32 %v3154_v40, %v6862_v38  ;;  %v3156_v47 = vmax.f32 %v3150_v59, 0.0  ;;  %v3012_v59 = vadd.f32 %v7223_v20, %v7068_v43 }
 0x48b   :  { %v3160_v7 = vmul.f32 %v3156_v47, %v6862_v38  ;;  %v4806_v62 = vpop.permute.xlu1 %4805  ;;  %v7301_v2 = vadd.f32 %v3158_v54, %v6879_v39  ;;  %v3019_v54 = vmax.f32 %v3012_v59, 0.0  ;;  %v3021_v47 = vmax.f32 %v3016_v51, 0.0  ;;  %v5020_v51 = vld [vmem:[%s7687_s9 + $0x200] ss:$8 sps:$4 sm:$0xff]  }
 0x48c   :  { %v4808_v41 = vunpack.i.h.bf16 %v4806_v62  ;;  %v4807_v5 = vunpack.i.l.bf16 %v4806_v62  ;;  %v3213_v42 = vpop.f32.mrb[84].mxu0  ;;  %v3084_v62 = vadd.f32 %v7256_v16, %v7068_v43 }
 0x48d   :  { %v7304_v58 = vadd.f32 %v3160_v7, %v6879_v39  ;;  %v3214_v56 = vadd.f32 %v3213_v42, %v6842_v33  ;;  %v7307_v6 = vpop.f32.mrb[85].mxu0  ;;  %v3023_v21 = vmul.f32 %v3019_v54, %v7088_v8  ;;  %v3025_v7 = vmul.f32 %v3021_v47, %v7088_v8  ;;  %v5022_v54 = vld [vmem:[%s7687_s9 + $0x204] ss:$8 sps:$4 sm:$0xff]  }
 0x48e   :  { %v2971_v22 = vmax.f32 %v7136_v18, %v4808_v41  ;;  %v2970_v3 = vmax.f32 %v7133_v24, %v4807_v5  ;;  %v3217_v14 = vpop.f32.mrb[86].mxu0  ;;  %v2888_v24 = vmul.f32 %v2884_v60, %v6862_v38  ;;  %v4972_v60 = vld [vmem:[%s7687_s9 + $0x100] ss:$8 sps:$4 sm:$0xff]   ;;  %3979 = vmatprep.subr.bf16.mxu1 %v5022_v54 }
 0x48f   :  { %v3222_v23 = vmax.f32 %v3214_v56, 0.0  ;;  %v3218_v32 = vadd.f32 %v3217_v14, %v6842_v33  ;;  %v7314_v35 = vpop.f32.mrb[87].mxu0  ;;  %v4829_v11 = vpack.i.bf16 %v7304_v58, %v7301_v2  ;;  %v3317_v57 = vpop.permute.xlu1 %3316  ;;  %v3027_v48 = vadd.f32 %v3023_v21, %v7100_v10  ;;  %v5025_v21 = vld [vmem:[%s7687_s9 + $0x214] ss:$8 sps:$4 sm:$0xff]   ;;  %3980 = vmatpush1.bf16.msra.mxu1 %v5020_v51  ;;  %v5002_v54 = vld [vmem:[%s7687_s9 + $0x1a0] ss:$8 sps:$4 sm:$0xff]  }
 0x490   :  { %v2973_v26 = vmax.f32 %v2971_v22, %v2961_v52  ;;  %v2972_v49 = vmax.f32 %v2970_v3, %v2959_v61  ;;  %v7332_v37 = vadd.f32 %v2888_v24, %v6879_v39  ;;  %v3029_v52 = vadd.f32 %v3025_v7, %v7100_v10  ;;  %3981 = vmatprep.subr.bf16.mxu1 %v5025_v21  ;;  %v5049_v51 = vld [vmem:[%s7687_s9 + $0x294] ss:$8 sps:$4 sm:$0xff]   ;;  %v5047_v21 = vld [vmem:[%s7687_s9 + $0x290] ss:$8 sps:$4 sm:$0xff]  }
 0x491   :  { %v3226_v0 = vmul.f32 %v3222_v23, %v6862_v38  ;;  %v3224_v46 = vmax.f32 %v3218_v32, 0.0  ;;  %4830 = vrot.lane.b32.xlu1 %v4829_v11, %s5139_s0  ;;  %v3089_v22 = vmax.f32 %v3084_v62, 0.0 }
 0x492   :  { %v7320_v18 = vpack.c.bf16 %v2973_v26, %v2972_v49  ;;  %v4824_v40 = vpack.i.bf16 %v7332_v37, %v7337_v36 }
 0x493   :  { %v3228_v17 = vmul.f32 %v3224_v46, %v6862_v38  ;;  %v7326_v63 = vadd.f32 %v3226_v0, %v6879_v39  ;;  %v3091_v0 = vmul.f32 %v3087_v34, %v7088_v8  ;;  %v3093_v24 = vmul.f32 %v3089_v22, %v7088_v8  ;;  %v4981_v34 = vld [vmem:[%s7687_s9 + $0x130] ss:$8 sps:$4 sm:$0xff]   ;;  %v5031_v22 = vld [vmem:[%s7687_s9 + $0x234] ss:$8 sps:$4 sm:$0xff]  }
 0x495   :  { %v7329_v19 = vadd.f32 %v3228_v17, %v6879_v39  ;;  %v3095_v47 = vadd.f32 %v3091_v0, %v7100_v10  ;;  %v3097_v55 = vadd.f32 %v3093_v24, %v7100_v10  ;;  %v4998_v0 = vld [vmem:[%s7687_s9 + $0x184] ss:$8 sps:$4 sm:$0xff]   ;;  %v4996_v24 = vld [vmem:[%s7687_s9 + $0x180] ss:$8 sps:$4 sm:$0xff]  }
 0x497   :  { %v4814_v1 = vpack.i.bf16 %v7329_v19, %v7326_v63 }
 0x499   :  { %4815 = vrot.lane.b32.xlu0 %v4814_v1, %s5139_s0  ;;  %v4980_v1 = vld [vmem:[%s7687_s9 + $0x124] ss:$8 sps:$4 sm:$0xff]  }
 0x49d   :  { %4825 = vrot.lane.b32.xlu0 %v4824_v40, %s5139_s0 }
 0x4c3   :  { %v4821_v41 = vpop.permute.xlu1 %4820 }
 0x4c4   :  { %v4823_v5 = vunpack.i.h.bf16 %v4821_v41  ;;  %v4822_v42 = vunpack.i.l.bf16 %v4821_v41  ;;  %v3281_v20 = vpop.f32.mrb[84].mxu1  ;;  %v4978_v41 = vld [vmem:[%s7687_s9 + $0x120] ss:$8 sps:$4 sm:$0xff]  }
 0x4c5   :  { %v3282_v56 = vadd.f32 %v3281_v20, %v6842_v33  ;;  %v7355_v61 = vpop.f32.mrb[85].mxu1  ;;  %v5028_v20 = vld [vmem:[%s7687_s9 + $0x224] ss:$8 sps:$4 sm:$0xff]  }
 0x4c6   :  { %v3039_v29 = vmax.f32 %v7245_v9, %v4823_v5  ;;  %v3038_v3 = vmax.f32 %v7242_v13, %v4822_v42  ;;  %v3285_v14 = vpop.f32.mrb[86].mxu1  ;;  %v3320_v16 = vpop.permute.xlu0 %3319  ;;  %v4977_v9 = vld [vmem:[%s7687_s9 + $0x114] ss:$8 sps:$4 sm:$0xff]   ;;  %v3332_v13 = vsel %vm283_vm2, %v7152_v27, %v3317_v57 }
 0x4c7   :  { %v3290_v23 = vmax.f32 %v3282_v56, 0.0  ;;  %v3286_v32 = vadd.f32 %v3285_v14, %v6842_v33  ;;  %v7364_v11 = vpop.f32.mrb[87].mxu1  ;;  %v3336_v26 = vsel %vm283_vm2, %v7276_v53, %v3320_v16  ;;  %v4975_v53 = vld [vmem:[%s7687_s9 + $0x110] ss:$8 sps:$4 sm:$0xff]   ;;  %v4983_v5 = vld [vmem:[%s7687_s9 + $0x134] ss:$8 sps:$4 sm:$0xff]  }
 0x4c8   :  { %v3041_v49 = vmax.f32 %v3039_v29, %v3029_v52  ;;  %v3040_v30 = vmax.f32 %v3038_v3, %v3027_v48  ;;  %3925 = vmatprep.mubr.bf16.mxu0 %v3336_v26  ;;  %v4986_v56 = vld [vmem:[%s7687_s9 + $0x144] ss:$8 sps:$4 sm:$0xff]   ;;  %v5026_v52 = vld [vmem:[%s7687_s9 + $0x220] ss:$8 sps:$4 sm:$0xff]   ;;  %v4989_v3 = vld [vmem:[%s7687_s9 + $0x154] ss:$8 sps:$4 sm:$0xff]  }
 0x4c9   :  { %v3294_v46 = vmul.f32 %v3290_v23, %v6862_v38  ;;  %v3292_v33 = vmax.f32 %v3286_v32, 0.0  ;;  %3926 = vmatmul.mubr.bf16.vlgmr.msra.gmra.mrb[88].mxu0 %v3332_v13  ;;  %v4984_v29 = vld [vmem:[%s7687_s9 + $0x140] ss:$8 sps:$4 sm:$0xff]   ;;  %v5029_v14 = vld [vmem:[%s7687_s9 + $0x230] ss:$8 sps:$4 sm:$0xff]  }
 0x4ca   :  { %3937 = vmatpush1.bf16.msra.mxu0 %v4972_v60  ;;  %v7379_v17 = vpack.c.bf16 %v3041_v49, %v3040_v30  ;;  %v4987_v16 = vld [vmem:[%s7687_s9 + $0x150] ss:$8 sps:$4 sm:$0xff]   ;;  %v4992_v60 = vld [vmem:[%s7687_s9 + $0x164] ss:$8 sps:$4 sm:$0xff]   ;;  %v5032_v23 = vld [vmem:[%s7687_s9 + $0x240] ss:$8 sps:$4 sm:$0xff]  }
 0x4cb   :  { %v3296_v27 = vmul.f32 %v3292_v33, %v6862_v38  ;;  %v4811_v12 = vpop.permute.xlu0 %4810  ;;  %3938 = vmatprep.subr.bf16.mxu0 %v4977_v9  ;;  %v7393_v38 = vadd.f32 %v3294_v46, %v6879_v39  ;;  %v5037_v32 = vld [vmem:[%s7687_s9 + $0x254] ss:$8 sps:$4 sm:$0xff]   ;;  %v4990_v26 = vld [vmem:[%s7687_s9 + $0x160] ss:$8 sps:$4 sm:$0xff]   ;;  %v5035_v13 = vld [vmem:[%s7687_s9 + $0x250] ss:$8 sps:$4 sm:$0xff]  }
 0x4cc   :  { %v4813_v40 = vunpack.i.h.bf16 %v4811_v12  ;;  %v4812_v59 = vunpack.i.l.bf16 %v4811_v12  ;;  %v4995_v9 = vld [vmem:[%s7687_s9 + $0x174] ss:$8 sps:$4 sm:$0xff]   ;;  %v5040_v49 = vld [vmem:[%s7687_s9 + $0x264] ss:$8 sps:$4 sm:$0xff]   ;;  %v4993_v30 = vld [vmem:[%s7687_s9 + $0x170] ss:$8 sps:$4 sm:$0xff]  }
 0x4cd   :  { %v7396_v57 = vadd.f32 %v3296_v27, %v6879_v39  ;;  %v5038_v46 = vld [vmem:[%s7687_s9 + $0x260] ss:$8 sps:$4 sm:$0xff]   ;;  %v5043_v33 = vld [vmem:[%s7687_s9 + $0x274] ss:$8 sps:$4 sm:$0xff]   ;;  %v5041_v27 = vld [vmem:[%s7687_s9 + $0x270] ss:$8 sps:$4 sm:$0xff]  }
 0x4ce   :  { %v3107_v7 = vmax.f32 %v7272_v31, %v4813_v40  ;;  %v3106_v62 = vmax.f32 %v7269_v4, %v4812_v59  ;;  %3939 = vmatpush1.bf16.msra.mxu0 %v4975_v53  ;;  %v5023_v31 = vld [vmem:[%s7687_s9 + $0x210] ss:$8 sps:$4 sm:$0xff]   ;;  %v5001_v53 = vld [vmem:[%s7687_s9 + $0x194] ss:$8 sps:$4 sm:$0xff]   ;;  %v5046_v12 = vld [vmem:[%s7687_s9 + $0x284] ss:$8 sps:$4 sm:$0xff]  }
 0x4cf   :  { %v4834_v39 = vpack.i.bf16 %v7396_v57, %v7393_v38  ;;  %3940 = vmatprep.subr.bf16.mxu0 %v4980_v1  ;;  %3982 = vmatpush1.bf16.msra.mxu1 %v5023_v31  ;;  %v4999_v1 = vld [vmem:[%s7687_s9 + $0x190] ss:$8 sps:$4 sm:$0xff]   ;;  %v5004_v40 = vld [vmem:[%s7687_s9 + $0x1a4] ss:$8 sps:$4 sm:$0xff]   ;;  %v5044_v59 = vld [vmem:[%s7687_s9 + $0x280] ss:$8 sps:$4 sm:$0xff]  }
 0x4d0   :  { %v3109_v4 = vmax.f32 %v3107_v7, %v3097_v55  ;;  %v3108_v42 = vmax.f32 %v3106_v62, %v3095_v47  ;;  %3983 = vmatprep.subr.bf16.mxu1 %v5028_v20  ;;  %v5007_v47 = vld [vmem:[%s7687_s9 + $0x1b4] ss:$8 sps:$4 sm:$0xff]   ;;  %v5052_v55 = vld [vmem:[%s7687_s9 + $0x2a4] ss:$8 sps:$4 sm:$0xff]   ;;  %v5005_v7 = vld [vmem:[%s7687_s9 + $0x1b0] ss:$8 sps:$4 sm:$0xff]   ;;  %v3152_v20 = vadd.f32 %v7287_v15, %v7068_v43 }
 0x4d1   :  { %4835 = vrot.lane.b32.xlu0 %v4834_v39, %s5139_s0  ;;  %v5010_v62 = vld [vmem:[%s7687_s9 + $0x1c4] ss:$8 sps:$4 sm:$0xff]   ;;  %v5055_v39 = vld [vmem:[%s7687_s9 + $0x2b4] ss:$8 sps:$4 sm:$0xff]  }
 0x4d2   :  { %v3110_v48 = vpack.c.bf16 %v3109_v4, %v3108_v42  ;;  %3941 = vmatpush1.bf16.msra.mxu0 %v4978_v41  ;;  %v5050_v41 = vld [vmem:[%s7687_s9 + $0x2a0] ss:$8 sps:$4 sm:$0xff]   ;;  %v5013_v31 = vld [vmem:[%s7687_s9 + $0x1d4] ss:$8 sps:$4 sm:$0xff]   ;;  %v5053_v4 = vld [vmem:[%s7687_s9 + $0x2b0] ss:$8 sps:$4 sm:$0xff]   ;;  %v3148_v42 = vadd.f32 %v7284_v45, %v7068_v43 }
 0x4d3   :  { %3942 = vmatprep.subr.bf16.mxu0 %v4983_v5  ;;  %3984 = vmatpush1.bf16.msra.mxu1 %v5026_v52  ;;  %v5008_v5 = vld [vmem:[%s7687_s9 + $0x1c0] ss:$8 sps:$4 sm:$0xff]   ;;  %v3157_v52 = vmax.f32 %v3152_v20, 0.0  ;;  %v5019_v15 = vld [vmem:[%s7687_s9 + $0x1f4] ss:$8 sps:$4 sm:$0xff]  }
 0x4d4   :  { %3325 = vrot.lane.b32.xlu1 %v3110_v48, %s5139_s0  ;;  %3985 = vmatprep.subr.bf16.mxu1 %v5031_v22  ;;  %v5011_v48 = vld [vmem:[%s7687_s9 + $0x1d0] ss:$8 sps:$4 sm:$0xff]   ;;  %v5014_v45 = vld [vmem:[%s7687_s9 + $0x1e0] ss:$8 sps:$4 sm:$0xff]  }
 0x4d5   :  { %3322 = vrot.lane.b32.xlu0 %v7320_v18, %s5139_s0  ;;  %v5034_v18 = vld [vmem:[%s7687_s9 + $0x244] ss:$8 sps:$4 sm:$0xff]  }
 0x4d6   :  { %3943 = vmatpush1.bf16.msra.mxu0 %v4981_v34  ;;  %v5016_v34 = vld [vmem:[%s7687_s9 + $0x1e4] ss:$8 sps:$4 sm:$0xff]  }
 0x4d7   :  { %3944 = vmatprep.subr.bf16.mxu0 %v4986_v56  ;;  %3986 = vmatpush1.bf16.msra.mxu1 %v5029_v14  ;;  %v3155_v56 = vmax.f32 %v3148_v42, 0.0  ;;  %v3220_v14 = vadd.f32 %v7314_v35, %v7068_v43 }
 0x4d8   :  { %3987 = vmatprep.subr.bf16.mxu1 %v5034_v18  ;;  %v5017_v18 = vld [vmem:[%s7687_s9 + $0x1f0] ss:$8 sps:$4 sm:$0xff]  }
 0x4d9   :  { %v3159_v22 = vmul.f32 %v3155_v56, %v7088_v8 }
 0x4da   :  { %3945 = vmatpush1.bf16.msra.mxu0 %v4984_v29  ;;  %v3161_v29 = vmul.f32 %v3157_v52, %v7088_v8 }
 0x4db   :  { %3946 = vmatprep.subr.bf16.mxu0 %v4989_v3  ;;  %3988 = vmatpush1.bf16.msra.mxu1 %v5032_v23  ;;  %v3216_v3 = vadd.f32 %v7307_v6, %v7068_v43  ;;  %v3163_v6 = vadd.f32 %v3159_v22, %v7100_v10 }
 0x4dc   :  { %3989 = vmatprep.subr.bf16.mxu1 %v5037_v32  ;;  %v2876_v32 = vadd.f32 %v7078_v50, %v7068_v43 }
 0x4dd   :  { %v3223_v35 = vmax.f32 %v3216_v3, 0.0 }
 0x4de   :  { %3947 = vmatpush1.bf16.msra.mxu0 %v4987_v16 }
 0x4df   :  { %3948 = vmatprep.subr.bf16.mxu0 %v4992_v60  ;;  %3990 = vmatpush1.bf16.msra.mxu1 %v5035_v13  ;;  %v3225_v13 = vmax.f32 %v3220_v14, 0.0  ;;  %v3227_v50 = vmul.f32 %v3223_v35, %v7088_v8  ;;  %v5063_v35 = vld [vmem:[%s7688_s11 + $0x18] sm:$0xff]  }
 0x4e0   :  { %3991 = vmatprep.subr.bf16.mxu1 %v5040_v49 }
 0x4e2   :  { %3949 = vmatpush1.bf16.msra.mxu0 %v4990_v26  ;;  %v2880_v26 = vadd.f32 %v7084_v28, %v7068_v43 }
 0x4e3   :  { %3950 = vmatprep.subr.bf16.mxu0 %v4995_v9  ;;  %3992 = vmatpush1.bf16.msra.mxu1 %v5038_v46  ;;  %v3165_v9 = vadd.f32 %v3161_v29, %v7100_v10 }
 0x4e4   :  { %3993 = vmatprep.subr.bf16.mxu1 %v5043_v33  ;;  %v2883_v33 = vmax.f32 %v2876_v32, 0.0  ;;  %v5059_v32 = vld [vmem:[%s7688_s11 + $0x8] sm:$0xff]  }
 0x4e6   :  { %3951 = vmatpush1.bf16.msra.mxu0 %v4993_v30 }
 0x4e7   :  { %3952 = vmatprep.subr.bf16.mxu0 %v4998_v0  ;;  %3994 = vmatpush1.bf16.msra.mxu1 %v5041_v27 }
 0x4e8   :  { %3995 = vmatprep.subr.bf16.mxu1 %v5046_v12 }
 0x4ea   :  { %3953 = vmatpush1.bf16.msra.mxu0 %v4996_v24  ;;  %v2885_v24 = vmax.f32 %v2880_v26, 0.0  ;;  %v5060_v26 = vld [vmem:[%s7688_s11 + $0x50] sm:$0xff]  }
 0x4eb   :  { %3954 = vmatprep.subr.bf16.mxu0 %v5001_v53  ;;  %3996 = vmatpush1.bf16.msra.mxu1 %v5044_v59  ;;  %v3229_v53 = vmul.f32 %v3225_v13, %v7088_v8  ;;  %v5064_v13 = vld [vmem:[%s7688_s11 + $0x60] sm:$0xff]  }
 0x4ec   :  { %3997 = vmatprep.subr.bf16.mxu1 %v5049_v51  ;;  %v2889_v59 = vmul.f32 %v2885_v24, %v7088_v8  ;;  %v5070_v24 = vld [vmem:[%s7688_s11 + $0x78] sm:$0xff]  }
 0x4ee   :  { %3955 = vmatpush1.bf16.msra.mxu0 %v4999_v1 }
 0x4ef   :  { %3956 = vmatprep.subr.bf16.mxu0 %v5004_v40  ;;  %3998 = vmatpush1.bf16.msra.mxu1 %v5047_v21  ;;  %v2887_v40 = vmul.f32 %v2883_v33, %v7088_v8  ;;  %v5069_v33 = vld [vmem:[%s7688_s11 + $0x30] sm:$0xff]  }
 0x4f0   :  { %3999 = vmatprep.subr.bf16.mxu1 %v5052_v55 }
 0x4f2   :  { %3957 = vmatpush1.bf16.msra.mxu0 %v5002_v54 }
 0x4f3   :  { %3958 = vmatprep.subr.bf16.mxu0 %v5007_v47  ;;  %4000 = vmatpush1.bf16.msra.mxu1 %v5050_v41  ;;  %v2891_v41 = vadd.f32 %v2887_v40, %v7100_v10  ;;  %v3438_v40 = vld [vmem:[%s7690_s10] sm:$0x3] }
 0x4f4   :  { %4001 = vmatprep.subr.bf16.mxu1 %v5055_v39  ;;  %v2893_v39 = vadd.f32 %v2889_v59, %v7100_v10  ;;  %v3443_v59 = vrot.slane %v3438_v40, %v7740_v25 }
 0x4f6   :  { %3959 = vmatpush1.bf16.msra.mxu0 %v5005_v7 }
 0x4f7   :  { %3960 = vmatprep.subr.bf16.mxu0 %v5010_v62  ;;  %4002 = vmatpush1.bf16.msra.mxu1 %v5053_v4 }
 0x4fa   :  { %3961 = vmatpush1.bf16.msra.mxu0 %v5008_v5 }
 0x4fb   :  { %3962 = vmatprep.subr.bf16.mxu0 %v5013_v31 }
 0x4fe   :  { %3963 = vmatpush1.bf16.msra.mxu0 %v5011_v48  ;;  %v3288_v48 = vadd.f32 %v7364_v11, %v7068_v43 }
 0x4ff   :  { %3964 = vmatprep.subr.bf16.mxu0 %v5016_v34 }
 0x500   :  { %v3293_v56 = vmax.f32 %v3288_v48, 0.0  ;;  %v5073_v48 = vld [vmem:[%s7689_s13 + $0x8] sm:$0xff]  }
 0x502   :  { %3965 = vmatpush1.bf16.msra.mxu0 %v5014_v45 }
 0x503   :  { %v4831_v16 = vpop.permute.xlu1 %4830  ;;  %3966 = vmatprep.subr.bf16.mxu0 %v5019_v15 }
 0x504   :  { %v4833_v60 = vunpack.i.h.bf16 %v4831_v16  ;;  %v4832_v23 = vunpack.i.l.bf16 %v4831_v16 }
 0x506   :  { %v3175_v49 = vmax.f32 %v7304_v58, %v4833_v60  ;;  %v3174_v30 = vmax.f32 %v7301_v2, %v4832_v23  ;;  %3967 = vmatpush1.bf16.msra.mxu0 %v5017_v18  ;;  %v3231_v58 = vadd.f32 %v3227_v50, %v7100_v10  ;;  %v3233_v2 = vadd.f32 %v3229_v53, %v7100_v10  ;;  %v5071_v50 = vld [vmem:[%s7688_s11 + $0x38] sm:$0xff]  }
 0x507   :  { %v5140_v53 = vmov 0.0  }
 0x508   :  { %v3177_v0 = vmax.f32 %v3175_v49, %v3165_v9  ;;  %v3176_v46 = vmax.f32 %v3174_v30, %v3163_v6  ;;  %v5061_v6 = vld [vmem:[%s7688_s11 + $0x10] sm:$0xff]   ;;  %v5062_v9 = vld [vmem:[%s7688_s11 + $0x58] sm:$0xff]   ;;  %v5065_v49 = vld [vmem:[%s7688_s11 + $0x20] sm:$0xff]  }
 0x509   :  { %v5066_v30 = vld [vmem:[%s7688_s11 + $0x68] sm:$0xff]  }
 0x50a   :  { %v3178_v28 = vpack.c.bf16 %v3177_v0, %v3176_v46  ;;  %v5067_v0 = vld [vmem:[%s7688_s11 + $0x28] sm:$0xff]   ;;  %v5068_v46 = vld [vmem:[%s7688_s11 + $0x70] sm:$0xff]  }
 0x50b   :  { %v4816_v27 = vpop.permute.xlu0 %4815 }
 0x50c   :  { %v4818_v12 = vunpack.i.h.bf16 %v4816_v27  ;;  %v4817_v1 = vunpack.i.l.bf16 %v4816_v27 }
 0x50e   :  { %v3243_v51 = vmax.f32 %v7329_v19, %v4818_v12  ;;  %v3242_v54 = vmax.f32 %v7326_v63, %v4817_v1  ;;  %v3284_v63 = vadd.f32 %v7355_v61, %v7068_v43 }
 0x50f   :  { %v4826_v47 = vpop.permute.xlu0 %4825 }
 0x510   :  { %v3245_v21 = vmax.f32 %v3243_v51, %v3233_v2  ;;  %v3244_v55 = vmax.f32 %v3242_v54, %v3231_v58  ;;  %v4828_v7 = vunpack.i.h.bf16 %v4826_v47  ;;  %v4827_v62 = vunpack.i.l.bf16 %v4826_v47 }
 0x511   :  { %v3291_v34 = vmax.f32 %v3284_v63, 0.0  ;;  %v3447_v58 = vrot.slane %v3438_v40, %v7741_v44  ;;  %v5072_v44 = vld [vmem:[%s7689_s13] sm:$0xff]  }
 0x512   :  { %v2903_v5 = vmax.f32 %v7332_v37, %v4828_v7  ;;  %v2902_v31 = vmax.f32 %v7337_v36, %v4827_v62  ;;  %v3246_v4 = vpack.c.bf16 %v3245_v21, %v3244_v55  ;;  %v3297_v37 = vmul.f32 %v3293_v56, %v7088_v8  ;;  %v5075_v56 = vld [vmem:[%s7689_s13 + $0x18] sm:$0xff]  }
 0x513   :  { %v3295_v52 = vmul.f32 %v3291_v34, %v7088_v8  ;;  %v5074_v34 = vld [vmem:[%s7689_s13 + $0x10] sm:$0xff]  }
 0x514   :  { %v2905_v42 = vmax.f32 %v2903_v5, %v2893_v39  ;;  %v2904_v20 = vmax.f32 %v2902_v31, %v2891_v41  ;;  %3328 = vrot.lane.b32.xlu1 %v3246_v4, %s5139_s0  ;;  %v3301_v29 = vadd.f32 %v3297_v37, %v7100_v10  ;;  %v4475_v37 = vld [vmem:[%s7691_s12] ss:$0 sm:$0xff] }
 0x515   :  { %v3299_v22 = vadd.f32 %v3295_v52, %v7100_v10 }
 0x516   :  { %v2906_v19 = vpack.c.bf16 %v2905_v42, %v2904_v20 }
 0x543   :  { %v4836_v45 = vpop.permute.xlu0 %4835 }
 0x544   :  { %v4838_v36 = vunpack.i.h.bf16 %v4836_v45  ;;  %v4837_v15 = vunpack.i.l.bf16 %v4836_v45 }
 0x546   :  { %v3311_v3 = vmax.f32 %v7396_v57, %v4838_v36  ;;  %v3310_v61 = vmax.f32 %v7393_v38, %v4837_v15  ;;  %v3326_v14 = vpop.permute.xlu1 %3325  ;;  %v5056_v38 = vld [vmem:[%s7688_s11 + $0x40] sm:$0xff]   ;;  %v5058_v57 = vld [vmem:[%s7688_s11 + $0x48] sm:$0xff]  }
 0x547   :  { %v3323_v18 = vpop.permute.xlu0 %3322  ;;  %v3344_v43 = vsel %vm283_vm2, %v7379_v17, %v3326_v14  ;;  %v5057_v17 = vld [vmem:[%s7688_s11] sm:$0xff]   ;;  %4498 = vmatprep.subr.bf16.mxu1 %v5056_v38 }
 0x548   :  { %v3313_v11 = vmax.f32 %v3311_v3, %v3301_v29  ;;  %v3312_v16 = vmax.f32 %v3310_v61, %v3299_v22  ;;  %v3340_v8 = vsel %vm283_vm2, %v2906_v19, %v3323_v18  ;;  %3968 = vmatprep.mubr.bf16.mxu0 %v3344_v43 }
 0x549   :  { %3969 = vmatmul.mubr.bf16.vlgmr.msra.gmra.mrb[88].mxu0 %v3340_v8 }
 0x54a   :  { %v3314_v60 = vpack.c.bf16 %v3313_v11, %v3312_v16  ;;  %v4492_v11 = vld [vmem:[%s7692_s14] ss:$0 sm:$0xff] }
 0x54c   :  { %4474 = vmatprep.mubr.msk.bf16.mxu1 %vm283_vm2, %v3314_v60 }
 0x586   :  { %v3329_v23 = vpop.permute.xlu1 %3328 }
 0x587   :  { %v3348_v10 = vsel %vm283_vm2, %v3178_v28, %v3329_v23 }
 0x588   :  { %4012 = vmatmul.mubr.bf16.vlgmr.msra.gmra.mrb[88].mxu1 %v3348_v10 }
 0x589   :  { %4499 = vmatpush3.bf16.msra.mxu1 %v5057_v17 }
 0x58a   :  { %4500 = vmatprep.subr.bf16.mxu1 %v5058_v57 }
 0x58d   :  { %4501 = vmatpush3.bf16.msra.mxu1 %v5059_v32 }
 0x58e   :  { %4502 = vmatprep.subr.bf16.mxu1 %v5060_v26 }
 0x591   :  { %4503 = vmatpush3.bf16.msra.mxu1 %v5061_v6 }
 0x592   :  { %4504 = vmatprep.subr.bf16.mxu1 %v5062_v9 }
 0x595   :  { %4505 = vmatpush3.bf16.msra.mxu1 %v5063_v35 }
 0x596   :  { %4506 = vmatprep.subr.bf16.mxu1 %v5064_v13 }
 0x599   :  { %4507 = vmatpush3.bf16.msra.mxu1 %v5065_v49 }
 0x59a   :  { %4508 = vmatprep.subr.bf16.mxu1 %v5066_v30 }
 0x59d   :  { %4509 = vmatpush3.bf16.msra.mxu1 %v5067_v0 }
 0x59e   :  { %4510 = vmatprep.subr.bf16.mxu1 %v5068_v46 }
 0x5a1   :  { %4511 = vmatpush3.bf16.msra.mxu1 %v5069_v33 }
 0x5a2   :  { %4512 = vmatprep.subr.bf16.mxu1 %v5070_v24 }
 0x5a5   :  { %4513 = vmatpush3.bf16.msra.mxu1 %v5071_v50 }
 0x5a6   :  { %4525 = vmatprep.subr.bf16.mxu1 %v5140_v53 }
 0x61c   :  { %v3970_v28 = vpop.f32.mrb[88].mxu0 }
 0x61d   :  { %v3972_v27 = vpop.f32.mrb[89].mxu0  ;;  %v4537_v2 = vadd.f32 %v3970_v28, %v3443_v59 }
 0x61e   :  { %v3974_v12 = vpop.f32.mrb[90].mxu0  ;;  %v4539_v51 = vadd.f32 %v3972_v27, %v3447_v58 }
 0x61f   :  { %v3976_v1 = vpop.f32.mrb[91].mxu0  ;;  %v4541_v47 = vadd.f32 %v3974_v12, %v3443_v59 }
 0x620   :  { %v4543_v7 = vadd.f32 %v3976_v1, %v3447_v58 }
 0x65b   :  { %v4013_v54 = vpop.f32.mrb[88].mxu1 }
 0x65c   :  { %v4538_v21 = vadd.f32 %v4537_v2, %v4013_v54  ;;  %v4015_v55 = vpop.f32.mrb[89].mxu1 }
 0x65d   :  { %v4540_v62 = vadd.f32 %v4539_v51, %v4015_v55  ;;  %v4017_v41 = vpop.f32.mrb[90].mxu1 }
 0x65e   :  { %v4542_v39 = vadd.f32 %v4541_v47, %v4017_v41  ;;  %v4019_v5 = vpop.f32.mrb[91].mxu1  ;;  %v4022_v4 = vmax.f32 %v4538_v21, 0.0 }
 0x65f   :  { %v4544_v31 = vadd.f32 %v4543_v7, %v4019_v5  ;;  %v4023_v20 = vmax.f32 %v4540_v62, 0.0 }
 0x660   :  { %v4024_v42 = vmax.f32 %v4542_v39, 0.0 }
 0x661   :  { %v4025_v19 = vmax.f32 %v4544_v31, 0.0 }
 0x662   :  { %v4026_v63 = vpack.c.bf16 %v4024_v42, %v4022_v4 }
 0x663   :  { %v4027_v25 = vpack.c.bf16 %v4025_v19, %v4023_v20 }
 0x665   :  { %4195 = vmatprep.mubr.bf16.mxu1 %v4027_v25 }
 0x666   :  { %4196 = vmatmul.mubr.bf16.vlgmr.msra.gmra.mrb[92].mxu1 %v4026_v63 }
 0x667   :  { %4526 = vmatpush3.bf16.msra.mxu1 %v5072_v44  ;;  %4533 = vmatprep.mubr.msk.bf16.mxu1 %vm5141_vm4, %v5140_v53 }
 0x668   :  { %4527 = vmatprep.subr.bf16.mxu1 %v5140_v53 }
 0x66b   :  { %4528 = vmatpush3.bf16.msra.mxu1 %v5073_v48 }
 0x66c   :  { %4529 = vmatprep.subr.bf16.mxu1 %v5140_v53 }
 0x66f   :  { %4530 = vmatpush3.bf16.msra.mxu1 %v5074_v34 }
 0x670   :  { %4531 = vmatprep.subr.bf16.mxu1 %v5140_v53 }
 0x673   :  { %4532 = vmatpush3.bf16.msra.mxu1 %v5075_v56 }
 0x739   :  { %v4514_v52 = vpop.f32.mrb[92].mxu1 }
 0x73a   :  { %v4515_v45 = vpop.f32.mrb[93].mxu1 }
 0x73b   :  { %v4516_v36 = vadd.f32 %v4515_v45, %v4514_v52  ;;  %v4517_v15 = vpop.f32.mrb[94].mxu1 }
 0x73c   :  { %v4518_v22 = vpop.f32.mrb[95].mxu1 }
 0x73d   :  { %v4198_v29 = vadd.f32 %v4516_v36, %v4475_v37  ;;  %v4519_v3 = vadd.f32 %v4518_v22, %v4517_v15 }
 0x73f   :  { %v4201_v61 = vadd.f32 %v4519_v3, %v4475_v37  ;;  %v4204_v14 = vmax.f32 %v4198_v29, 0.0 }
 0x741   :  { %v4205_v18 = vmax.f32 %v4201_v61, 0.0 }
 0x743   :  { %v4206_v43 = vpack.c.bf16 %v4205_v18, %v4204_v14 }
 0x745   :  { %4534 = vmatmul.mubr.msk.bf16.vlgmr.msra.gmra.mrb[96].mxu1 %vm283_vm2, %v4206_v43 }
 0x818   :  { %v4283_v16 = vpop.f32.mrb[96].mxu1 }
 0x819   :  { %v4284_v8 = vadd.f32 %v4492_v11, %v4283_v16  ;;  %v4535_v60 = vpop.f32.mrb[97].mxu1 }
 0x81a   :  { %v4286_v23 = vpop.f32.mrb[98].mxu1 }
 0x81b   :  { %4290 = vst [vmem:[%s7693_s15] sm:$0xff] %v4284_v8  ;;  %v4287_v10 = vadd.f32 %v4492_v11, %v4286_v23  ;;  %v4536_v38 = vpop.f32.mrb[99].mxu1 }
 0x81d   :  { %4291 = vst [vmem:[%s7693_s15 + $0x8] sm:$0xff] %v4287_v10 }

</bundles_post_ra>
